<compile_context>
chip_gen: v6e
topology: v6e:2x2x1
jax: 0.10.0
libtpu: 0.0.40
codegen_flags: <defaults>
</compile_context>

<pallas_src>
import functools
import math

import jax
import jax.numpy as jnp
from jax.experimental import pallas as pl
from jax.experimental.pallas import tpu as pltpu


def _vmem_limit(nbytes):
    """Explicit scoped-VMEM request: 2x estimated resident bytes + headroom,
    clamped to a range that is safe on v5e/v6e (128 MiB phys) and v7x (64 MiB)."""
    return int(min(max(2 * nbytes + (4 << 20), 16 << 20), 40 << 20))


# ----------------------------- conv matmul kernel -----------------------------

def _conv_mm_relu_kernel(a_ref, w_ref, o_ref):
    acc = jnp.dot(a_ref[...], w_ref[...], preferred_element_type=jnp.float32)
    o_ref[...] = jnp.maximum(acc, 0.0).astype(o_ref.dtype)   # fused ReLU, bf16 store


def _pick_tile_m(m, max_tile=512):
    """Largest M-tile <= max_tile dividing M with >= 2 grid steps (dual-TC friendly)."""
    for t in (512, 256, 128, 64, 32, 16, 8):
        if t <= max_tile and m % t == 0 and m // t >= 2:
            return t
    return m


def conv2d_via_pallas(x, w, stride, padding):
    """x: (B, H, W, Cin) NHWC bf16; w: (Cout, Cin, kh, kw) PyTorch layout, bias=False.
    im2col extraction stays as wrapper glue at these tiny sizes; the contraction +
    ReLU runs in a Pallas kernel, M-tiled with a 'parallel' grid axis.  Returns bf16.
    TODO(synk): at real image sizes im2col should move inside the kernel (shifted
    in-kernel loads) to avoid the kh*kw-fold HBM expansion of `patches`."""
    B, H, W, Cin = x.shape
    Cout, _, kh, kw = w.shape
    xp = jnp.pad(x, ((0, 0), (padding, padding), (padding, padding), (0, 0)))
    Ho = (H + 2 * padding - kh) // stride + 1
    Wo = (W + 2 * padding - kw) // stride + 1
    cols = []
    for di in range(kh):
        for dj in range(kw):
            cols.append(xp[:, di:di + stride * (Ho - 1) + 1:stride,
                           dj:dj + stride * (Wo - 1) + 1:stride, :])
    patches = jnp.stack(cols, axis=3)                     # (B, Ho, Wo, kh*kw, Cin) bf16
    patches = patches.reshape(B * Ho * Wo, kh * kw * Cin)
    w_mat = jnp.transpose(w, (2, 3, 1, 0)).reshape(kh * kw * Cin, Cout)
    w_mat = w_mat.astype(jnp.bfloat16)                    # bf16 MXU operands, f32 acc

    M, K = patches.shape
    Kp = ((K + 127) // 128) * 128                         # lane-dense contraction dim
    if Kp != K:
        patches = jnp.pad(patches, ((0, 0), (0, Kp - K)))
        w_mat = jnp.pad(w_mat, ((0, Kp - K), (0, 0)))

    tile_m = _pick_tile_m(M)
    vmem = _vmem_limit(2 * (tile_m * Kp + Kp * Cout + tile_m * Cout) * 2)
    out = pl.pallas_call(
        _conv_mm_relu_kernel,
        out_shape=jax.ShapeDtypeStruct((M, Cout), jnp.bfloat16),
        grid=(M // tile_m,),
        in_specs=[pl.BlockSpec((tile_m, Kp), lambda i: (i, 0)),
                  pl.BlockSpec((Kp, Cout), lambda i: (0, 0))],
        out_specs=pl.BlockSpec((tile_m, Cout), lambda i: (i, 0)),
        compiler_params=pltpu.CompilerParams(
            dimension_semantics=("parallel",),
            vmem_limit_bytes=vmem),
    )(patches, w_mat)
    return out.reshape(B, Ho, Wo, Cout)


def max_blur_pool(x):
    """kornia MaxBlurPool2D(kernel_size=3, stride=2, max_pool_size=2, ceil_mode=False):
    max_pool2d(k=2, stride=1, pad=0) then depthwise 3x3 binomial blur, stride 2, pad 1.
    Feature maps here are tiny, so this stays as plain-JAX glue (bf16 in/out, f32 acc).
    TODO(synk): verify exact kornia padding/ceil semantics for the target config."""
    m = jnp.maximum(jnp.maximum(x[:, :-1, :-1], x[:, 1:, :-1]),
                    jnp.maximum(x[:, :-1, 1:], x[:, 1:, 1:]))
    B, Hm, Wm, C = m.shape
    p = jnp.pad(m.astype(jnp.float32), ((0, 0), (1, 1), (1, 1), (0, 0)))
    Ho = (Hm + 2 - 3) // 2 + 1
    Wo = (Wm + 2 - 3) // 2 + 1
    blur = jnp.array([1.0, 2.0, 1.0], jnp.float32)
    blur = (blur[:, None] * blur[None, :]) / 16.0
    out = jnp.zeros((B, Ho, Wo, C), jnp.float32)
    for di in range(3):
        for dj in range(3):
            out = out + blur[di, dj] * p[:, di:di + 2 * (Ho - 1) + 1:2,
                                          dj:dj + 2 * (Wo - 1) + 1:2, :]
    return out.astype(x.dtype)


# ----------------------------- fused transformer kernel -----------------------------

def _pick_batch_tile(B, S, target_m=128):
    """Batch elements per grid step: flatten toward target_m matmul rows, but keep
    >= 2 parallel grid steps when B >= 2 so a dual-TC chip (v7x) is fully used."""
    bt = max(1, min(B, max(1, target_m // max(S, 1))))
    while bt > 1 and B % bt != 0:
        bt -= 1
    if B >= 2 and B // bt < 2:
        bt = max(1, B // 2)
        while bt > 1 and B % bt != 0:
            bt -= 1
    return bt


def _transformer_kernel(
        tok_ref, pos_ref, reg_ref,
        ln1_g, ln1_b, q_w, q_b, k_w, k_b, v_w, v_b, proj_w, proj_b,
        ln2_g, ln2_b, fc1_w, fc1_b, fc2_w, fc2_b,
        norm_g, norm_b,
        out_ref, x_scr,
        *, Bt, P, R, D, H, eps):
    """One grid step = (one batch tile, one transformer block).  The residual
    stream is carried across the depth grid axis in a VMEM scratch, so only one
    block's weights are resident at a time (streamed via BlockSpec)."""
    S = P + R
    M = Bt * S
    Dh = D // H
    scale = 1.0 / math.sqrt(Dh)
    l = pl.program_id(1)

    def ln(v, g_ref, b_ref):
        g = g_ref[0]                                        # (1, D)
        b = b_ref[0]
        mu = jnp.mean(v, axis=-1, keepdims=True)
        vc = v - mu
        var = jnp.mean(vc * vc, axis=-1, keepdims=True)
        return vc * jax.lax.rsqrt(var + eps) * g + b

    def mm(a, w_ref, b_ref):        # bf16 MXU operands, f32 accumulate, fused bias
        return jnp.dot(a.astype(jnp.bfloat16), w_ref[0],
                       preferred_element_type=jnp.float32) + b_ref[0]

    # ---- token assembly (first block only): [patch tokens + pos ; register tokens]
    # Patch tokens first so the final output slice starts at sublane 0.
    @pl.when(l == 0)
    def _():
        patches = tok_ref[...] + pos_ref[...]               # (Bt, P, D)
        for b in range(Bt):
            x_scr[b * S:b * S + P, :] = patches[b]
            x_scr[b * S + P:(b + 1) * S, :] = reg_ref[0]

    x = x_scr[...]                                          # (M, D) f32 residual stream

    # ---- pre-norm multi-head self-attention ----
    h = ln(x, ln1_g, ln1_b)
    q = (mm(h, q_w, q_b) * scale).reshape(Bt, S, D)         # scale q, not the scores
    k = mm(h, k_w, k_b).reshape(Bt, S, D)
    v = mm(h, v_w, v_b).reshape(Bt, S, D)
    heads = []
    for hh in range(H):                                     # static head loop
        sl = slice(hh * Dh, (hh + 1) * Dh)
        qh, kh, vh = q[:, :, sl], k[:, :, sl], v[:, :, sl]  # (Bt, S, Dh)
        s = jnp.einsum('bqd,bkd->bqk', qh, kh, preferred_element_type=jnp.float32)
        s = s - jnp.max(s, axis=-1, keepdims=True)
        p = jnp.exp(s)
        p = p / jnp.sum(p, axis=-1, keepdims=True)          # exact softmax normalization
        heads.append(jnp.einsum('bqk,bkd->bqd', p, vh,
                                preferred_element_type=jnp.float32))
    attn = jnp.concatenate(heads, axis=-1).reshape(M, D)    # stays in vregs, no scratch
    x = x + mm(attn, proj_w, proj_b)                        # fused residual + bias

    # ---- pre-norm MLP ----
    h = ln(x, ln2_g, ln2_b)
    h = mm(h, fc1_w, fc1_b)
    # TODO(synk): PyTorch nn.GELU defaults to exact erf GELU; tanh approximation
    # used here (EUP-friendly), max abs diff ~1e-3 vs the exact form.
    h = jax.nn.gelu(h, approximate=True)
    x = x + mm(h, fc2_w, fc2_b)                             # fused residual + bias

    x_scr[...] = x                                          # carry to next block

    # ---- final LayerNorm + drop register tokens (last block only) ----
    @pl.when(l == pl.num_programs(1) - 1)
    def _():
        y = ln(x, norm_g, norm_b)
        for b in range(Bt):
            out_ref[b] = y[b * S:b * S + P, :]


def transformer_forward(tokens, params, num_heads):
    """ViT-style pre-norm transformer with DINOv2-style register tokens.
    dropout / stochastic depth are 0 in this deterministic (eval-equivalent) run.
    TODO(synk): the original Transformer class body is not provided; a standard
    pre-norm ViT block (LN->MHSA->res, LN->MLP->res, final LN) is assumed."""
    B, P, D = tokens.shape
    R = params["register_tokens"].shape[1]
    S = P + R
    depth = len(params["blocks"])
    Hd = params["blocks"][0]["fc1_w"].shape[1]
    eps = 1e-5                                     # PyTorch nn.LayerNorm default
    Bt = _pick_batch_tile(B, S)
    nb = B // Bt

    f32, bf16 = jnp.float32, jnp.bfloat16

    def stack(fn, dtype):
        return jnp.stack([jnp.asarray(fn(blk), dtype) for blk in params["blocks"]],
                         axis=0)

    # Split fused qkv into three aligned (D, D) matmuls (q/k/v each land at lane 0).
    q_w = stack(lambda b: b["qkv_w"][:, 0 * D:1 * D], bf16)
    k_w = stack(lambda b: b["qkv_w"][:, 1 * D:2 * D], bf16)
    v_w = stack(lambda b: b["qkv_w"][:, 2 * D:3 * D], bf16)
    q_b = stack(lambda b: b["qkv_b"][0 * D:1 * D].reshape(1, D), f32)
    k_b = stack(lambda b: b["qkv_b"][1 * D:2 * D].reshape(1, D), f32)
    v_b = stack(lambda b: b["qkv_b"][2 * D:3 * D].reshape(1, D), f32)

    inputs = [
        jnp.asarray(tokens, f32),                                   # 0
        jnp.asarray(params["pos_embed"], f32),                      # 1
        jnp.asarray(params["register_tokens"], f32),                # 2
        stack(lambda b: b["ln1_g"].reshape(1, D), f32),             # 3
        stack(lambda b: b["ln1_b"].reshape(1, D), f32),             # 4
        q_w, q_b, k_w, k_b, v_w, v_b,                               # 5..10
        stack(lambda b: b["proj_w"], bf16),                         # 11
        stack(lambda b: b["proj_b"].reshape(1, D), f32),            # 12
        stack(lambda b: b["ln2_g"].reshape(1, D), f32),             # 13
        stack(lambda b: b["ln2_b"].reshape(1, D), f32),             # 14
        stack(lambda b: b["fc1_w"], bf16),                          # 15
        stack(lambda b: b["fc1_b"].reshape(1, Hd), f32),            # 16
        stack(lambda b: b["fc2_w"], bf16),                          # 17
        stack(lambda b: b["fc2_b"].reshape(1, D), f32),             # 18
        jnp.asarray(params["norm_g"], f32).reshape(1, 1, D),        # 19
        jnp.asarray(params["norm_b"], f32).reshape(1, 1, D),        # 20
    ]

    def blk_spec(arr):          # per-depth streamed weight/bias
        nd = arr.ndim
        return pl.BlockSpec((1,) + arr.shape[1:],
                            lambda b, l, _nd=nd: (l,) + (0,) * (_nd - 1))

    def const_spec(arr):        # fetched once, constant across the grid
        nd = arr.ndim
        return pl.BlockSpec(arr.shape, lambda b, l, _nd=nd: (0,) * _nd)

    in_specs = [pl.BlockSpec((Bt, P, D), lambda b, l: (b, 0, 0)),
                const_spec(inputs[1]), const_spec(inputs[2])]
    in_specs += [blk_spec(a) for a in inputs[3:19]]
    in_specs += [const_spec(inputs[19]), const_spec(inputs[20])]

    # Rough per-step resident bytes (one block's weights, double-buffered) for the
    # explicit scoped-VMEM request.
    blk_bytes = (4 * D * D + 2 * D * Hd) * 2 + (6 * D + Hd) * 4
    act_bytes = (2 * Bt * P * D + (P + R) * D + Bt * S * D) * 4
    vmem = _vmem_limit(2 * blk_bytes + act_bytes)

    # Note: output is (B, P, D); at realistic D (>=128) this store is already
    # lane-dense.  Lane-packing P*D for the tiny demo D=64 was skipped for
    # lowering robustness.
    out = pl.pallas_call(
        functools.partial(_transformer_kernel, Bt=Bt, P=P, R=R, D=D,
                          H=num_heads, eps=eps),
        out_shape=jax.ShapeDtypeStruct((B, P, D), jnp.float32),
        grid=(nb, depth),
        in_specs=in_specs,
        out_specs=pl.BlockSpec((Bt, P, D), lambda b, l: (b, 0, 0)),
        scratch_shapes=[pltpu.VMEM((Bt * S, D), jnp.float32)],   # residual-stream carry
        compiler_params=pltpu.CompilerParams(
            dimension_semantics=("parallel", "arbitrary"),
            vmem_limit_bytes=vmem),
    )(*inputs)
    return out


# ----------------------------- model forward -----------------------------

def tokenizer_forward(x_nchw, params, patch_size, masks=None):
    """SparseCNNTokenizer.forward — input NCHW like PyTorch, internal NHWC."""
    B, Cin, H, W = x_nchw.shape
    fmap_hw = H // patch_size
    x = jnp.transpose(x_nchw, (0, 2, 3, 1)).astype(jnp.float32)  # NHWC
    if masks is not None:
        m = masks.reshape(B, fmap_hw, fmap_hw).astype(jnp.float32)
        m = jnp.repeat(jnp.repeat(m, patch_size, axis=1), patch_size, axis=2)
        x = x * m[..., None]
    x = x.astype(jnp.bfloat16)
    # TODO(synk): sparsify.dense_model_to_sparse re-masking after each conv/pool
    # (sparsify._cur_active) is identity for the dense / all-ones-mask path
    # exercised here; masked-token sparse convs not modeled.
    x = conv2d_via_pallas(x, params["conv1_w"], stride=2, padding=3)
    x = max_blur_pool(x)
    x = conv2d_via_pallas(x, params["conv2_w"], stride=2, padding=3)
    x = max_blur_pool(x)
    B_, h, w, C = x.shape
    # rearrange 'b c h w -> b (h w) c'  (NHWC already has channel last)
    return x.reshape(B_, h * w, C).astype(jnp.float32)


def scott_forward(x, params, patch_size, num_heads, masks=None):
    tokens = tokenizer_forward(x, params, patch_size, masks)
    return transformer_forward(tokens, params, num_heads)


# ----------------------------- parameters -----------------------------

def init_params(key, in_channels, embed_dim, depth, mlp_ratio,
                num_patches, num_register_tokens):
    keys = jax.random.split(key, 8 + depth * 8)
    ki = iter(keys)

    def kaiming(k, shape):  # conv weight (Cout, Cin, kh, kw), kaiming_normal_ fan_in
        fan_in = shape[1] * shape[2] * shape[3]
        return jax.random.normal(k, shape, jnp.float32) * math.sqrt(2.0 / fan_in)

    def tn(k, shape, std=0.02):
        return jax.random.normal(k, shape, jnp.float32) * std

    hidden = int(embed_dim * mlp_ratio)
    params = {
        "conv1_w": kaiming(next(ki), (64, in_channels, 7, 7)),
        "conv2_w": kaiming(next(ki), (embed_dim, 64, 7, 7)),
        "pos_embed": tn(next(ki), (1, num_patches, embed_dim)),
        "register_tokens": tn(next(ki), (1, num_register_tokens, embed_dim)),
        "norm_g": jnp.ones((embed_dim,), jnp.float32),
        "norm_b": jnp.zeros((embed_dim,), jnp.float32),
        "blocks": [],
    }
    for _ in range(depth):
        params["blocks"].append({
            "ln1_g": jnp.ones((embed_dim,), jnp.float32),
            "ln1_b": jnp.zeros((embed_dim,), jnp.float32),
            "qkv_w": tn(next(ki), (embed_dim, 3 * embed_dim)),
            "qkv_b": jnp.zeros((3 * embed_dim,), jnp.float32),
            "proj_w": tn(next(ki), (embed_dim, embed_dim)),
            "proj_b": jnp.zeros((embed_dim,), jnp.float32),
            "ln2_g": jnp.ones((embed_dim,), jnp.float32),
            "ln2_b": jnp.zeros((embed_dim,), jnp.float32),
            "fc1_w": tn(next(ki), (embed_dim, hidden)),
            "fc1_b": jnp.zeros((hidden,), jnp.float32),
            "fc2_w": tn(next(ki), (hidden, embed_dim)),
            "fc2_b": jnp.zeros((embed_dim,), jnp.float32),
        })
    return params


# ----------------------------- main -----------------------------

if __name__ == "__main__":
    # Small, consistent config: downsample factor of the tokenizer stack is 16,
    # so patch_size must be 16.
    B = 2
    img_size, patch_size, in_channels = 32, 16, 3
    embed_dim, depth, num_heads, mlp_ratio = 64, 2, 4, 2.0
    num_register_tokens = 2
    fmap_hw = img_size // patch_size
    num_patches = fmap_hw * fmap_hw

    key = jax.random.PRNGKey(0)
    kx, kp = jax.random.split(key)
    x = jax.random.normal(kx, (B, in_channels, img_size, img_size), jnp.float32)  # NCHW

    params = init_params(kp, in_channels, embed_dim, depth, mlp_ratio,
                         num_patches, num_register_tokens)

    fwd = jax.jit(functools.partial(scott_forward, patch_size=patch_size,
                                    num_heads=num_heads))
    out = fwd(x, params)
    out = jax.block_until_ready(out)
    assert out.shape == (B, num_patches, embed_dim), out.shape
    assert bool(jnp.all(jnp.isfinite(out)))
    print("KERNEL_OK")
</pallas_src>

<mosaic_0001>
module attributes {stable_mosaic.version = 11 : i64} {
  func.func @_conv_mm_relu_kernel(%arg0: i32, %arg1: memref<256x256xbf16, #tpu.memory_space<vmem>>, %arg2: memref<256x64xbf16, #tpu.memory_space<vmem>>, %arg3: memref<256x64xbf16, #tpu.memory_space<vmem>>) attributes {dimension_semantics = [#tpu.dimension_semantics<parallel>], iteration_bounds = array<i64: 2>, scalar_prefetch = 0 : i64, scratch_operands = 0 : i64, tpu.core_type = #tpu.core_type<tc>, window_params = [{transform_indices = @transform_0, window_bounds = array<i64: 256, 256>}, {pipeline_mode = #tpu.pipeline_mode<synchronous>, transform_indices = @transform_1, window_bounds = array<i64: 256, 64>}, {transform_indices = @transform_2, window_bounds = array<i64: 256, 64>}]} {
    %c0 = arith.constant 0 : index
    %c0_0 = arith.constant 0 : index
    %0 = vector.load %arg1[%c0, %c0_0] : memref<256x256xbf16, #tpu.memory_space<vmem>>, vector<256x256xbf16>
    %c0_1 = arith.constant 0 : index
    %c0_2 = arith.constant 0 : index
    %1 = vector.load %arg2[%c0_1, %c0_2] : memref<256x64xbf16, #tpu.memory_space<vmem>>, vector<256x64xbf16>
    %cst = arith.constant dense<0.000000e+00> : vector<256x64xf32>
    %2 = tpu.matmul %0, %1, %cst {dimension_numbers = #tpu.dot_dimension_numbers<[1], [0], [0], [1], [0, 0, 1, 1], [], []>} : vector<256x256xbf16>, vector<256x64xbf16>, vector<256x64xf32> -> vector<256x64xf32>
    %cst_3 = arith.constant 0.000000e+00 : f32
    %3 = vector.broadcast %cst_3 : f32 to vector<256x64xf32>
    %4 = arith.maximumf %2, %3 : vector<256x64xf32>
    %5 = arith.truncf %4 : vector<256x64xf32> to vector<256x64xbf16>
    %c0_4 = arith.constant 0 : index
    %c0_5 = arith.constant 0 : index
    %6 = vector.load %arg3[%c0_4, %c0_5] : memref<256x64xbf16, #tpu.memory_space<vmem>>, vector<256x64xbf16>
    tpu.vector_store %arg3[%c0_4, %c0_5], %5 {strides = array<i32>} : memref<256x64xbf16, #tpu.memory_space<vmem>>, vector<256x64xbf16>,
    return
  }
  func.func @transform_0(%arg0: i32) -> (i32, i32) {
    %c0_i32 = arith.constant 0 : i32
    %c0_i32_0 = arith.constant 0 : i32
    return %arg0, %c0_i32 : i32, i32
  }
  func.func @transform_1(%arg0: i32) -> (i32, i32) {
    %c0_i32 = arith.constant 0 : i32
    %c0_i32_0 = arith.constant 0 : i32
    %c0_i32_1 = arith.constant 0 : i32
    return %c0_i32, %c0_i32_0 : i32, i32
  }
  func.func @transform_2(%arg0: i32) -> (i32, i32) {
    %c0_i32 = arith.constant 0 : i32
    %c0_i32_0 = arith.constant 0 : i32
    return %arg0, %c0_i32 : i32, i32
  }
}

module attributes {stable_mosaic.version = 11 : i64} {
  func.func @_conv_mm_relu_kernel(%arg0: i32, %arg1: memref<16x3200xbf16, #tpu.memory_space<vmem>>, %arg2: memref<3200x64xbf16, #tpu.memory_space<vmem>>, %arg3: memref<16x64xbf16, #tpu.memory_space<vmem>>) attributes {dimension_semantics = [#tpu.dimension_semantics<parallel>], iteration_bounds = array<i64: 2>, scalar_prefetch = 0 : i64, scratch_operands = 0 : i64, tpu.core_type = #tpu.core_type<tc>, window_params = [{transform_indices = @transform_0, window_bounds = array<i64: 16, 3200>}, {pipeline_mode = #tpu.pipeline_mode<synchronous>, transform_indices = @transform_1, window_bounds = array<i64: 3200, 64>}, {transform_indices = @transform_2, window_bounds = array<i64: 16, 64>}]} {
    %c0 = arith.constant 0 : index
    %c0_0 = arith.constant 0 : index
    %0 = vector.load %arg1[%c0, %c0_0] : memref<16x3200xbf16, #tpu.memory_space<vmem>>, vector<16x3200xbf16>
    %c0_1 = arith.constant 0 : index
    %c0_2 = arith.constant 0 : index
    %1 = vector.load %arg2[%c0_1, %c0_2] : memref<3200x64xbf16, #tpu.memory_space<vmem>>, vector<3200x64xbf16>
    %cst = arith.constant dense<0.000000e+00> : vector<16x64xf32>
    %2 = tpu.matmul %0, %1, %cst {dimension_numbers = #tpu.dot_dimension_numbers<[1], [0], [0], [1], [0, 0, 1, 1], [], []>} : vector<16x3200xbf16>, vector<3200x64xbf16>, vector<16x64xf32> -> vector<16x64xf32>
    %cst_3 = arith.constant 0.000000e+00 : f32
    %3 = vector.broadcast %cst_3 : f32 to vector<16x64xf32>
    %4 = arith.maximumf %2, %3 : vector<16x64xf32>
    %5 = arith.truncf %4 : vector<16x64xf32> to vector<16x64xbf16>
    %c0_4 = arith.constant 0 : index
    %c0_5 = arith.constant 0 : index
    %6 = vector.load %arg3[%c0_4, %c0_5] : memref<16x64xbf16, #tpu.memory_space<vmem>>, vector<16x64xbf16>
    tpu.vector_store %arg3[%c0_4, %c0_5], %5 {strides = array<i32>} : memref<16x64xbf16, #tpu.memory_space<vmem>>, vector<16x64xbf16>,
    return
  }
  func.func @transform_0(%arg0: i32) -> (i32, i32) {
    %c0_i32 = arith.constant 0 : i32
    %c0_i32_0 = arith.constant 0 : i32
    return %arg0, %c0_i32 : i32, i32
  }
  func.func @transform_1(%arg0: i32) -> (i32, i32) {
    %c0_i32 = arith.constant 0 : i32
    %c0_i32_0 = arith.constant 0 : i32
    %c0_i32_1 = arith.constant 0 : i32
    return %c0_i32, %c0_i32_0 : i32, i32
  }
  func.func @transform_2(%arg0: i32) -> (i32, i32) {
    %c0_i32 = arith.constant 0 : i32
    %c0_i32_0 = arith.constant 0 : i32
    return %arg0, %c0_i32 : i32, i32
  }
}

module attributes {stable_mosaic.version = 11 : i64} {
  func.func @_transformer_kernel(%arg0: i32, %arg1: i32, %arg2: memref<1x4x64xf32, #tpu.memory_space<vmem>>, %arg3: memref<1x4x64xf32, #tpu.memory_space<vmem>>, %arg4: memref<1x2x64xf32, #tpu.memory_space<vmem>>, %arg5: memref<1x1x64xf32, #tpu.memory_space<vmem>>, %arg6: memref<1x1x64xf32, #tpu.memory_space<vmem>>, %arg7: memref<1x64x64xbf16, #tpu.memory_space<vmem>>, %arg8: memref<1x1x64xf32, #tpu.memory_space<vmem>>, %arg9: memref<1x64x64xbf16, #tpu.memory_space<vmem>>, %arg10: memref<1x1x64xf32, #tpu.memory_space<vmem>>, %arg11: memref<1x64x64xbf16, #tpu.memory_space<vmem>>, %arg12: memref<1x1x64xf32, #tpu.memory_space<vmem>>, %arg13: memref<1x64x64xbf16, #tpu.memory_space<vmem>>, %arg14: memref<1x1x64xf32, #tpu.memory_space<vmem>>, %arg15: memref<1x1x64xf32, #tpu.memory_space<vmem>>, %arg16: memref<1x1x64xf32, #tpu.memory_space<vmem>>, %arg17: memref<1x64x128xbf16, #tpu.memory_space<vmem>>, %arg18: memref<1x1x128xf32, #tpu.memory_space<vmem>>, %arg19: memref<1x128x64xbf16, #tpu.memory_space<vmem>>, %arg20: memref<1x1x64xf32, #tpu.memory_space<vmem>>, %arg21: memref<1x1x64xf32, #tpu.memory_space<vmem>>, %arg22: memref<1x1x64xf32, #tpu.memory_space<vmem>>, %arg23: memref<1x4x64xf32, #tpu.memory_space<vmem>>, %arg24: memref<6x64xf32, #tpu.memory_space<vmem>>) attributes {dimension_semantics = [#tpu.dimension_semantics<parallel>, #tpu.dimension_semantics<arbitrary>], iteration_bounds = array<i64: 2, 2>, scalar_prefetch = 0 : i64, scratch_operands = 1 : i64, tpu.core_type = #tpu.core_type<tc>, window_params = [{transform_indices = @transform_0, window_bounds = array<i64: 1, 4, 64>}, {pipeline_mode = #tpu.pipeline_mode<synchronous>, transform_indices = @transform_1, window_bounds = array<i64: 1, 4, 64>}, {pipeline_mode = #tpu.pipeline_mode<synchronous>, transform_indices = @transform_2, window_bounds = array<i64: 1, 2, 64>}, {transform_indices = @transform_3, window_bounds = array<i64: 1, 1, 64>}, {transform_indices = @transform_4, window_bounds = array<i64: 1, 1, 64>}, {transform_indices = @transform_5, window_bounds = array<i64: 1, 64, 64>}, {transform_indices = @transform_6, window_bounds = array<i64: 1, 1, 64>}, {transform_indices = @transform_7, window_bounds = array<i64: 1, 64, 64>}, {transform_indices = @transform_8, window_bounds = array<i64: 1, 1, 64>}, {transform_indices = @transform_9, window_bounds = array<i64: 1, 64, 64>}, {transform_indices = @transform_10, window_bounds = array<i64: 1, 1, 64>}, {transform_indices = @transform_11, window_bounds = array<i64: 1, 64, 64>}, {transform_indices = @transform_12, window_bounds = array<i64: 1, 1, 64>}, {transform_indices = @transform_13, window_bounds = array<i64: 1, 1, 64>}, {transform_indices = @transform_14, window_bounds = array<i64: 1, 1, 64>}, {transform_indices = @transform_15, window_bounds = array<i64: 1, 64, 128>}, {transform_indices = @transform_16, window_bounds = array<i64: 1, 1, 128>}, {transform_indices = @transform_17, window_bounds = array<i64: 1, 128, 64>}, {transform_indices = @transform_18, window_bounds = array<i64: 1, 1, 64>}, {pipeline_mode = #tpu.pipeline_mode<synchronous>, transform_indices = @transform_19, window_bounds = array<i64: 1, 1, 64>}, {pipeline_mode = #tpu.pipeline_mode<synchronous>, transform_indices = @transform_20, window_bounds = array<i64: 1, 1, 64>}, {transform_indices = @transform_21, window_bounds = array<i64: 1, 4, 64>}]} {
    %c0_i32 = arith.constant 0 : i32
    %0 = arith.cmpi eq, %arg1, %c0_i32 : i32
    %1 = arith.extui %0 : i1 to i32
    %c0_i32_0 = arith.constant 0 : i32
    %2 = arith.cmpi ne, %1, %c0_i32_0 : i32
    scf.if %2 {
      %c0_89 = arith.constant 0 : index
      %c0_90 = arith.constant 0 : index
      %c0_91 = arith.constant 0 : index
      %182 = vector.load %arg2[%c0_89, %c0_90, %c0_91] : memref<1x4x64xf32, #tpu.memory_space<vmem>>, vector<1x4x64xf32>
      %c0_92 = arith.constant 0 : index
      %c0_93 = arith.constant 0 : index
      %c0_94 = arith.constant 0 : index
      %183 = vector.load %arg3[%c0_92, %c0_93, %c0_94] : memref<1x4x64xf32, #tpu.memory_space<vmem>>, vector<1x4x64xf32>
      %184 = arith.addf %182, %183 : vector<1x4x64xf32>
      %185 = vector.shape_cast %184 : vector<1x4x64xf32> to vector<4x64xf32>
      %c0_95 = arith.constant 0 : index
      %c0_96 = arith.constant 0 : index
      %186 = vector.load %arg24[%c0_95, %c0_96] : memref<6x64xf32, #tpu.memory_space<vmem>>, vector<4x64xf32>
      tpu.vector_store %arg24[%c0_95, %c0_96], %185 {strides = array<i32>} : memref<6x64xf32, #tpu.memory_space<vmem>>, vector<4x64xf32>,
      %c0_97 = arith.constant 0 : index
      %c0_98 = arith.constant 0 : index
      %c0_99 = arith.constant 0 : index
      %187 = vector.load %arg4[%c0_97, %c0_98, %c0_99] : memref<1x2x64xf32, #tpu.memory_space<vmem>>, vector<1x2x64xf32>
      %188 = vector.shape_cast %187 : vector<1x2x64xf32> to vector<2x64xf32>
      %c4 = arith.constant 4 : index
      %c0_100 = arith.constant 0 : index
      %189 = vector.load %arg24[%c4, %c0_100] : memref<6x64xf32, #tpu.memory_space<vmem>>, vector<2x64xf32>
      tpu.vector_store %arg24[%c4, %c0_100], %188 {strides = array<i32>} : memref<6x64xf32, #tpu.memory_space<vmem>>, vector<2x64xf32>,
    } else {
    }
    %c0 = arith.constant 0 : index
    %c0_1 = arith.constant 0 : index
    %3 = vector.load %arg24[%c0, %c0_1] : memref<6x64xf32, #tpu.memory_space<vmem>>, vector<6x64xf32>
    %c0_2 = arith.constant 0 : index
    %c0_3 = arith.constant 0 : index
    %c0_4 = arith.constant 0 : index
    %4 = vector.load %arg5[%c0_2, %c0_3, %c0_4] : memref<1x1x64xf32, #tpu.memory_space<vmem>>, vector<1x1x64xf32>
    %5 = vector.shape_cast %4 : vector<1x1x64xf32> to vector<1x64xf32>
    %c0_5 = arith.constant 0 : index
    %c0_6 = arith.constant 0 : index
    %c0_7 = arith.constant 0 : index
    %6 = vector.load %arg6[%c0_5, %c0_6, %c0_7] : memref<1x1x64xf32, #tpu.memory_space<vmem>>, vector<1x1x64xf32>
    %7 = vector.shape_cast %6 : vector<1x1x64xf32> to vector<1x64xf32>
    %cst = arith.constant dense<0.000000e+00> : vector<6xf32>
    %8 = vector.multi_reduction <add>, %3, %cst [1] : vector<6x64xf32> to vector<6xf32>
    %9 = vector.shape_cast %8 : vector<6xf32> to vector<6x1xf32>
    %cst_8 = arith.constant 6.400000e+01 : f32
    %10 = vector.broadcast %cst_8 : f32 to vector<6x1xf32>
    %11 = arith.divf %9, %10 : vector<6x1xf32>
    %12 = vector.broadcast %11 : vector<6x1xf32> to vector<6x64xf32>
    %13 = arith.subf %3, %12 : vector<6x64xf32>
    %14 = arith.mulf %13, %13 : vector<6x64xf32>
    %cst_9 = arith.constant dense<0.000000e+00> : vector<6xf32>
    %15 = vector.multi_reduction <add>, %14, %cst_9 [1] : vector<6x64xf32> to vector<6xf32>
    %16 = vector.shape_cast %15 : vector<6xf32> to vector<6x1xf32>
    %cst_10 = arith.constant 6.400000e+01 : f32
    %17 = vector.broadcast %cst_10 : f32 to vector<6x1xf32>
    %18 = arith.divf %16, %17 : vector<6x1xf32>
    %cst_11 = arith.constant 9.99999974E-6 : f32
    %19 = vector.broadcast %cst_11 : f32 to vector<6x1xf32>
    %20 = arith.addf %18, %19 : vector<6x1xf32>
    %21 = math.rsqrt %20 : vector<6x1xf32>
    %22 = vector.broadcast %21 : vector<6x1xf32> to vector<6x64xf32>
    %23 = arith.mulf %13, %22 : vector<6x64xf32>
    %24 = vector.broadcast %5 : vector<1x64xf32> to vector<6x64xf32>
    %25 = arith.mulf %23, %24 : vector<6x64xf32>
    %26 = vector.broadcast %7 : vector<1x64xf32> to vector<6x64xf32>
    %27 = arith.addf %25, %26 : vector<6x64xf32>
    %28 = arith.truncf %27 : vector<6x64xf32> to vector<6x64xbf16>
    %c0_12 = arith.constant 0 : index
    %c0_13 = arith.constant 0 : index
    %c0_14 = arith.constant 0 : index
    %29 = vector.load %arg7[%c0_12, %c0_13, %c0_14] : memref<1x64x64xbf16, #tpu.memory_space<vmem>>, vector<1x64x64xbf16>
    %30 = vector.shape_cast %29 : vector<1x64x64xbf16> to vector<64x64xbf16>
    %cst_15 = arith.constant dense<0.000000e+00> : vector<6x64xf32>
    %31 = tpu.matmul %28, %30, %cst_15 {dimension_numbers = #tpu.dot_dimension_numbers<[1], [0], [0], [1], [0, 0, 1, 1], [], []>} : vector<6x64xbf16>, vector<64x64xbf16>, vector<6x64xf32> -> vector<6x64xf32>
    %c0_16 = arith.constant 0 : index
    %c0_17 = arith.constant 0 : index
    %c0_18 = arith.constant 0 : index
    %32 = vector.load %arg8[%c0_16, %c0_17, %c0_18] : memref<1x1x64xf32, #tpu.memory_space<vmem>>, vector<1x1x64xf32>
    %33 = vector.shape_cast %32 : vector<1x1x64xf32> to vector<1x64xf32>
    %34 = vector.broadcast %33 : vector<1x64xf32> to vector<6x64xf32>
    %35 = arith.addf %31, %34 : vector<6x64xf32>
    %cst_19 = arith.constant 2.500000e-01 : f32
    %36 = vector.broadcast %cst_19 : f32 to vector<6x64xf32>
    %37 = arith.mulf %35, %36 : vector<6x64xf32>
    %38 = vector.shape_cast %37 : vector<6x64xf32> to vector<1x6x64xf32>
    %39 = arith.truncf %27 : vector<6x64xf32> to vector<6x64xbf16>
    %c0_20 = arith.constant 0 : index
    %c0_21 = arith.constant 0 : index
    %c0_22 = arith.constant 0 : index
    %40 = vector.load %arg9[%c0_20, %c0_21, %c0_22] : memref<1x64x64xbf16, #tpu.memory_space<vmem>>, vector<1x64x64xbf16>
    %41 = vector.shape_cast %40 : vector<1x64x64xbf16> to vector<64x64xbf16>
    %cst_23 = arith.constant dense<0.000000e+00> : vector<6x64xf32>
    %42 = tpu.matmul %39, %41, %cst_23 {dimension_numbers = #tpu.dot_dimension_numbers<[1], [0], [0], [1], [0, 0, 1, 1], [], []>} : vector<6x64xbf16>, vector<64x64xbf16>, vector<6x64xf32> -> vector<6x64xf32>
    %c0_24 = arith.constant 0 : index
    %c0_25 = arith.constant 0 : index
    %c0_26 = arith.constant 0 : index
    %43 = vector.load %arg10[%c0_24, %c0_25, %c0_26] : memref<1x1x64xf32, #tpu.memory_space<vmem>>, vector<1x1x64xf32>
    %44 = vector.shape_cast %43 : vector<1x1x64xf32> to vector<1x64xf32>
    %45 = vector.broadcast %44 : vector<1x64xf32> to vector<6x64xf32>
    %46 = arith.addf %42, %45 : vector<6x64xf32>
    %47 = vector.shape_cast %46 : vector<6x64xf32> to vector<1x6x64xf32>
    %48 = arith.truncf %27 : vector<6x64xf32> to vector<6x64xbf16>
    %c0_27 = arith.constant 0 : index
    %c0_28 = arith.constant 0 : index
    %c0_29 = arith.constant 0 : index
    %49 = vector.load %arg11[%c0_27, %c0_28, %c0_29] : memref<1x64x64xbf16, #tpu.memory_space<vmem>>, vector<1x64x64xbf16>
    %50 = vector.shape_cast %49 : vector<1x64x64xbf16> to vector<64x64xbf16>
    %cst_30 = arith.constant dense<0.000000e+00> : vector<6x64xf32>
    %51 = tpu.matmul %48, %50, %cst_30 {dimension_numbers = #tpu.dot_dimension_numbers<[1], [0], [0], [1], [0, 0, 1, 1], [], []>} : vector<6x64xbf16>, vector<64x64xbf16>, vector<6x64xf32> -> vector<6x64xf32>
    %c0_31 = arith.constant 0 : index
    %c0_32 = arith.constant 0 : index
    %c0_33 = arith.constant 0 : index
    %52 = vector.load %arg12[%c0_31, %c0_32, %c0_33] : memref<1x1x64xf32, #tpu.memory_space<vmem>>, vector<1x1x64xf32>
    %53 = vector.shape_cast %52 : vector<1x1x64xf32> to vector<1x64xf32>
    %54 = vector.broadcast %53 : vector<1x64xf32> to vector<6x64xf32>
    %55 = arith.addf %51, %54 : vector<6x64xf32>
    %56 = vector.shape_cast %55 : vector<6x64xf32> to vector<1x6x64xf32>
    %57 = vector.extract_strided_slice %38 {offsets = [0, 0, 0], sizes = [1, 6, 16], strides = [1, 1, 1]} : vector<1x6x64xf32> to vector<1x6x16xf32>
    %58 = vector.extract_strided_slice %47 {offsets = [0, 0, 0], sizes = [1, 6, 16], strides = [1, 1, 1]} : vector<1x6x64xf32> to vector<1x6x16xf32>
    %59 = vector.extract_strided_slice %56 {offsets = [0, 0, 0], sizes = [1, 6, 16], strides = [1, 1, 1]} : vector<1x6x64xf32> to vector<1x6x16xf32>
    "tpu.trace_start"() <{level = 10 : i32, message = "bqd,bkd->bqk"}> : () -> ()
    %cst_34 = arith.constant dense<0.000000e+00> : vector<1x6x6xf32>
    %60 = tpu.matmul %57, %58, %cst_34 {dimension_numbers = #tpu.dot_dimension_numbers<[2], [2], [1], [1], [0, 0, 0, 1, 1, 1], [0], [0]>} : vector<1x6x16xf32>, vector<1x6x16xf32>, vector<1x6x6xf32> -> vector<1x6x6xf32>
    "tpu.trace_stop"() : () -> ()
    %cst_35 = arith.constant dense<0xFF800000> : vector<1x6xf32>
    %61 = vector.multi_reduction <maximumf>, %60, %cst_35 [2] : vector<1x6x6xf32> to vector<1x6xf32>
    %62 = vector.shape_cast %61 : vector<1x6xf32> to vector<1x6x1xf32>
    %63 = vector.broadcast %62 : vector<1x6x1xf32> to vector<1x6x6xf32>
    %64 = arith.subf %60, %63 : vector<1x6x6xf32>
    %65 = math.exp %64 : vector<1x6x6xf32>
    %cst_36 = arith.constant dense<0.000000e+00> : vector<1x6xf32>
    %66 = vector.multi_reduction <add>, %65, %cst_36 [2] : vector<1x6x6xf32> to vector<1x6xf32>
    %67 = vector.shape_cast %66 : vector<1x6xf32> to vector<1x6x1xf32>
    %68 = vector.broadcast %67 : vector<1x6x1xf32> to vector<1x6x6xf32>
    %69 = arith.divf %65, %68 : vector<1x6x6xf32>
    "tpu.trace_start"() <{level = 10 : i32, message = "bqk,bkd->bqd"}> : () -> ()
    %cst_37 = arith.constant dense<0.000000e+00> : vector<1x6x16xf32>
    %70 = tpu.matmul %69, %59, %cst_37 {dimension_numbers = #tpu.dot_dimension_numbers<[2], [1], [1], [2], [0, 0, 0, 1, 1, 2], [0], [0]>} : vector<1x6x6xf32>, vector<1x6x16xf32>, vector<1x6x16xf32> -> vector<1x6x16xf32>
    "tpu.trace_stop"() : () -> ()
    %71 = vector.extract_strided_slice %38 {offsets = [0, 0, 16], sizes = [1, 6, 16], strides = [1, 1, 1]} : vector<1x6x64xf32> to vector<1x6x16xf32>
    %72 = vector.extract_strided_slice %47 {offsets = [0, 0, 16], sizes = [1, 6, 16], strides = [1, 1, 1]} : vector<1x6x64xf32> to vector<1x6x16xf32>
    %73 = vector.extract_strided_slice %56 {offsets = [0, 0, 16], sizes = [1, 6, 16], strides = [1, 1, 1]} : vector<1x6x64xf32> to vector<1x6x16xf32>
    "tpu.trace_start"() <{level = 10 : i32, message = "bqd,bkd->bqk"}> : () -> ()
    %cst_38 = arith.constant dense<0.000000e+00> : vector<1x6x6xf32>
    %74 = tpu.matmul %71, %72, %cst_38 {dimension_numbers = #tpu.dot_dimension_numbers<[2], [2], [1], [1], [0, 0, 0, 1, 1, 1], [0], [0]>} : vector<1x6x16xf32>, vector<1x6x16xf32>, vector<1x6x6xf32> -> vector<1x6x6xf32>
    "tpu.trace_stop"() : () -> ()
    %cst_39 = arith.constant dense<0xFF800000> : vector<1x6xf32>
    %75 = vector.multi_reduction <maximumf>, %74, %cst_39 [2] : vector<1x6x6xf32> to vector<1x6xf32>
    %76 = vector.shape_cast %75 : vector<1x6xf32> to vector<1x6x1xf32>
    %77 = vector.broadcast %76 : vector<1x6x1xf32> to vector<1x6x6xf32>
    %78 = arith.subf %74, %77 : vector<1x6x6xf32>
    %79 = math.exp %78 : vector<1x6x6xf32>
    %cst_40 = arith.constant dense<0.000000e+00> : vector<1x6xf32>
    %80 = vector.multi_reduction <add>, %79, %cst_40 [2] : vector<1x6x6xf32> to vector<1x6xf32>
    %81 = vector.shape_cast %80 : vector<1x6xf32> to vector<1x6x1xf32>
    %82 = vector.broadcast %81 : vector<1x6x1xf32> to vector<1x6x6xf32>
    %83 = arith.divf %79, %82 : vector<1x6x6xf32>
    "tpu.trace_start"() <{level = 10 : i32, message = "bqk,bkd->bqd"}> : () -> ()
    %cst_41 = arith.constant dense<0.000000e+00> : vector<1x6x16xf32>
    %84 = tpu.matmul %83, %73, %cst_41 {dimension_numbers = #tpu.dot_dimension_numbers<[2], [1], [1], [2], [0, 0, 0, 1, 1, 2], [0], [0]>} : vector<1x6x6xf32>, vector<1x6x16xf32>, vector<1x6x16xf32> -> vector<1x6x16xf32>
    "tpu.trace_stop"() : () -> ()
    %85 = vector.extract_strided_slice %38 {offsets = [0, 0, 32], sizes = [1, 6, 16], strides = [1, 1, 1]} : vector<1x6x64xf32> to vector<1x6x16xf32>
    %86 = vector.extract_strided_slice %47 {offsets = [0, 0, 32], sizes = [1, 6, 16], strides = [1, 1, 1]} : vector<1x6x64xf32> to vector<1x6x16xf32>
    %87 = vector.extract_strided_slice %56 {offsets = [0, 0, 32], sizes = [1, 6, 16], strides = [1, 1, 1]} : vector<1x6x64xf32> to vector<1x6x16xf32>
    "tpu.trace_start"() <{level = 10 : i32, message = "bqd,bkd->bqk"}> : () -> ()
    %cst_42 = arith.constant dense<0.000000e+00> : vector<1x6x6xf32>
    %88 = tpu.matmul %85, %86, %cst_42 {dimension_numbers = #tpu.dot_dimension_numbers<[2], [2], [1], [1], [0, 0, 0, 1, 1, 1], [0], [0]>} : vector<1x6x16xf32>, vector<1x6x16xf32>, vector<1x6x6xf32> -> vector<1x6x6xf32>
    "tpu.trace_stop"() : () -> ()
    %cst_43 = arith.constant dense<0xFF800000> : vector<1x6xf32>
    %89 = vector.multi_reduction <maximumf>, %88, %cst_43 [2] : vector<1x6x6xf32> to vector<1x6xf32>
    %90 = vector.shape_cast %89 : vector<1x6xf32> to vector<1x6x1xf32>
    %91 = vector.broadcast %90 : vector<1x6x1xf32> to vector<1x6x6xf32>
    %92 = arith.subf %88, %91 : vector<1x6x6xf32>
    %93 = math.exp %92 : vector<1x6x6xf32>
    %cst_44 = arith.constant dense<0.000000e+00> : vector<1x6xf32>
    %94 = vector.multi_reduction <add>, %93, %cst_44 [2] : vector<1x6x6xf32> to vector<1x6xf32>
    %95 = vector.shape_cast %94 : vector<1x6xf32> to vector<1x6x1xf32>
    %96 = vector.broadcast %95 : vector<1x6x1xf32> to vector<1x6x6xf32>
    %97 = arith.divf %93, %96 : vector<1x6x6xf32>
    "tpu.trace_start"() <{level = 10 : i32, message = "bqk,bkd->bqd"}> : () -> ()
    %cst_45 = arith.constant dense<0.000000e+00> : vector<1x6x16xf32>
    %98 = tpu.matmul %97, %87, %cst_45 {dimension_numbers = #tpu.dot_dimension_numbers<[2], [1], [1], [2], [0, 0, 0, 1, 1, 2], [0], [0]>} : vector<1x6x6xf32>, vector<1x6x16xf32>, vector<1x6x16xf32> -> vector<1x6x16xf32>
    "tpu.trace_stop"() : () -> ()
    %99 = vector.extract_strided_slice %38 {offsets = [0, 0, 48], sizes = [1, 6, 16], strides = [1, 1, 1]} : vector<1x6x64xf32> to vector<1x6x16xf32>
    %100 = vector.extract_strided_slice %47 {offsets = [0, 0, 48], sizes = [1, 6, 16], strides = [1, 1, 1]} : vector<1x6x64xf32> to vector<1x6x16xf32>
    %101 = vector.extract_strided_slice %56 {offsets = [0, 0, 48], sizes = [1, 6, 16], strides = [1, 1, 1]} : vector<1x6x64xf32> to vector<1x6x16xf32>
    "tpu.trace_start"() <{level = 10 : i32, message = "bqd,bkd->bqk"}> : () -> ()
    %cst_46 = arith.constant dense<0.000000e+00> : vector<1x6x6xf32>
    %102 = tpu.matmul %99, %100, %cst_46 {dimension_numbers = #tpu.dot_dimension_numbers<[2], [2], [1], [1], [0, 0, 0, 1, 1, 1], [0], [0]>} : vector<1x6x16xf32>, vector<1x6x16xf32>, vector<1x6x6xf32> -> vector<1x6x6xf32>
    "tpu.trace_stop"() : () -> ()
    %cst_47 = arith.constant dense<0xFF800000> : vector<1x6xf32>
    %103 = vector.multi_reduction <maximumf>, %102, %cst_47 [2] : vector<1x6x6xf32> to vector<1x6xf32>
    %104 = vector.shape_cast %103 : vector<1x6xf32> to vector<1x6x1xf32>
    %105 = vector.broadcast %104 : vector<1x6x1xf32> to vector<1x6x6xf32>
    %106 = arith.subf %102, %105 : vector<1x6x6xf32>
    %107 = math.exp %106 : vector<1x6x6xf32>
    %cst_48 = arith.constant dense<0.000000e+00> : vector<1x6xf32>
    %108 = vector.multi_reduction <add>, %107, %cst_48 [2] : vector<1x6x6xf32> to vector<1x6xf32>
    %109 = vector.shape_cast %108 : vector<1x6xf32> to vector<1x6x1xf32>
    %110 = vector.broadcast %109 : vector<1x6x1xf32> to vector<1x6x6xf32>
    %111 = arith.divf %107, %110 : vector<1x6x6xf32>
    "tpu.trace_start"() <{level = 10 : i32, message = "bqk,bkd->bqd"}> : () -> ()
    %cst_49 = arith.constant dense<0.000000e+00> : vector<1x6x16xf32>
    %112 = tpu.matmul %111, %101, %cst_49 {dimension_numbers = #tpu.dot_dimension_numbers<[2], [1], [1], [2], [0, 0, 0, 1, 1, 2], [0], [0]>} : vector<1x6x6xf32>, vector<1x6x16xf32>, vector<1x6x16xf32> -> vector<1x6x16xf32>
    "tpu.trace_stop"() : () -> ()
    %113 = tpu.concatenate %70, %84, %98, %112 in 2 : vector<1x6x16xf32>, vector<1x6x16xf32>, vector<1x6x16xf32>, vector<1x6x16xf32> -> vector<1x6x64xf32>
    %114 = vector.shape_cast %113 : vector<1x6x64xf32> to vector<6x64xf32>
    %115 = arith.truncf %114 : vector<6x64xf32> to vector<6x64xbf16>
    %c0_50 = arith.constant 0 : index
    %c0_51 = arith.constant 0 : index
    %c0_52 = arith.constant 0 : index
    %116 = vector.load %arg13[%c0_50, %c0_51, %c0_52] : memref<1x64x64xbf16, #tpu.memory_space<vmem>>, vector<1x64x64xbf16>
    %117 = vector.shape_cast %116 : vector<1x64x64xbf16> to vector<64x64xbf16>
    %cst_53 = arith.constant dense<0.000000e+00> : vector<6x64xf32>
    %118 = tpu.matmul %115, %117, %cst_53 {dimension_numbers = #tpu.dot_dimension_numbers<[1], [0], [0], [1], [0, 0, 1, 1], [], []>} : vector<6x64xbf16>, vector<64x64xbf16>, vector<6x64xf32> -> vector<6x64xf32>
    %c0_54 = arith.constant 0 : index
    %c0_55 = arith.constant 0 : index
    %c0_56 = arith.constant 0 : index
    %119 = vector.load %arg14[%c0_54, %c0_55, %c0_56] : memref<1x1x64xf32, #tpu.memory_space<vmem>>, vector<1x1x64xf32>
    %120 = vector.shape_cast %119 : vector<1x1x64xf32> to vector<1x64xf32>
    %121 = vector.broadcast %120 : vector<1x64xf32> to vector<6x64xf32>
    %122 = arith.addf %118, %121 : vector<6x64xf32>
    %123 = arith.addf %3, %122 : vector<6x64xf32>
    %c0_57 = arith.constant 0 : index
    %c0_58 = arith.constant 0 : index
    %c0_59 = arith.constant 0 : index
    %124 = vector.load %arg15[%c0_57, %c0_58, %c0_59] : memref<1x1x64xf32, #tpu.memory_space<vmem>>, vector<1x1x64xf32>
    %125 = vector.shape_cast %124 : vector<1x1x64xf32> to vector<1x64xf32>
    %c0_60 = arith.constant 0 : index
    %c0_61 = arith.constant 0 : index
    %c0_62 = arith.constant 0 : index
    %126 = vector.load %arg16[%c0_60, %c0_61, %c0_62] : memref<1x1x64xf32, #tpu.memory_space<vmem>>, vector<1x1x64xf32>
    %127 = vector.shape_cast %126 : vector<1x1x64xf32> to vector<1x64xf32>
    %cst_63 = arith.constant dense<0.000000e+00> : vector<6xf32>
    %128 = vector.multi_reduction <add>, %123, %cst_63 [1] : vector<6x64xf32> to vector<6xf32>
    %129 = vector.shape_cast %128 : vector<6xf32> to vector<6x1xf32>
    %cst_64 = arith.constant 6.400000e+01 : f32
    %130 = vector.broadcast %cst_64 : f32 to vector<6x1xf32>
    %131 = arith.divf %129, %130 : vector<6x1xf32>
    %132 = vector.broadcast %131 : vector<6x1xf32> to vector<6x64xf32>
    %133 = arith.subf %123, %132 : vector<6x64xf32>
    %134 = arith.mulf %133, %133 : vector<6x64xf32>
    %cst_65 = arith.constant dense<0.000000e+00> : vector<6xf32>
    %135 = vector.multi_reduction <add>, %134, %cst_65 [1] : vector<6x64xf32> to vector<6xf32>
    %136 = vector.shape_cast %135 : vector<6xf32> to vector<6x1xf32>
    %cst_66 = arith.constant 6.400000e+01 : f32
    %137 = vector.broadcast %cst_66 : f32 to vector<6x1xf32>
    %138 = arith.divf %136, %137 : vector<6x1xf32>
    %cst_67 = arith.constant 9.99999974E-6 : f32
    %139 = vector.broadcast %cst_67 : f32 to vector<6x1xf32>
    %140 = arith.addf %138, %139 : vector<6x1xf32>
    %141 = math.rsqrt %140 : vector<6x1xf32>
    %142 = vector.broadcast %141 : vector<6x1xf32> to vector<6x64xf32>
    %143 = arith.mulf %133, %142 : vector<6x64xf32>
    %144 = vector.broadcast %125 : vector<1x64xf32> to vector<6x64xf32>
    %145 = arith.mulf %143, %144 : vector<6x64xf32>
    %146 = vector.broadcast %127 : vector<1x64xf32> to vector<6x64xf32>
    %147 = arith.addf %145, %146 : vector<6x64xf32>
    %148 = arith.truncf %147 : vector<6x64xf32> to vector<6x64xbf16>
    %c0_68 = arith.constant 0 : index
    %c0_69 = arith.constant 0 : index
    %c0_70 = arith.constant 0 : index
    %149 = vector.load %arg17[%c0_68, %c0_69, %c0_70] : memref<1x64x128xbf16, #tpu.memory_space<vmem>>, vector<1x64x128xbf16>
    %150 = vector.shape_cast %149 : vector<1x64x128xbf16> to vector<64x128xbf16>
    %cst_71 = arith.constant dense<0.000000e+00> : vector<6x128xf32>
    %151 = tpu.matmul %148, %150, %cst_71 {dimension_numbers = #tpu.dot_dimension_numbers<[1], [0], [0], [1], [0, 0, 1, 1], [], []>} : vector<6x64xbf16>, vector<64x128xbf16>, vector<6x128xf32> -> vector<6x128xf32>
    %c0_72 = arith.constant 0 : index
    %c0_73 = arith.constant 0 : index
    %c0_74 = arith.constant 0 : index
    %152 = vector.load %arg18[%c0_72, %c0_73, %c0_74] : memref<1x1x128xf32, #tpu.memory_space<vmem>>, vector<1x1x128xf32>
    %153 = vector.shape_cast %152 : vector<1x1x128xf32> to vector<1x128xf32>
    %154 = vector.broadcast %153 : vector<1x128xf32> to vector<6x128xf32>
    %155 = arith.addf %151, %154 : vector<6x128xf32>
    %156 = arith.mulf %155, %155 : vector<6x128xf32>
    %157 = arith.mulf %155, %156 : vector<6x128xf32>
    %cst_75 = arith.constant 4.471500e-02 : f32
    %158 = vector.broadcast %cst_75 : f32 to vector<6x128xf32>
    %159 = arith.mulf %158, %157 : vector<6x128xf32>
    %160 = arith.addf %155, %159 : vector<6x128xf32>
    %cst_76 = arith.constant 0.797884583 : f32
    %161 = vector.broadcast %cst_76 : f32 to vector<6x128xf32>
    %162 = arith.mulf %161, %160 : vector<6x128xf32>
    %163 = math.tanh %162 : vector<6x128xf32>
    %cst_77 = arith.constant 1.000000e+00 : f32
    %164 = vector.broadcast %cst_77 : f32 to vector<6x128xf32>
    %165 = arith.addf %164, %163 : vector<6x128xf32>
    %cst_78 = arith.constant 5.000000e-01 : f32
    %166 = vector.broadcast %cst_78 : f32 to vector<6x128xf32>
    %167 = arith.mulf %166, %165 : vector<6x128xf32>
    %168 = arith.mulf %155, %167 : vector<6x128xf32>
    %169 = arith.truncf %168 : vector<6x128xf32> to vector<6x128xbf16>
    %c0_79 = arith.constant 0 : index
    %c0_80 = arith.constant 0 : index
    %c0_81 = arith.constant 0 : index
    %170 = vector.load %arg19[%c0_79, %c0_80, %c0_81] : memref<1x128x64xbf16, #tpu.memory_space<vmem>>, vector<1x128x64xbf16>
    %171 = vector.shape_cast %170 : vector<1x128x64xbf16> to vector<128x64xbf16>
    %cst_82 = arith.constant dense<0.000000e+00> : vector<6x64xf32>
    %172 = tpu.matmul %169, %171, %cst_82 {dimension_numbers = #tpu.dot_dimension_numbers<[1], [0], [0], [1], [0, 0, 1, 1], [], []>} : vector<6x128xbf16>, vector<128x64xbf16>, vector<6x64xf32> -> vector<6x64xf32>
    %c0_83 = arith.constant 0 : index
    %c0_84 = arith.constant 0 : index
    %c0_85 = arith.constant 0 : index
    %173 = vector.load %arg20[%c0_83, %c0_84, %c0_85] : memref<1x1x64xf32, #tpu.memory_space<vmem>>, vector<1x1x64xf32>
    %174 = vector.shape_cast %173 : vector<1x1x64xf32> to vector<1x64xf32>
    %175 = vector.broadcast %174 : vector<1x64xf32> to vector<6x64xf32>
    %176 = arith.addf %172, %175 : vector<6x64xf32>
    %177 = arith.addf %123, %176 : vector<6x64xf32>
    %c0_86 = arith.constant 0 : index
    %c0_87 = arith.constant 0 : index
    %178 = vector.load %arg24[%c0_86, %c0_87] : memref<6x64xf32, #tpu.memory_space<vmem>>, vector<6x64xf32>
    tpu.vector_store %arg24[%c0_86, %c0_87], %177 {strides = array<i32>} : memref<6x64xf32, #tpu.memory_space<vmem>>, vector<6x64xf32>,
    %c1_i32 = arith.constant 1 : i32
    %179 = arith.cmpi eq, %arg1, %c1_i32 : i32
    %180 = arith.extui %179 : i1 to i32
    %c0_i32_88 = arith.constant 0 : i32
    %181 = arith.cmpi ne, %180, %c0_i32_88 : i32
    scf.if %181 {
      %c0_89 = arith.constant 0 : index
      %c0_90 = arith.constant 0 : index
      %c0_91 = arith.constant 0 : index
      %182 = vector.load %arg21[%c0_89, %c0_90, %c0_91] : memref<1x1x64xf32, #tpu.memory_space<vmem>>, vector<1x1x64xf32>
      %183 = vector.shape_cast %182 : vector<1x1x64xf32> to vector<1x64xf32>
      %c0_92 = arith.constant 0 : index
      %c0_93 = arith.constant 0 : index
      %c0_94 = arith.constant 0 : index
      %184 = vector.load %arg22[%c0_92, %c0_93, %c0_94] : memref<1x1x64xf32, #tpu.memory_space<vmem>>, vector<1x1x64xf32>
      %185 = vector.shape_cast %184 : vector<1x1x64xf32> to vector<1x64xf32>
      %cst_95 = arith.constant dense<0.000000e+00> : vector<6xf32>
      %186 = vector.multi_reduction <add>, %177, %cst_95 [1] : vector<6x64xf32> to vector<6xf32>
      %187 = vector.shape_cast %186 : vector<6xf32> to vector<6x1xf32>
      %cst_96 = arith.constant 6.400000e+01 : f32
      %188 = vector.broadcast %cst_96 : f32 to vector<6x1xf32>
      %189 = arith.divf %187, %188 : vector<6x1xf32>
      %190 = vector.broadcast %189 : vector<6x1xf32> to vector<6x64xf32>
      %191 = arith.subf %177, %190 : vector<6x64xf32>
      %192 = arith.mulf %191, %191 : vector<6x64xf32>
      %cst_97 = arith.constant dense<0.000000e+00> : vector<6xf32>
      %193 = vector.multi_reduction <add>, %192, %cst_97 [1] : vector<6x64xf32> to vector<6xf32>
      %194 = vector.shape_cast %193 : vector<6xf32> to vector<6x1xf32>
      %cst_98 = arith.constant 6.400000e+01 : f32
      %195 = vector.broadcast %cst_98 : f32 to vector<6x1xf32>
      %196 = arith.divf %194, %195 : vector<6x1xf32>
      %cst_99 = arith.constant 9.99999974E-6 : f32
      %197 = vector.broadcast %cst_99 : f32 to vector<6x1xf32>
      %198 = arith.addf %196, %197 : vector<6x1xf32>
      %199 = math.rsqrt %198 : vector<6x1xf32>
      %200 = vector.broadcast %199 : vector<6x1xf32> to vector<6x64xf32>
      %201 = arith.mulf %191, %200 : vector<6x64xf32>
      %202 = vector.broadcast %183 : vector<1x64xf32> to vector<6x64xf32>
      %203 = arith.mulf %201, %202 : vector<6x64xf32>
      %204 = vector.broadcast %185 : vector<1x64xf32> to vector<6x64xf32>
      %205 = arith.addf %203, %204 : vector<6x64xf32>
      %206 = vector.extract_strided_slice %205 {offsets = [0, 0], sizes = [4, 64], strides = [1, 1]} : vector<6x64xf32> to vector<4x64xf32>
      %c0_100 = arith.constant 0 : index
      %c0_101 = arith.constant 0 : index
      %c0_102 = arith.constant 0 : index
      %207 = vector.load %arg23[%c0_100, %c0_101, %c0_102] : memref<1x4x64xf32, #tpu.memory_space<vmem>>, vector<1x4x64xf32>
      %208 = vector.shape_cast %207 : vector<1x4x64xf32> to vector<4x64xf32>
      %209 = vector.shape_cast %206 : vector<4x64xf32> to vector<1x4x64xf32>
      tpu.vector_store %arg23[%c0_100, %c0_101, %c0_102], %209 {strides = array<i32>} : memref<1x4x64xf32, #tpu.memory_space<vmem>>, vector<1x4x64xf32>,
    } else {
    }
    return
  }
  func.func @transform_0(%arg0: i32, %arg1: i32) -> (i32, i32, i32) {
    %c0_i32 = arith.constant 0 : i32
    %c0_i32_0 = arith.constant 0 : i32
    %c0_i32_1 = arith.constant 0 : i32
    return %arg0, %c0_i32, %c0_i32_0 : i32, i32, i32
  }
  func.func @transform_1(%arg0: i32, %arg1: i32) -> (i32, i32, i32) {
    %c0_i32 = arith.constant 0 : i32
    %c0_i32_0 = arith.constant 0 : i32
    %c0_i32_1 = arith.constant 0 : i32
    %c0_i32_2 = arith.constant 0 : i32
    return %c0_i32, %c0_i32_0, %c0_i32_1 : i32, i32, i32
  }
  func.func @transform_2(%arg0: i32, %arg1: i32) -> (i32, i32, i32) {
    %c0_i32 = arith.constant 0 : i32
    %c0_i32_0 = arith.constant 0 : i32
    %c0_i32_1 = arith.constant 0 : i32
    %c0_i32_2 = arith.constant 0 : i32
    return %c0_i32, %c0_i32_0, %c0_i32_1 : i32, i32, i32
  }
  func.func @transform_3(%arg0: i32, %arg1: i32) -> (i32, i32, i32) {
    %c0_i32 = arith.constant 0 : i32
    %c0_i32_0 = arith.constant 0 : i32
    %c0_i32_1 = arith.constant 0 : i32
    return %arg1, %c0_i32, %c0_i32_0 : i32, i32, i32
  }
  func.func @transform_4(%arg0: i32, %arg1: i32) -> (i32, i32, i32) {
    %c0_i32 = arith.constant 0 : i32
    %c0_i32_0 = arith.constant 0 : i32
    %c0_i32_1 = arith.constant 0 : i32
    return %arg1, %c0_i32, %c0_i32_0 : i32, i32, i32
  }
  func.func @transform_5(%arg0: i32, %arg1: i32) -> (i32, i32, i32) {
    %c0_i32 = arith.constant 0 : i32
    %c0_i32_0 = arith.constant 0 : i32
    %c0_i32_1 = arith.constant 0 : i32
    return %arg1, %c0_i32, %c0_i32_0 : i32, i32, i32
  }
  func.func @transform_6(%arg0: i32, %arg1: i32) -> (i32, i32, i32) {
    %c0_i32 = arith.constant 0 : i32
    %c0_i32_0 = arith.constant 0 : i32
    %c0_i32_1 = arith.constant 0 : i32
    return %arg1, %c0_i32, %c0_i32_0 : i32, i32, i32
  }
  func.func @transform_7(%arg0: i32, %arg1: i32) -> (i32, i32, i32) {
    %c0_i32 = arith.constant 0 : i32
    %c0_i32_0 = arith.constant 0 : i32
    %c0_i32_1 = arith.constant 0 : i32
    return %arg1, %c0_i32, %c0_i32_0 : i32, i32, i32
  }
  func.func @transform_8(%arg0: i32, %arg1: i32) -> (i32, i32, i32) {
    %c0_i32 = arith.constant 0 : i32
    %c0_i32_0 = arith.constant 0 : i32
    %c0_i32_1 = arith.constant 0 : i32
    return %arg1, %c0_i32, %c0_i32_0 : i32, i32, i32
  }
  func.func @transform_9(%arg0: i32, %arg1: i32) -> (i32, i32, i32) {
    %c0_i32 = arith.constant 0 : i32
    %c0_i32_0 = arith.constant 0 : i32
    %c0_i32_1 = arith.constant 0 : i32
    return %arg1, %c0_i32, %c0_i32_0 : i32, i32, i32
  }
  func.func @transform_10(%arg0: i32, %arg1: i32) -> (i32, i32, i32) {
    %c0_i32 = arith.constant 0 : i32
    %c0_i32_0 = arith.constant 0 : i32
    %c0_i32_1 = arith.constant 0 : i32
    return %arg1, %c0_i32, %c0_i32_0 : i32, i32, i32
  }
  func.func @transform_11(%arg0: i32, %arg1: i32) -> (i32, i32, i32) {
    %c0_i32 = arith.constant 0 : i32
    %c0_i32_0 = arith.constant 0 : i32
    %c0_i32_1 = arith.constant 0 : i32
    return %arg1, %c0_i32, %c0_i32_0 : i32, i32, i32
  }
  func.func @transform_12(%arg0: i32, %arg1: i32) -> (i32, i32, i32) {
    %c0_i32 = arith.constant 0 : i32
    %c0_i32_0 = arith.constant 0 : i32
    %c0_i32_1 = arith.constant 0 : i32
    return %arg1, %c0_i32, %c0_i32_0 : i32, i32, i32
  }
  func.func @transform_13(%arg0: i32, %arg1: i32) -> (i32, i32, i32) {
    %c0_i32 = arith.constant 0 : i32
    %c0_i32_0 = arith.constant 0 : i32
    %c0_i32_1 = arith.constant 0 : i32
    return %arg1, %c0_i32, %c0_i32_0 : i32, i32, i32
  }
  func.func @transform_14(%arg0: i32, %arg1: i32) -> (i32, i32, i32) {
    %c0_i32 = arith.constant 0 : i32
    %c0_i32_0 = arith.constant 0 : i32
    %c0_i32_1 = arith.constant 0 : i32
    return %arg1, %c0_i32, %c0_i32_0 : i32, i32, i32
  }
  func.func @transform_15(%arg0: i32, %arg1: i32) -> (i32, i32, i32) {
    %c0_i32 = arith.constant 0 : i32
    %c0_i32_0 = arith.constant 0 : i32
    %c0_i32_1 = arith.constant 0 : i32
    return %arg1, %c0_i32, %c0_i32_0 : i32, i32, i32
  }
  func.func @transform_16(%arg0: i32, %arg1: i32) -> (i32, i32, i32) {
    %c0_i32 = arith.constant 0 : i32
    %c0_i32_0 = arith.constant 0 : i32
    %c0_i32_1 = arith.constant 0 : i32
    return %arg1, %c0_i32, %c0_i32_0 : i32, i32, i32
  }
  func.func @transform_17(%arg0: i32, %arg1: i32) -> (i32, i32, i32) {
    %c0_i32 = arith.constant 0 : i32
    %c0_i32_0 = arith.constant 0 : i32
    %c0_i32_1 = arith.constant 0 : i32
    return %arg1, %c0_i32, %c0_i32_0 : i32, i32, i32
  }
  func.func @transform_18(%arg0: i32, %arg1: i32) -> (i32, i32, i32) {
    %c0_i32 = arith.constant 0 : i32
    %c0_i32_0 = arith.constant 0 : i32
    %c0_i32_1 = arith.constant 0 : i32
    return %arg1, %c0_i32, %c0_i32_0 : i32, i32, i32
  }
  func.func @transform_19(%arg0: i32, %arg1: i32) -> (i32, i32, i32) {
    %c0_i32 = arith.constant 0 : i32
    %c0_i32_0 = arith.constant 0 : i32
    %c0_i32_1 = arith.constant 0 : i32
    %c0_i32_2 = arith.constant 0 : i32
    return %c0_i32, %c0_i32_0, %c0_i32_1 : i32, i32, i32
  }
  func.func @transform_20(%arg0: i32, %arg1: i32) -> (i32, i32, i32) {
    %c0_i32 = arith.constant 0 : i32
    %c0_i32_0 = arith.constant 0 : i32
    %c0_i32_1 = arith.constant 0 : i32
    %c0_i32_2 = arith.constant 0 : i32
    return %c0_i32, %c0_i32_0, %c0_i32_1 : i32, i32, i32
  }
  func.func @transform_21(%arg0: i32, %arg1: i32) -> (i32, i32, i32) {
    %c0_i32 = arith.constant 0 : i32
    %c0_i32_0 = arith.constant 0 : i32
    %c0_i32_1 = arith.constant 0 : i32
    return %arg0, %c0_i32, %c0_i32_0 : i32, i32, i32
  }
}

</mosaic_0001>

<bundles_post_ra>
// kernel: scott_forward.3
= control target key start
LH: loop header
LB: loop body
LE: loop exit
PB: predicated region body
PF: predicated region fallthrough
CT: control target
= control target key end

     0   :  { %s1229_s9 = smov 0   ;;  %s1398_s0 = inlined_call_operand.vmem [shape: bf16[512,256], index: 0, kind: input, shape index: {}]   ;;  %s1399_s1 = inlined_call_operand.vmem [shape: bf16[256,64], index: 1, kind: input, shape index: {}]   ;;  %s1400_s2 = inlined_call_operand.vmem [shape: bf16[512,64], index: 2, kind: output, shape index: {}]  }
   0x1 LB: > { %s881_s10 = sadd.s32 4294967295, %s1212_s9   ;;  %p885_p0 = scmp.ge.s32.totalorder %s1212_s9, 1  ;;  %s1212_s9 = sphi %s1229_s9, %s12_s9  }
   0x2   : > { %p114_p1 = scmp.lt.s32.totalorder %s1212_s9, 3 }
   0x4   : > { %p115_p2 = pnand %p885_p0, %p114_p1 }
   0x5   : > { %s886_s13 = sshll.u32 (!%p115_p2), %s881_s10, 5 }
   0x6   : > { %118 = sbr.rel (%p115_p2) target bundleno = 306 (0x132), region = 28  ;;  %p138_p3 = scmp.lt.s32.totalorder (!%p115_p2), %s886_s13, 63 }
   0xb   : > { %v1142_v0 = vld [vmem:[%s1399_s1 + $0x78] sm:$0xff]   ;;  %v1144_v2 = vld [vmem:[%s1399_s1 + $0x70] sm:$0xff]   ;;  %v1146_v4 = vld [vmem:[%s1399_s1 + $0x68] sm:$0xff]   ;;  %s1402_s13 = smov (!%p138_p3, %s886_s13), 63  ;;  %vm792_vm0 = vcmask 519168  }
   0xc   : > { %v1143_v1 = vld [vmem:[%s1399_s1 + $0x38] sm:$0xff]   ;;  %1006 = vmatprep.subr.bf16.mxu0 %v1142_v0  ;;  %1118 = vmatprep.subr.bf16.mxu1 %v1142_v0  ;;  %v1145_v3 = vld [vmem:[%s1399_s1 + $0x30] sm:$0xff]   ;;  %v1147_v5 = vld [vmem:[%s1399_s1 + $0x28] sm:$0xff]   ;;  %s973_s28 = sshll.u32 %s1402_s13, 3  ;;  %s890_s22 = sshll.u32 %s1402_s13, 2 }
   0xd   : > { %1007 = vmatpush3.bf16.msra.mxu0 %v1143_v1  ;;  %1126 = vmatpush3.bf16.msra.mxu1 %v1143_v1  ;;  %v1148_v6 = vld [vmem:[%s1399_s1 + $0x60] sm:$0xff]   ;;  %v1150_v8 = vld [vmem:[%s1399_s1 + $0x58] sm:$0xff]   ;;  %s1270_s5 = scalar_lea.vmem %s1398_s0, %s973_s28  ;;  %v1152_v10 = vld [vmem:[%s1399_s1 + $0x50] sm:$0xff]   ;;  %s1329_s25 = scalar_lea.vmem %s1400_s2, %s890_s22 }
   0xe   : > { %1008 = vmatprep.subr.bf16.mxu0 %v1144_v2  ;;  %1119 = vmatprep.subr.bf16.mxu1 %v1144_v2  ;;  %v1149_v7 = vld [vmem:[%s1399_s1 + $0x20] sm:$0xff]   ;;  %v1151_v9 = vld [vmem:[%s1399_s1 + $0x18] sm:$0xff]   ;;  %v1153_v13 = vld [vmem:[%s1399_s1 + $0x10] sm:$0xff]  }
   0xf   : > { %v1160_v11 = vld [vmem:[%s1270_s5 + $0x4] ss:$8 sps:$4 sm:$0xff]   ;;  %v1158_v18 = vld [vmem:[%s1270_s5] ss:$8 sps:$4 sm:$0xff]   ;;  %v1164_v20 = vld [vmem:[%s1270_s5 + $0x14] ss:$8 sps:$4 sm:$0xff]  }
  0x10   : > { %v1163_v12 = vld [vmem:[%s1270_s5 + $0x84] ss:$8 sps:$4 sm:$0xff]   ;;  %503 = vmatprep.mubr.bf16.mxu0 %v1160_v11  ;;  %v1161_v19 = vld [vmem:[%s1270_s5 + $0x80] ss:$8 sps:$4 sm:$0xff]   ;;  %v1166_v21 = vld [vmem:[%s1270_s5 + $0x94] ss:$8 sps:$4 sm:$0xff]  }
  0x11   : > { %1009 = vmatpush3.bf16.msra.mxu0 %v1145_v3  ;;  %1127 = vmatpush3.bf16.msra.mxu1 %v1145_v3  ;;  %v1154_v14 = vld [vmem:[%s1399_s1 + $0x48] sm:$0xff]   ;;  %v1156_v16 = vld [vmem:[%s1399_s1 + $0x40] sm:$0xff]   ;;  %v1168_v22 = vld [vmem:[%s1270_s5 + $0x10] ss:$8 sps:$4 sm:$0xff]  }
  0x12   : > { %1010 = vmatprep.subr.bf16.mxu0 %v1146_v4  ;;  %1120 = vmatprep.subr.bf16.mxu1 %v1146_v4  ;;  %v1155_v15 = vld [vmem:[%s1399_s1 + $0x8] sm:$0xff]   ;;  %v1157_v17 = vld [vmem:[%s1399_s1] sm:$0xff]   ;;  %v1169_v23 = vld [vmem:[%s1270_s5 + $0x90] ss:$8 sps:$4 sm:$0xff]  }
  0x13   : > { %567 = vmatprep.mubr.bf16.mxu1 %v1163_v12  ;;  %v1170_v24 = vld [vmem:[%s1270_s5 + $0x24] ss:$8 sps:$4 sm:$0xff]   ;;  %v1174_v26 = vld [vmem:[%s1270_s5 + $0x20] ss:$8 sps:$4 sm:$0xff]   ;;  %v1176_v28 = vld [vmem:[%s1270_s5 + $0x34] ss:$8 sps:$4 sm:$0xff]  }
  0x14   : > { %v1172_v25 = vld [vmem:[%s1270_s5 + $0xa4] ss:$8 sps:$4 sm:$0xff]   ;;  %v1175_v27 = vld [vmem:[%s1270_s5 + $0xa0] ss:$8 sps:$4 sm:$0xff]   ;;  %v1178_v29 = vld [vmem:[%s1270_s5 + $0xb4] ss:$8 sps:$4 sm:$0xff]  }
  0x15   : > { %1011 = vmatpush3.bf16.msra.mxu0 %v1147_v5  ;;  %1128 = vmatpush3.bf16.msra.mxu1 %v1147_v5  ;;  %v1180_v30 = vld [vmem:[%s1270_s5 + $0x30] ss:$8 sps:$4 sm:$0xff]   ;;  %v1182_v32 = vld [vmem:[%s1270_s5 + $0x44] ss:$8 sps:$4 sm:$0xff]   ;;  %v1186_v34 = vld [vmem:[%s1270_s5 + $0x40] ss:$8 sps:$4 sm:$0xff]  }
  0x16   : > { %1012 = vmatprep.subr.bf16.mxu0 %v1148_v6  ;;  %1121 = vmatprep.subr.bf16.mxu1 %v1148_v6  ;;  %v1181_v31 = vld [vmem:[%s1270_s5 + $0xb0] ss:$8 sps:$4 sm:$0xff]   ;;  %v1184_v33 = vld [vmem:[%s1270_s5 + $0xc4] ss:$8 sps:$4 sm:$0xff]   ;;  %v1187_v35 = vld [vmem:[%s1270_s5 + $0xc0] ss:$8 sps:$4 sm:$0xff]  }
  0x17   : > { %v1188_v36 = vld [vmem:[%s1270_s5 + $0x54] ss:$8 sps:$4 sm:$0xff]   ;;  %v1192_v38 = vld [vmem:[%s1270_s5 + $0x50] ss:$8 sps:$4 sm:$0xff]   ;;  %v1194_v40 = vld [vmem:[%s1270_s5 + $0x64] ss:$8 sps:$4 sm:$0xff]  }
  0x18   : > { %v1190_v37 = vld [vmem:[%s1270_s5 + $0xd4] ss:$8 sps:$4 sm:$0xff]   ;;  %v1193_v39 = vld [vmem:[%s1270_s5 + $0xd0] ss:$8 sps:$4 sm:$0xff]   ;;  %v1196_v41 = vld [vmem:[%s1270_s5 + $0xe4] ss:$8 sps:$4 sm:$0xff]  }
  0x19   : > { %1013 = vmatpush3.bf16.msra.mxu0 %v1149_v7  ;;  %1129 = vmatpush3.bf16.msra.mxu1 %v1149_v7  ;;  %v1198_v42 = vld [vmem:[%s1270_s5 + $0x60] ss:$8 sps:$4 sm:$0xff]   ;;  %v1200_v44 = vld [vmem:[%s1270_s5 + $0x74] ss:$8 sps:$4 sm:$0xff]   ;;  %v1204_v46 = vld [vmem:[%s1270_s5 + $0x70] ss:$8 sps:$4 sm:$0xff]  }
  0x1a   : > { %1014 = vmatprep.subr.bf16.mxu0 %v1150_v8  ;;  %1122 = vmatprep.subr.bf16.mxu1 %v1150_v8  ;;  %v1199_v43 = vld [vmem:[%s1270_s5 + $0xe0] ss:$8 sps:$4 sm:$0xff]   ;;  %v1202_v45 = vld [vmem:[%s1270_s5 + $0xf4] ss:$8 sps:$4 sm:$0xff]   ;;  %v1205_v47 = vld [vmem:[%s1270_s5 + $0xf0] ss:$8 sps:$4 sm:$0xff]  }
  0x1d   : > { %1015 = vmatpush3.bf16.msra.mxu0 %v1151_v9  ;;  %1130 = vmatpush3.bf16.msra.mxu1 %v1151_v9 }
  0x1e   : > { %1016 = vmatprep.subr.bf16.mxu0 %v1152_v10  ;;  %1123 = vmatprep.subr.bf16.mxu1 %v1152_v10 }
  0x21   : > { %1017 = vmatpush3.bf16.msra.mxu0 %v1153_v13  ;;  %1131 = vmatpush3.bf16.msra.mxu1 %v1153_v13 }
  0x22   : > { %1018 = vmatprep.subr.bf16.mxu0 %v1154_v14  ;;  %1124 = vmatprep.subr.bf16.mxu1 %v1154_v14 }
  0x25   : > { %1019 = vmatpush3.bf16.msra.mxu0 %v1155_v15  ;;  %1132 = vmatpush3.bf16.msra.mxu1 %v1155_v15 }
  0x26   : > { %1020 = vmatprep.subr.bf16.mxu0 %v1156_v16  ;;  %1125 = vmatprep.subr.bf16.mxu1 %v1156_v16 }
  0x29   : > { %1021 = vmatpush3.bf16.msra.mxu0 %v1157_v17  ;;  %1133 = vmatpush3.bf16.msra.mxu1 %v1157_v17 }
  0x2c   : > { %504 = vmatmul.mubr.bf16.vlgmr.msra.gmra.mxu0 %v1158_v18  ;;  %568 = vmatmul.mubr.bf16.vlgmr.msra.gmra.mxu1 %v1161_v19 }
  0x2d   : > { %511 = vmatprep.mubr.bf16.mxu0 %v1164_v20  ;;  %575 = vmatprep.mubr.bf16.mxu1 %v1166_v21 }
  0x34   : > { %512 = vmatmul.mubr.bf16.gmra.mxu0 %v1168_v22  ;;  %576 = vmatmul.mubr.bf16.gmra.mxu1 %v1169_v23 }
  0x35   : > { %519 = vmatprep.mubr.bf16.mxu0 %v1170_v24  ;;  %583 = vmatprep.mubr.bf16.mxu1 %v1172_v25 }
  0x3c   : > { %520 = vmatmul.mubr.bf16.gmra.mxu0 %v1174_v26  ;;  %584 = vmatmul.mubr.bf16.gmra.mxu1 %v1175_v27 }
  0x3d   : > { %527 = vmatprep.mubr.bf16.mxu0 %v1176_v28  ;;  %591 = vmatprep.mubr.bf16.mxu1 %v1178_v29 }
  0x44   : > { %528 = vmatmul.mubr.bf16.gmra.mxu0 %v1180_v30  ;;  %592 = vmatmul.mubr.bf16.gmra.mxu1 %v1181_v31 }
  0x45   : > { %535 = vmatprep.mubr.bf16.mxu0 %v1182_v32  ;;  %599 = vmatprep.mubr.bf16.mxu1 %v1184_v33 }
  0x4c   : > { %536 = vmatmul.mubr.bf16.gmra.mxu0 %v1186_v34  ;;  %600 = vmatmul.mubr.bf16.gmra.mxu1 %v1187_v35 }
  0x4d   : > { %543 = vmatprep.mubr.bf16.mxu0 %v1188_v36  ;;  %607 = vmatprep.mubr.bf16.mxu1 %v1190_v37 }
  0x54   : > { %544 = vmatmul.mubr.bf16.gmra.mxu0 %v1192_v38  ;;  %608 = vmatmul.mubr.bf16.gmra.mxu1 %v1193_v39 }
  0x55   : > { %551 = vmatprep.mubr.bf16.mxu0 %v1194_v40  ;;  %615 = vmatprep.mubr.bf16.mxu1 %v1196_v41 }
  0x5c   : > { %552 = vmatmul.mubr.bf16.gmra.mxu0 %v1198_v42  ;;  %616 = vmatmul.mubr.bf16.gmra.mxu1 %v1199_v43 }
  0x5d   : > { %559 = vmatprep.mubr.bf16.mxu0 %v1200_v44  ;;  %623 = vmatprep.mubr.bf16.mxu1 %v1202_v45 }
  0x64   : > { %560 = vmatmul.mubr.bf16.gmra.mxu0 %v1204_v46  ;;  %624 = vmatmul.mubr.bf16.gmra.mxu1 %v1205_v47 }
  0xec   : > { %v1022_v48 = vpop.f32.mrf.mxu0  ;;  %v1070_v49 = vpop.f32.mrf.mxu1 }
  0xee   : > { %v1023_v50 = vpop.f32.mrf.mxu0  ;;  %v1071_v51 = vpop.f32.mrf.mxu1 }
  0xef   : > { %v1024_v52 = vadd.f32 %v1023_v50, %v1022_v48  ;;  %v1072_v53 = vadd.f32 %v1071_v51, %v1070_v49 }
  0xf0   : > { %v1025_v54 = vpop.f32.mrf.mxu0  ;;  %v1073_v55 = vpop.f32.mrf.mxu1 }
  0xf1   : > { %v632_v56 = vmax.f32 %v1024_v52, 0.0  ;;  %v648_v57 = vmax.f32 %v1072_v53, 0.0 }
  0xf2   : > { %v1026_v58 = vpop.f32.mrf.mxu0  ;;  %v1074_v59 = vpop.f32.mrf.mxu1 }
  0xf3   : > { %v974_v60 = vpack.c.bf16 %v632_v56, %v632_v56  ;;  %v990_v61 = vpack.c.bf16 %v648_v57, %v648_v57  ;;  %v1027_v62 = vadd.f32 %v1026_v58, %v1025_v54  ;;  %v1075_v63 = vadd.f32 %v1074_v59, %v1073_v55 }
  0xf4   : > { %v1028_v0 = vpop.f32.mrf.mxu0  ;;  %v1076_v1 = vpop.f32.mrf.mxu1 }
  0xf5   : > { %793 = vst.msk [vmem:[%s1329_s25] sm:$0xf] %vm792_vm0, %v974_v60  ;;  %809 = vst.msk [vmem:[%s1329_s25 + $0x40] sm:$0xf] %vm792_vm0, %v990_v61  ;;  %v633_v2 = vmax.f32 %v1027_v62, 0.0  ;;  %v649_v3 = vmax.f32 %v1075_v63, 0.0 }
  0xf6   : > { %v1029_v4 = vpop.f32.mrf.mxu0  ;;  %v1077_v5 = vpop.f32.mrf.mxu1 }
  0xf7   : > { %v975_v6 = vpack.c.bf16 %v633_v2, %v633_v2  ;;  %v991_v7 = vpack.c.bf16 %v649_v3, %v649_v3  ;;  %v1030_v8 = vadd.f32 %v1029_v4, %v1028_v0  ;;  %v1078_v9 = vadd.f32 %v1077_v5, %v1076_v1 }
  0xf8   : > { %v1031_v10 = vpop.f32.mrf.mxu0  ;;  %v1079_v11 = vpop.f32.mrf.mxu1 }
  0xf9   : > { %794 = vst.msk [vmem:[%s1329_s25 + $0x4] sm:$0xf] %vm792_vm0, %v975_v6  ;;  %810 = vst.msk [vmem:[%s1329_s25 + $0x44] sm:$0xf] %vm792_vm0, %v991_v7  ;;  %v634_v12 = vmax.f32 %v1030_v8, 0.0  ;;  %v650_v13 = vmax.f32 %v1078_v9, 0.0 }
  0xfa   : > { %v1032_v14 = vpop.f32.mrf.mxu0  ;;  %v1080_v15 = vpop.f32.mrf.mxu1 }
  0xfb   : > { %v976_v16 = vpack.c.bf16 %v634_v12, %v634_v12  ;;  %v992_v17 = vpack.c.bf16 %v650_v13, %v650_v13  ;;  %v1033_v18 = vadd.f32 %v1032_v14, %v1031_v10  ;;  %v1081_v19 = vadd.f32 %v1080_v15, %v1079_v11 }
  0xfc   : > { %v1034_v20 = vpop.f32.mrf.mxu0  ;;  %v1082_v21 = vpop.f32.mrf.mxu1 }
  0xfd   : > { %795 = vst.msk [vmem:[%s1329_s25 + $0x8] sm:$0xf] %vm792_vm0, %v976_v16  ;;  %811 = vst.msk [vmem:[%s1329_s25 + $0x48] sm:$0xf] %vm792_vm0, %v992_v17  ;;  %v635_v22 = vmax.f32 %v1033_v18, 0.0  ;;  %v651_v23 = vmax.f32 %v1081_v19, 0.0 }
  0xfe   : > { %v1035_v24 = vpop.f32.mrf.mxu0  ;;  %v1083_v25 = vpop.f32.mrf.mxu1 }
  0xff   : > { %v977_v26 = vpack.c.bf16 %v635_v22, %v635_v22  ;;  %v993_v27 = vpack.c.bf16 %v651_v23, %v651_v23  ;;  %v1036_v28 = vadd.f32 %v1035_v24, %v1034_v20  ;;  %v1084_v29 = vadd.f32 %v1083_v25, %v1082_v21 }
 0x100   : > { %v1037_v30 = vpop.f32.mrf.mxu0  ;;  %v1085_v31 = vpop.f32.mrf.mxu1 }
 0x101   : > { %796 = vst.msk [vmem:[%s1329_s25 + $0xc] sm:$0xf] %vm792_vm0, %v977_v26  ;;  %812 = vst.msk [vmem:[%s1329_s25 + $0x4c] sm:$0xf] %vm792_vm0, %v993_v27  ;;  %v636_v32 = vmax.f32 %v1036_v28, 0.0  ;;  %v652_v33 = vmax.f32 %v1084_v29, 0.0 }
 0x102   : > { %v1038_v34 = vpop.f32.mrf.mxu0  ;;  %v1086_v35 = vpop.f32.mrf.mxu1 }
 0x103   : > { %v978_v36 = vpack.c.bf16 %v636_v32, %v636_v32  ;;  %v994_v37 = vpack.c.bf16 %v652_v33, %v652_v33  ;;  %v1039_v38 = vadd.f32 %v1038_v34, %v1037_v30  ;;  %v1087_v39 = vadd.f32 %v1086_v35, %v1085_v31 }
 0x104   : > { %v1040_v40 = vpop.f32.mrf.mxu0  ;;  %v1088_v41 = vpop.f32.mrf.mxu1 }
 0x105   : > { %797 = vst.msk [vmem:[%s1329_s25 + $0x10] sm:$0xf] %vm792_vm0, %v978_v36  ;;  %813 = vst.msk [vmem:[%s1329_s25 + $0x50] sm:$0xf] %vm792_vm0, %v994_v37  ;;  %v637_v42 = vmax.f32 %v1039_v38, 0.0  ;;  %v653_v43 = vmax.f32 %v1087_v39, 0.0 }
 0x106   : > { %v1041_v44 = vpop.f32.mrf.mxu0  ;;  %v1089_v45 = vpop.f32.mrf.mxu1 }
 0x107   : > { %v979_v46 = vpack.c.bf16 %v637_v42, %v637_v42  ;;  %v995_v47 = vpack.c.bf16 %v653_v43, %v653_v43  ;;  %v1042_v48 = vadd.f32 %v1041_v44, %v1040_v40  ;;  %v1090_v49 = vadd.f32 %v1089_v45, %v1088_v41 }
 0x108   : > { %v1043_v50 = vpop.f32.mrf.mxu0  ;;  %v1091_v51 = vpop.f32.mrf.mxu1 }
 0x109   : > { %798 = vst.msk [vmem:[%s1329_s25 + $0x14] sm:$0xf] %vm792_vm0, %v979_v46  ;;  %814 = vst.msk [vmem:[%s1329_s25 + $0x54] sm:$0xf] %vm792_vm0, %v995_v47  ;;  %v638_v52 = vmax.f32 %v1042_v48, 0.0  ;;  %v654_v53 = vmax.f32 %v1090_v49, 0.0 }
 0x10a   : > { %v1044_v54 = vpop.f32.mrf.mxu0  ;;  %v1092_v55 = vpop.f32.mrf.mxu1 }
 0x10b   : > { %v980_v56 = vpack.c.bf16 %v638_v52, %v638_v52  ;;  %v996_v57 = vpack.c.bf16 %v654_v53, %v654_v53  ;;  %v1045_v58 = vadd.f32 %v1044_v54, %v1043_v50  ;;  %v1093_v59 = vadd.f32 %v1092_v55, %v1091_v51 }
 0x10c   : > { %v1046_v60 = vpop.f32.mrf.mxu0  ;;  %v1094_v61 = vpop.f32.mrf.mxu1 }
 0x10d   : > { %799 = vst.msk [vmem:[%s1329_s25 + $0x18] sm:$0xf] %vm792_vm0, %v980_v56  ;;  %815 = vst.msk [vmem:[%s1329_s25 + $0x58] sm:$0xf] %vm792_vm0, %v996_v57  ;;  %v639_v62 = vmax.f32 %v1045_v58, 0.0  ;;  %v655_v63 = vmax.f32 %v1093_v59, 0.0 }
 0x10e   : > { %v1047_v0 = vpop.f32.mrf.mxu0  ;;  %v1095_v1 = vpop.f32.mrf.mxu1 }
 0x10f   : > { %v981_v2 = vpack.c.bf16 %v639_v62, %v639_v62  ;;  %v997_v3 = vpack.c.bf16 %v655_v63, %v655_v63  ;;  %v1048_v4 = vadd.f32 %v1047_v0, %v1046_v60  ;;  %v1096_v5 = vadd.f32 %v1095_v1, %v1094_v61 }
 0x110   : > { %v1049_v6 = vpop.f32.mrf.mxu0  ;;  %v1097_v7 = vpop.f32.mrf.mxu1 }
 0x111   : > { %800 = vst.msk [vmem:[%s1329_s25 + $0x1c] sm:$0xf] %vm792_vm0, %v981_v2  ;;  %816 = vst.msk [vmem:[%s1329_s25 + $0x5c] sm:$0xf] %vm792_vm0, %v997_v3  ;;  %v640_v8 = vmax.f32 %v1048_v4, 0.0  ;;  %v656_v9 = vmax.f32 %v1096_v5, 0.0 }
 0x112   : > { %v1050_v10 = vpop.f32.mrf.mxu0  ;;  %v1098_v11 = vpop.f32.mrf.mxu1 }
 0x113   : > { %v982_v12 = vpack.c.bf16 %v640_v8, %v640_v8  ;;  %v998_v13 = vpack.c.bf16 %v656_v9, %v656_v9  ;;  %v1051_v14 = vadd.f32 %v1050_v10, %v1049_v6  ;;  %v1099_v15 = vadd.f32 %v1098_v11, %v1097_v7 }
 0x114   : > { %v1052_v16 = vpop.f32.mrf.mxu0  ;;  %v1100_v17 = vpop.f32.mrf.mxu1 }
 0x115   : > { %801 = vst.msk [vmem:[%s1329_s25 + $0x20] sm:$0xf] %vm792_vm0, %v982_v12  ;;  %817 = vst.msk [vmem:[%s1329_s25 + $0x60] sm:$0xf] %vm792_vm0, %v998_v13  ;;  %v641_v18 = vmax.f32 %v1051_v14, 0.0  ;;  %v657_v19 = vmax.f32 %v1099_v15, 0.0 }
 0x116   : > { %v1053_v20 = vpop.f32.mrf.mxu0  ;;  %v1101_v21 = vpop.f32.mrf.mxu1 }
 0x117   : > { %v983_v22 = vpack.c.bf16 %v641_v18, %v641_v18  ;;  %v999_v23 = vpack.c.bf16 %v657_v19, %v657_v19  ;;  %v1054_v24 = vadd.f32 %v1053_v20, %v1052_v16  ;;  %v1102_v25 = vadd.f32 %v1101_v21, %v1100_v17 }
 0x118   : > { %v1055_v26 = vpop.f32.mrf.mxu0  ;;  %v1103_v27 = vpop.f32.mrf.mxu1 }
 0x119   : > { %802 = vst.msk [vmem:[%s1329_s25 + $0x24] sm:$0xf] %vm792_vm0, %v983_v22  ;;  %818 = vst.msk [vmem:[%s1329_s25 + $0x64] sm:$0xf] %vm792_vm0, %v999_v23  ;;  %v642_v28 = vmax.f32 %v1054_v24, 0.0  ;;  %v658_v29 = vmax.f32 %v1102_v25, 0.0 }
 0x11a   : > { %v1056_v30 = vpop.f32.mrf.mxu0  ;;  %v1104_v31 = vpop.f32.mrf.mxu1 }
 0x11b   : > { %v984_v32 = vpack.c.bf16 %v642_v28, %v642_v28  ;;  %v1000_v33 = vpack.c.bf16 %v658_v29, %v658_v29  ;;  %v1057_v34 = vadd.f32 %v1056_v30, %v1055_v26  ;;  %v1105_v35 = vadd.f32 %v1104_v31, %v1103_v27 }
 0x11c   : > { %v1058_v36 = vpop.f32.mrf.mxu0  ;;  %v1106_v37 = vpop.f32.mrf.mxu1 }
 0x11d   : > { %803 = vst.msk [vmem:[%s1329_s25 + $0x28] sm:$0xf] %vm792_vm0, %v984_v32  ;;  %819 = vst.msk [vmem:[%s1329_s25 + $0x68] sm:$0xf] %vm792_vm0, %v1000_v33  ;;  %v643_v38 = vmax.f32 %v1057_v34, 0.0  ;;  %v659_v39 = vmax.f32 %v1105_v35, 0.0 }
 0x11e   : > { %v1059_v40 = vpop.f32.mrf.mxu0  ;;  %v1107_v41 = vpop.f32.mrf.mxu1 }
 0x11f   : > { %v985_v42 = vpack.c.bf16 %v643_v38, %v643_v38  ;;  %v1001_v43 = vpack.c.bf16 %v659_v39, %v659_v39  ;;  %v1060_v44 = vadd.f32 %v1059_v40, %v1058_v36  ;;  %v1108_v45 = vadd.f32 %v1107_v41, %v1106_v37 }
 0x120   : > { %v1061_v46 = vpop.f32.mrf.mxu0  ;;  %v1109_v47 = vpop.f32.mrf.mxu1 }
 0x121   : > { %804 = vst.msk [vmem:[%s1329_s25 + $0x2c] sm:$0xf] %vm792_vm0, %v985_v42  ;;  %820 = vst.msk [vmem:[%s1329_s25 + $0x6c] sm:$0xf] %vm792_vm0, %v1001_v43  ;;  %v644_v48 = vmax.f32 %v1060_v44, 0.0  ;;  %v660_v49 = vmax.f32 %v1108_v45, 0.0 }
 0x122   : > { %v1062_v50 = vpop.f32.mrf.mxu0  ;;  %v1110_v51 = vpop.f32.mrf.mxu1 }
 0x123   : > { %v986_v52 = vpack.c.bf16 %v644_v48, %v644_v48  ;;  %v1002_v53 = vpack.c.bf16 %v660_v49, %v660_v49  ;;  %v1063_v54 = vadd.f32 %v1062_v50, %v1061_v46  ;;  %v1111_v55 = vadd.f32 %v1110_v51, %v1109_v47 }
 0x124   : > { %v1064_v56 = vpop.f32.mrf.mxu0  ;;  %v1112_v57 = vpop.f32.mrf.mxu1 }
 0x125   : > { %805 = vst.msk [vmem:[%s1329_s25 + $0x30] sm:$0xf] %vm792_vm0, %v986_v52  ;;  %821 = vst.msk [vmem:[%s1329_s25 + $0x70] sm:$0xf] %vm792_vm0, %v1002_v53  ;;  %v645_v58 = vmax.f32 %v1063_v54, 0.0  ;;  %v661_v59 = vmax.f32 %v1111_v55, 0.0 }
 0x126   : > { %v1065_v60 = vpop.f32.mrf.mxu0  ;;  %v1113_v61 = vpop.f32.mrf.mxu1 }
 0x127   : > { %v987_v62 = vpack.c.bf16 %v645_v58, %v645_v58  ;;  %v1003_v63 = vpack.c.bf16 %v661_v59, %v661_v59  ;;  %v1066_v0 = vadd.f32 %v1065_v60, %v1064_v56  ;;  %v1114_v1 = vadd.f32 %v1113_v61, %v1112_v57 }
 0x128   : > { %v1067_v2 = vpop.f32.mrf.mxu0  ;;  %v1115_v3 = vpop.f32.mrf.mxu1 }
 0x129   : > { %806 = vst.msk [vmem:[%s1329_s25 + $0x34] sm:$0xf] %vm792_vm0, %v987_v62  ;;  %822 = vst.msk [vmem:[%s1329_s25 + $0x74] sm:$0xf] %vm792_vm0, %v1003_v63  ;;  %v646_v4 = vmax.f32 %v1066_v0, 0.0  ;;  %v662_v5 = vmax.f32 %v1114_v1, 0.0 }
 0x12a   : > { %v1068_v6 = vpop.f32.mrf.mxu0  ;;  %v1116_v7 = vpop.f32.mrf.mxu1 }
 0x12b   : > { %v988_v8 = vpack.c.bf16 %v646_v4, %v646_v4  ;;  %v1004_v9 = vpack.c.bf16 %v662_v5, %v662_v5  ;;  %v1069_v10 = vadd.f32 %v1068_v6, %v1067_v2  ;;  %v1117_v11 = vadd.f32 %v1116_v7, %v1115_v3 }
 0x12d   : > { %807 = vst.msk [vmem:[%s1329_s25 + $0x38] sm:$0xf] %vm792_vm0, %v988_v8  ;;  %823 = vst.msk [vmem:[%s1329_s25 + $0x78] sm:$0xf] %vm792_vm0, %v1004_v9  ;;  %v647_v12 = vmax.f32 %v1069_v10, 0.0  ;;  %v663_v13 = vmax.f32 %v1117_v11, 0.0 }
 0x12f   : > { %v989_v14 = vpack.c.bf16 %v647_v12, %v647_v12  ;;  %v1005_v15 = vpack.c.bf16 %v663_v13, %v663_v13 }
 0x131   : > { %808 = vst.msk [vmem:[%s1329_s25 + $0x3c] sm:$0xf] %vm792_vm0, %v989_v14  ;;  %824 = vst.msk [vmem:[%s1329_s25 + $0x7c] sm:$0xf] %vm792_vm0, %v1005_v15 }
 0x132 PF: > { %s12_s9 = sadd.s32 1, %s1212_s9  }
 0x133   : > { %p9_p4 = scmp.ge.s32.totalorder %s12_s9, 4  }
 0x135   :  { %11 = sbr.rel (!%p9_p4) target bundleno = 1 (0x1), region = 58 }

// kernel: scott_forward.4
= control target key start
LH: loop header
LB: loop body
LE: loop exit
PB: predicated region body
PF: predicated region fallthrough
CT: control target
= control target key end

     0   :  { %s3311_s9 = smov 0   ;;  %s3961_s0 = inlined_call_operand.vmem [shape: bf16[32,3200], index: 0, kind: input, shape index: {}]   ;;  %s3962_s1 = inlined_call_operand.vmem [shape: bf16[3200,64], index: 1, kind: input, shape index: {}]   ;;  %s3963_s2 = inlined_call_operand.vmem [shape: bf16[32,64], index: 2, kind: output, shape index: {}]  }
   0x1 LB: > { %s2505_s10 = sadd.s32 4294967295, %s3292_s9   ;;  %p2509_p0 = scmp.ge.s32.totalorder %s3292_s9, 1  ;;  %s3292_s9 = sphi %s3311_s9, %s12_s9  }
   0x2   : > { %p114_p1 = scmp.lt.s32.totalorder %s3292_s9, 3 }
   0x4   : > { %p115_p2 = pnand %p2509_p0, %p114_p1 }
   0x5   : > { %s2510_s15 = sshll.u32 (!%p115_p2), %s2505_s10, 1 }
   0x6   : > { %118 = sbr.rel (%p115_p2) target bundleno = 441 (0x1b9), region = 28  ;;  %p138_p3 = scmp.lt.s32.totalorder (!%p115_p2), %s2510_s15, 3 }
   0xb   : > { %v3049_v0 = vld [vmem:[%s3962_s1 + $0x78] sm:$0xff]   ;;  %v3053_v4 = vld [vmem:[%s3962_s1 + $0x70] sm:$0xff]   ;;  %v3057_v8 = vld [vmem:[%s3962_s1 + $0x68] sm:$0xff]   ;;  %s3965_s15 = smov (!%p138_p3, %s2510_s15), 3  ;;  %vm3295_vm0 = vmmov 0   ;;  %vm2446_vm1 = vcmask 519168  }
   0xc   : > { %v3050_v1 = vld [vmem:[%s3962_s1 + $0xf8] sm:$0xff]   ;;  %2745 = vmatprep.subr.bf16.mxu0 %v3049_v0  ;;  %v3054_v5 = vld [vmem:[%s3962_s1 + $0xf0] sm:$0xff]   ;;  %v3058_v9 = vld [vmem:[%s3962_s1 + $0xe8] sm:$0xff]   ;;  %s3038_s11 = smul.u32 100, %s3965_s15 }
   0xd   : > { %v3051_v2 = vld [vmem:[%s3962_s1 + $0x38] sm:$0xff]   ;;  %2767 = vmatprep.subr.bf16.mxu1 %v3050_v1  ;;  %v3055_v6 = vld [vmem:[%s3962_s1 + $0x30] sm:$0xff]   ;;  %v3059_v10 = vld [vmem:[%s3962_s1 + $0x28] sm:$0xff]  }
   0xe   : > { %v3052_v3 = vld [vmem:[%s3962_s1 + $0xb8] sm:$0xff]   ;;  %2746 = vmatpush3.bf16.msra.mxu0 %v3051_v2  ;;  %v3056_v7 = vld [vmem:[%s3962_s1 + $0xb0] sm:$0xff]   ;;  %v3060_v11 = vld [vmem:[%s3962_s1 + $0xa8] sm:$0xff]   ;;  %s3417_s23 = scalar_lea.vmem %s3961_s0, %s3038_s11 }
   0xf   : > { %2768 = vmatpush3.bf16.msra.mxu1 %v3052_v3  ;;  %2747 = vmatprep.subr.bf16.mxu0 %v3053_v4  ;;  %v3061_v12 = vld [vmem:[%s3962_s1 + $0x60] sm:$0xff]   ;;  %v3065_v16 = vld [vmem:[%s3962_s1 + $0x58] sm:$0xff]   ;;  %v3069_v20 = vld [vmem:[%s3962_s1 + $0x50] sm:$0xff]  }
  0x10   : > { %2769 = vmatprep.subr.bf16.mxu1 %v3054_v5  ;;  %v3062_v13 = vld [vmem:[%s3962_s1 + $0xe0] sm:$0xff]   ;;  %v3066_v17 = vld [vmem:[%s3962_s1 + $0xd8] sm:$0xff]   ;;  %v3070_v21 = vld [vmem:[%s3962_s1 + $0xd0] sm:$0xff]  }
  0x11   : > { %v3063_v14 = vld [vmem:[%s3962_s1 + $0x20] sm:$0xff]   ;;  %v3067_v18 = vld [vmem:[%s3962_s1 + $0x18] sm:$0xff]   ;;  %v3071_v22 = vld [vmem:[%s3962_s1 + $0x10] sm:$0xff]  }
  0x12   : > { %2748 = vmatpush3.bf16.msra.mxu0 %v3055_v6  ;;  %v3064_v15 = vld [vmem:[%s3962_s1 + $0xa0] sm:$0xff]   ;;  %v3068_v19 = vld [vmem:[%s3962_s1 + $0x98] sm:$0xff]   ;;  %v3072_v23 = vld [vmem:[%s3962_s1 + $0x90] sm:$0xff]  }
  0x13   : > { %2770 = vmatpush3.bf16.msra.mxu1 %v3056_v7  ;;  %2749 = vmatprep.subr.bf16.mxu0 %v3057_v8  ;;  %v3073_v24 = vld [vmem:[%s3962_s1 + $0x48] sm:$0xff]   ;;  %v3077_v28 = vld [vmem:[%s3962_s1 + $0x40] sm:$0xff]   ;;  %v3087_v36 = vld [vmem:[%s3962_s1 + $0x178] sm:$0xff]  }
  0x14   : > { %2771 = vmatprep.subr.bf16.mxu1 %v3058_v9  ;;  %v3074_v25 = vld [vmem:[%s3962_s1 + $0xc8] sm:$0xff]   ;;  %v3078_v29 = vld [vmem:[%s3962_s1 + $0xc0] sm:$0xff]   ;;  %v3088_v37 = vld [vmem:[%s3962_s1 + $0x138] sm:$0xff]  }
  0x15   : > { %v3075_v26 = vld [vmem:[%s3962_s1 + $0x8] sm:$0xff]   ;;  %v3079_v30 = vld [vmem:[%s3962_s1] sm:$0xff]   ;;  %v3089_v38 = vld [vmem:[%s3962_s1 + $0x1f8] sm:$0xff]  }
  0x16   : > { %2750 = vmatpush3.bf16.msra.mxu0 %v3059_v10  ;;  %v3076_v27 = vld [vmem:[%s3962_s1 + $0x88] sm:$0xff]   ;;  %v3080_v31 = vld [vmem:[%s3962_s1 + $0x80] sm:$0xff]   ;;  %v3090_v39 = vld [vmem:[%s3962_s1 + $0x1b8] sm:$0xff]  }
  0x17   : > { %2772 = vmatpush3.bf16.msra.mxu1 %v3060_v11  ;;  %2751 = vmatprep.subr.bf16.mxu0 %v3061_v12  ;;  %v3081_v32 = vld [vmem:[%s3417_s23] ss:$100 sps:$4 sm:$0xff]   ;;  %v3084_v34 = vld [vmem:[%s3417_s23 + $0x8] ss:$100 sps:$4 sm:$0xff]   ;;  %v3091_v40 = vld [vmem:[%s3962_s1 + $0x170] sm:$0xff]  }
  0x18   : > { %2773 = vmatprep.subr.bf16.mxu1 %v3062_v13  ;;  %v3083_v33 = vld [vmem:[%s3417_s23 + $0x4] ss:$100 sps:$4 sm:$0xff]   ;;  %v3086_v35 = vld [vmem:[%s3417_s23 + $0xc] ss:$100 sps:$4 sm:$0xff]   ;;  %v3103_v52 = vld [vmem:[%s3962_s1 + $0x158] sm:$0xff]  }
  0x19   : > { %1935 = vmatprep.mubr.bf16.mxu0 %v3083_v33  ;;  %1976 = vmatprep.mubr.bf16.mxu1 %v3086_v35  ;;  %v3092_v41 = vld [vmem:[%s3962_s1 + $0x130] sm:$0xff]   ;;  %v3095_v44 = vld [vmem:[%s3962_s1 + $0x168] sm:$0xff]   ;;  %v3099_v48 = vld [vmem:[%s3962_s1 + $0x160] sm:$0xff]  }
  0x1a   : > { %2752 = vmatpush3.bf16.msra.mxu0 %v3063_v14  ;;  %v3093_v42 = vld [vmem:[%s3962_s1 + $0x1f0] sm:$0xff]   ;;  %v3096_v45 = vld [vmem:[%s3962_s1 + $0x128] sm:$0xff]   ;;  %v3100_v49 = vld [vmem:[%s3962_s1 + $0x120] sm:$0xff]  }
  0x1b   : > { %2774 = vmatpush3.bf16.msra.mxu1 %v3064_v15  ;;  %2753 = vmatprep.subr.bf16.mxu0 %v3065_v16  ;;  %v3094_v43 = vld [vmem:[%s3962_s1 + $0x1b0] sm:$0xff]   ;;  %v3097_v46 = vld [vmem:[%s3962_s1 + $0x1e8] sm:$0xff]   ;;  %v3101_v50 = vld [vmem:[%s3962_s1 + $0x1e0] sm:$0xff]  }
  0x1c   : > { %2775 = vmatprep.subr.bf16.mxu1 %v3066_v17  ;;  %v3098_v47 = vld [vmem:[%s3962_s1 + $0x1a8] sm:$0xff]   ;;  %v3102_v51 = vld [vmem:[%s3962_s1 + $0x1a0] sm:$0xff]   ;;  %v3104_v53 = vld [vmem:[%s3962_s1 + $0x118] sm:$0xff]  }
  0x1d   : > { %v3105_v54 = vld [vmem:[%s3962_s1 + $0x1d8] sm:$0xff]   ;;  %v3107_v56 = vld [vmem:[%s3962_s1 + $0x150] sm:$0xff]   ;;  %v3111_v60 = vld [vmem:[%s3962_s1 + $0x148] sm:$0xff]  }
  0x1e   : > { %2754 = vmatpush3.bf16.msra.mxu0 %v3067_v18  ;;  %v3106_v55 = vld [vmem:[%s3962_s1 + $0x198] sm:$0xff]   ;;  %v3108_v57 = vld [vmem:[%s3962_s1 + $0x110] sm:$0xff]   ;;  %v3112_v61 = vld [vmem:[%s3962_s1 + $0x108] sm:$0xff]  }
  0x1f   : > { %2776 = vmatpush3.bf16.msra.mxu1 %v3068_v19  ;;  %2755 = vmatprep.subr.bf16.mxu0 %v3069_v20  ;;  %v3109_v58 = vld [vmem:[%s3962_s1 + $0x1d0] sm:$0xff]   ;;  %v3113_v62 = vld [vmem:[%s3962_s1 + $0x1c8] sm:$0xff]   ;;  %v3115_v0 = vld [vmem:[%s3962_s1 + $0x140] sm:$0xff]  }
  0x20   : > { %2777 = vmatprep.subr.bf16.mxu1 %v3070_v21  ;;  %v3110_v59 = vld [vmem:[%s3962_s1 + $0x190] sm:$0xff]   ;;  %v3114_v63 = vld [vmem:[%s3962_s1 + $0x188] sm:$0xff]   ;;  %v3116_v1 = vld [vmem:[%s3962_s1 + $0x100] sm:$0xff]  }
  0x21   : > { %v3117_v2 = vld [vmem:[%s3962_s1 + $0x1c0] sm:$0xff]   ;;  %v3118_v3 = vld [vmem:[%s3417_s23 + $0x10] ss:$100 sps:$4 sm:$0xff]   ;;  %v3122_v6 = vld [vmem:[%s3962_s1 + $0x278] sm:$0xff]  }
  0x22   : > { %2756 = vmatpush3.bf16.msra.mxu0 %v3071_v22  ;;  %v3120_v4 = vld [vmem:[%s3417_s23 + $0x14] ss:$100 sps:$4 sm:$0xff]   ;;  %v3121_v5 = vld [vmem:[%s3962_s1 + $0x180] sm:$0xff]   ;;  %v3133_v16 = vld [vmem:[%s3962_s1 + $0x268] sm:$0xff]  }
  0x23   : > { %2778 = vmatpush3.bf16.msra.mxu1 %v3072_v23  ;;  %2757 = vmatprep.subr.bf16.mxu0 %v3073_v24  ;;  %v3123_v7 = vld [vmem:[%s3417_s23 + $0x18] ss:$100 sps:$4 sm:$0xff]   ;;  %v3129_v12 = vld [vmem:[%s3962_s1 + $0x270] sm:$0xff]   ;;  %v3134_v17 = vld [vmem:[%s3962_s1 + $0x228] sm:$0xff]  }
  0x24   : > { %2779 = vmatprep.subr.bf16.mxu1 %v3074_v25  ;;  %v3125_v8 = vld [vmem:[%s3417_s23 + $0x1c] ss:$100 sps:$4 sm:$0xff]   ;;  %v3130_v13 = vld [vmem:[%s3962_s1 + $0x230] sm:$0xff]   ;;  %v3135_v18 = vld [vmem:[%s3962_s1 + $0x2e8] sm:$0xff]  }
  0x25   : > { %v3126_v9 = vld [vmem:[%s3962_s1 + $0x238] sm:$0xff]   ;;  %v3131_v14 = vld [vmem:[%s3962_s1 + $0x2f0] sm:$0xff]   ;;  %v3136_v19 = vld [vmem:[%s3962_s1 + $0x2a8] sm:$0xff]  }
  0x26   : > { %2758 = vmatpush3.bf16.msra.mxu0 %v3075_v26  ;;  %v3127_v10 = vld [vmem:[%s3962_s1 + $0x2f8] sm:$0xff]   ;;  %v3132_v15 = vld [vmem:[%s3962_s1 + $0x2b0] sm:$0xff]   ;;  %v3137_v20 = vld [vmem:[%s3962_s1 + $0x260] sm:$0xff]  }
  0x27   : > { %2780 = vmatpush3.bf16.msra.mxu1 %v3076_v27  ;;  %2759 = vmatprep.subr.bf16.mxu0 %v3077_v28  ;;  %v3128_v11 = vld [vmem:[%s3962_s1 + $0x2b8] sm:$0xff]   ;;  %v3138_v21 = vld [vmem:[%s3962_s1 + $0x220] sm:$0xff]   ;;  %v3145_v28 = vld [vmem:[%s3962_s1 + $0x250] sm:$0xff]  }
  0x28   : > { %2781 = vmatprep.subr.bf16.mxu1 %v3078_v29  ;;  %v3139_v22 = vld [vmem:[%s3962_s1 + $0x2e0] sm:$0xff]   ;;  %v3141_v24 = vld [vmem:[%s3962_s1 + $0x258] sm:$0xff]   ;;  %v3146_v29 = vld [vmem:[%s3962_s1 + $0x210] sm:$0xff]  }
  0x29   : > { %v3140_v23 = vld [vmem:[%s3962_s1 + $0x2a0] sm:$0xff]   ;;  %v3142_v25 = vld [vmem:[%s3962_s1 + $0x218] sm:$0xff]   ;;  %v3150_v33 = vld [vmem:[%s3962_s1 + $0x208] sm:$0xff]  }
  0x2a   : > { %2760 = vmatpush3.bf16.msra.mxu0 %v3079_v30  ;;  %v3143_v26 = vld [vmem:[%s3962_s1 + $0x2d8] sm:$0xff]   ;;  %v3147_v30 = vld [vmem:[%s3962_s1 + $0x2d0] sm:$0xff]   ;;  %v3152_v35 = vld [vmem:[%s3962_s1 + $0x288] sm:$0xff]  }
  0x2b   : > { %2782 = vmatpush3.bf16.msra.mxu1 %v3080_v31  ;;  %2789 = vmatprep.subr.bf16.mxu0 %v3087_v36  ;;  %v3144_v27 = vld [vmem:[%s3962_s1 + $0x298] sm:$0xff]   ;;  %v3148_v31 = vld [vmem:[%s3962_s1 + $0x290] sm:$0xff]   ;;  %v3153_v36 = vld [vmem:[%s3962_s1 + $0x240] sm:$0xff]  }
  0x2c   : > { %2811 = vmatprep.subr.bf16.mxu1 %v3089_v38  ;;  %v3155_v38 = vld [vmem:[%s3962_s1 + $0x2c0] sm:$0xff]  }
  0x2d   : > { %1936 = vmatmul.mubr.bf16.vlgmr.msra.gmra.mxu0 %v3081_v32  ;;  %v3149_v32 = vld [vmem:[%s3962_s1 + $0x248] sm:$0xff]  }
  0x2e   : > { %1977 = vmatmul.mubr.bf16.vlgmr.msra.gmra.mxu1 %v3084_v34  ;;  %2790 = vmatpush3.bf16.msra.mxu0 %v3088_v37  ;;  %v3151_v34 = vld [vmem:[%s3962_s1 + $0x2c8] sm:$0xff]   ;;  %v3154_v37 = vld [vmem:[%s3962_s1 + $0x200] sm:$0xff]  }
  0x2f   : > { %2812 = vmatpush3.bf16.msra.mxu1 %v3090_v39  ;;  %2791 = vmatprep.subr.bf16.mxu0 %v3091_v40  ;;  %v3156_v39 = vld [vmem:[%s3417_s23 + $0x20] ss:$100 sps:$4 sm:$0xff]  }
  0x30   : > { %2813 = vmatprep.subr.bf16.mxu1 %v3093_v42  ;;  %2017 = vmatprep.mubr.bf16.mxu0 %v3120_v4  ;;  %v3158_v40 = vld [vmem:[%s3417_s23 + $0x24] ss:$100 sps:$4 sm:$0xff]   ;;  %v3160_v42 = vld [vmem:[%s3962_s1 + $0x378] sm:$0xff]  }
  0x31   : > { %2058 = vmatprep.mubr.bf16.mxu1 %v3125_v8  ;;  %v3187_v4 = vld [vmem:[%s3962_s1 + $0x348] sm:$0xff]   ;;  %v3191_v8 = vld [vmem:[%s3962_s1 + $0x340] sm:$0xff]  }
  0x32   : > { %2792 = vmatpush3.bf16.msra.mxu0 %v3092_v41  ;;  %v3159_v41 = vld [vmem:[%s3962_s1 + $0x280] sm:$0xff]  }
  0x33   : > { %2814 = vmatpush3.bf16.msra.mxu1 %v3094_v43  ;;  %2793 = vmatprep.subr.bf16.mxu0 %v3095_v44  ;;  %v3161_v43 = vld [vmem:[%s3417_s23 + $0x28] ss:$100 sps:$4 sm:$0xff]  }
  0x34   : > { %2815 = vmatprep.subr.bf16.mxu1 %v3097_v46  ;;  %v3163_v44 = vld [vmem:[%s3417_s23 + $0x2c] ss:$100 sps:$4 sm:$0xff]   ;;  %v3165_v46 = vld [vmem:[%s3962_s1 + $0x3f8] sm:$0xff]  }
  0x36   : > { %2794 = vmatpush3.bf16.msra.mxu0 %v3096_v45  ;;  %v3164_v45 = vld [vmem:[%s3962_s1 + $0x338] sm:$0xff]  }
  0x37   : > { %2816 = vmatpush3.bf16.msra.mxu1 %v3098_v47  ;;  %2795 = vmatprep.subr.bf16.mxu0 %v3099_v48  ;;  %v3166_v47 = vld [vmem:[%s3962_s1 + $0x3b8] sm:$0xff]   ;;  %v3167_v48 = vld [vmem:[%s3962_s1 + $0x370] sm:$0xff]  }
  0x38   : > { %2817 = vmatprep.subr.bf16.mxu1 %v3101_v50  ;;  %v3169_v50 = vld [vmem:[%s3962_s1 + $0x3f0] sm:$0xff]  }
  0x3a   : > { %2796 = vmatpush3.bf16.msra.mxu0 %v3100_v49  ;;  %v3168_v49 = vld [vmem:[%s3962_s1 + $0x330] sm:$0xff]  }
  0x3b   : > { %2818 = vmatpush3.bf16.msra.mxu1 %v3102_v51  ;;  %2797 = vmatprep.subr.bf16.mxu0 %v3103_v52  ;;  %v3170_v51 = vld [vmem:[%s3962_s1 + $0x3b0] sm:$0xff]   ;;  %v3171_v52 = vld [vmem:[%s3962_s1 + $0x368] sm:$0xff]  }
  0x3c   : > { %2819 = vmatprep.subr.bf16.mxu1 %v3105_v54  ;;  %v3173_v54 = vld [vmem:[%s3962_s1 + $0x3e8] sm:$0xff]  }
  0x3e   : > { %2798 = vmatpush3.bf16.msra.mxu0 %v3104_v53  ;;  %v3172_v53 = vld [vmem:[%s3962_s1 + $0x328] sm:$0xff]  }
  0x3f   : > { %2820 = vmatpush3.bf16.msra.mxu1 %v3106_v55  ;;  %2799 = vmatprep.subr.bf16.mxu0 %v3107_v56  ;;  %v3174_v55 = vld [vmem:[%s3962_s1 + $0x3a8] sm:$0xff]   ;;  %v3175_v56 = vld [vmem:[%s3962_s1 + $0x360] sm:$0xff]  }
  0x40   : > { %2821 = vmatprep.subr.bf16.mxu1 %v3109_v58  ;;  %v3177_v58 = vld [vmem:[%s3962_s1 + $0x3e0] sm:$0xff]  }
  0x42   : > { %2800 = vmatpush3.bf16.msra.mxu0 %v3108_v57  ;;  %v3176_v57 = vld [vmem:[%s3962_s1 + $0x320] sm:$0xff]  }
  0x43   : > { %2822 = vmatpush3.bf16.msra.mxu1 %v3110_v59  ;;  %2801 = vmatprep.subr.bf16.mxu0 %v3111_v60  ;;  %v3178_v59 = vld [vmem:[%s3962_s1 + $0x3a0] sm:$0xff]   ;;  %v3179_v60 = vld [vmem:[%s3962_s1 + $0x358] sm:$0xff]  }
  0x44   : > { %2823 = vmatprep.subr.bf16.mxu1 %v3113_v62  ;;  %v3181_v62 = vld [vmem:[%s3962_s1 + $0x3d8] sm:$0xff]  }
  0x46   : > { %2802 = vmatpush3.bf16.msra.mxu0 %v3112_v61  ;;  %v3180_v61 = vld [vmem:[%s3962_s1 + $0x318] sm:$0xff]  }
  0x47   : > { %2824 = vmatpush3.bf16.msra.mxu1 %v3114_v63  ;;  %2803 = vmatprep.subr.bf16.mxu0 %v3115_v0  ;;  %v3182_v63 = vld [vmem:[%s3962_s1 + $0x398] sm:$0xff]   ;;  %v3183_v0 = vld [vmem:[%s3962_s1 + $0x350] sm:$0xff]  }
  0x48   : > { %2825 = vmatprep.subr.bf16.mxu1 %v3117_v2  ;;  %v3185_v2 = vld [vmem:[%s3962_s1 + $0x3d0] sm:$0xff]  }
  0x4a   : > { %2804 = vmatpush3.bf16.msra.mxu0 %v3116_v1  ;;  %v3184_v1 = vld [vmem:[%s3962_s1 + $0x310] sm:$0xff]  }
  0x4b   : > { %2826 = vmatpush3.bf16.msra.mxu1 %v3121_v5  ;;  %2833 = vmatprep.subr.bf16.mxu0 %v3122_v6  ;;  %v3188_v5 = vld [vmem:[%s3962_s1 + $0x308] sm:$0xff]  }
  0x4c   : > { %2855 = vmatprep.subr.bf16.mxu1 %v3127_v10  ;;  %v3189_v6 = vld [vmem:[%s3962_s1 + $0x3c8] sm:$0xff]   ;;  %v3193_v10 = vld [vmem:[%s3962_s1 + $0x3c0] sm:$0xff]  }
  0x4d   : > { %2018 = vmatmul.mubr.bf16.vlgmr.msra.gmra.mxu0 %v3118_v3  ;;  %v3186_v3 = vld [vmem:[%s3962_s1 + $0x390] sm:$0xff]  }
  0x4e   : > { %2834 = vmatpush3.bf16.msra.mxu0 %v3126_v9  ;;  %2059 = vmatmul.mubr.bf16.vlgmr.msra.gmra.mxu1 %v3123_v7  ;;  %v3190_v7 = vld [vmem:[%s3962_s1 + $0x388] sm:$0xff]   ;;  %v3192_v9 = vld [vmem:[%s3962_s1 + $0x300] sm:$0xff]  }
  0x4f   : > { %2856 = vmatpush3.bf16.msra.mxu1 %v3128_v11  ;;  %2835 = vmatprep.subr.bf16.mxu0 %v3129_v12  ;;  %v3194_v11 = vld [vmem:[%s3417_s23 + $0x30] ss:$100 sps:$4 sm:$0xff]  }
  0x50   : > { %2857 = vmatprep.subr.bf16.mxu1 %v3131_v14  ;;  %2099 = vmatprep.mubr.bf16.mxu0 %v3158_v40  ;;  %v3196_v12 = vld [vmem:[%s3417_s23 + $0x34] ss:$100 sps:$4 sm:$0xff]   ;;  %v3225_v40 = vld [vmem:[%s3962_s1 + $0x448] sm:$0xff]  }
  0x51   : > { %2140 = vmatprep.mubr.bf16.mxu1 %v3163_v44  ;;  %v3198_v14 = vld [vmem:[%s3962_s1 + $0x478] sm:$0xff]   ;;  %v3229_v44 = vld [vmem:[%s3962_s1 + $0x440] sm:$0xff]  }
  0x52   : > { %2836 = vmatpush3.bf16.msra.mxu0 %v3130_v13  ;;  %v3197_v13 = vld [vmem:[%s3962_s1 + $0x380] sm:$0xff]  }
  0x53   : > { %2858 = vmatpush3.bf16.msra.mxu1 %v3132_v15  ;;  %2837 = vmatprep.subr.bf16.mxu0 %v3133_v16  ;;  %v3199_v15 = vld [vmem:[%s3417_s23 + $0x38] ss:$100 sps:$4 sm:$0xff]  }
  0x54   : > { %2859 = vmatprep.subr.bf16.mxu1 %v3135_v18  ;;  %v3201_v16 = vld [vmem:[%s3417_s23 + $0x3c] ss:$100 sps:$4 sm:$0xff]  }
  0x55   : > { %v3203_v18 = vld [vmem:[%s3962_s1 + $0x4f8] sm:$0xff]  }
  0x56   : > { %2838 = vmatpush3.bf16.msra.mxu0 %v3134_v17  ;;  %v3202_v17 = vld [vmem:[%s3962_s1 + $0x438] sm:$0xff]  }
  0x57   : > { %2860 = vmatpush3.bf16.msra.mxu1 %v3136_v19  ;;  %2839 = vmatprep.subr.bf16.mxu0 %v3137_v20  ;;  %v3204_v19 = vld [vmem:[%s3962_s1 + $0x4b8] sm:$0xff]   ;;  %v3205_v20 = vld [vmem:[%s3962_s1 + $0x470] sm:$0xff]  }
  0x58   : > { %2861 = vmatprep.subr.bf16.mxu1 %v3139_v22  ;;  %v3207_v22 = vld [vmem:[%s3962_s1 + $0x4f0] sm:$0xff]  }
  0x5a   : > { %2840 = vmatpush3.bf16.msra.mxu0 %v3138_v21  ;;  %v3206_v21 = vld [vmem:[%s3962_s1 + $0x430] sm:$0xff]  }
  0x5b   : > { %2862 = vmatpush3.bf16.msra.mxu1 %v3140_v23  ;;  %2841 = vmatprep.subr.bf16.mxu0 %v3141_v24  ;;  %v3208_v23 = vld [vmem:[%s3962_s1 + $0x4b0] sm:$0xff]   ;;  %v3209_v24 = vld [vmem:[%s3962_s1 + $0x468] sm:$0xff]  }
  0x5c   : > { %2863 = vmatprep.subr.bf16.mxu1 %v3143_v26  ;;  %v3211_v26 = vld [vmem:[%s3962_s1 + $0x4e8] sm:$0xff]  }
  0x5e   : > { %2842 = vmatpush3.bf16.msra.mxu0 %v3142_v25  ;;  %v3210_v25 = vld [vmem:[%s3962_s1 + $0x428] sm:$0xff]  }
  0x5f   : > { %2864 = vmatpush3.bf16.msra.mxu1 %v3144_v27  ;;  %2843 = vmatprep.subr.bf16.mxu0 %v3145_v28  ;;  %v3212_v27 = vld [vmem:[%s3962_s1 + $0x4a8] sm:$0xff]   ;;  %v3213_v28 = vld [vmem:[%s3962_s1 + $0x460] sm:$0xff]  }
  0x60   : > { %2865 = vmatprep.subr.bf16.mxu1 %v3147_v30  ;;  %v3215_v30 = vld [vmem:[%s3962_s1 + $0x4e0] sm:$0xff]  }
  0x62   : > { %2844 = vmatpush3.bf16.msra.mxu0 %v3146_v29  ;;  %v3214_v29 = vld [vmem:[%s3962_s1 + $0x420] sm:$0xff]  }
  0x63   : > { %2866 = vmatpush3.bf16.msra.mxu1 %v3148_v31  ;;  %2845 = vmatprep.subr.bf16.mxu0 %v3149_v32  ;;  %v3216_v31 = vld [vmem:[%s3962_s1 + $0x4a0] sm:$0xff]   ;;  %v3217_v32 = vld [vmem:[%s3962_s1 + $0x458] sm:$0xff]  }
  0x64   : > { %2867 = vmatprep.subr.bf16.mxu1 %v3151_v34  ;;  %v3219_v34 = vld [vmem:[%s3962_s1 + $0x4d8] sm:$0xff]  }
  0x66   : > { %2846 = vmatpush3.bf16.msra.mxu0 %v3150_v33  ;;  %v3218_v33 = vld [vmem:[%s3962_s1 + $0x418] sm:$0xff]  }
  0x67   : > { %2868 = vmatpush3.bf16.msra.mxu1 %v3152_v35  ;;  %2847 = vmatprep.subr.bf16.mxu0 %v3153_v36  ;;  %v3220_v35 = vld [vmem:[%s3962_s1 + $0x498] sm:$0xff]   ;;  %v3221_v36 = vld [vmem:[%s3962_s1 + $0x450] sm:$0xff]  }
  0x68   : > { %2869 = vmatprep.subr.bf16.mxu1 %v3155_v38  ;;  %v3223_v38 = vld [vmem:[%s3962_s1 + $0x4d0] sm:$0xff]  }
  0x6a   : > { %2848 = vmatpush3.bf16.msra.mxu0 %v3154_v37  ;;  %v3222_v37 = vld [vmem:[%s3962_s1 + $0x410] sm:$0xff]  }
  0x6b   : > { %2870 = vmatpush3.bf16.msra.mxu1 %v3159_v41  ;;  %2877 = vmatprep.subr.bf16.mxu0 %v3160_v42  ;;  %v3226_v41 = vld [vmem:[%s3962_s1 + $0x408] sm:$0xff]  }
  0x6c   : > { %2899 = vmatprep.subr.bf16.mxu1 %v3165_v46  ;;  %v3227_v42 = vld [vmem:[%s3962_s1 + $0x4c8] sm:$0xff]   ;;  %v3231_v46 = vld [vmem:[%s3962_s1 + $0x4c0] sm:$0xff]  }
  0x6d   : > { %2100 = vmatmul.mubr.bf16.vlgmr.msra.gmra.mxu0 %v3156_v39  ;;  %v3224_v39 = vld [vmem:[%s3962_s1 + $0x490] sm:$0xff]  }
  0x6e   : > { %2878 = vmatpush3.bf16.msra.mxu0 %v3164_v45  ;;  %2141 = vmatmul.mubr.bf16.vlgmr.msra.gmra.mxu1 %v3161_v43  ;;  %v3228_v43 = vld [vmem:[%s3962_s1 + $0x488] sm:$0xff]   ;;  %v3230_v45 = vld [vmem:[%s3962_s1 + $0x400] sm:$0xff]  }
  0x6f   : > { %2900 = vmatpush3.bf16.msra.mxu1 %v3166_v47  ;;  %2879 = vmatprep.subr.bf16.mxu0 %v3167_v48  ;;  %v3232_v47 = vld [vmem:[%s3417_s23 + $0x40] ss:$100 sps:$4 sm:$0xff]  }
  0x70   : > { %2901 = vmatprep.subr.bf16.mxu1 %v3169_v50  ;;  %2181 = vmatprep.mubr.bf16.mxu0 %v3196_v12  ;;  %v3234_v48 = vld [vmem:[%s3417_s23 + $0x44] ss:$100 sps:$4 sm:$0xff]   ;;  %v3236_v50 = vld [vmem:[%s3962_s1 + $0x578] sm:$0xff]  }
  0x71   : > { %2222 = vmatprep.mubr.bf16.mxu1 %v3201_v16  ;;  %v3263_v12 = vld [vmem:[%s3962_s1 + $0x548] sm:$0xff]   ;;  %v3267_v16 = vld [vmem:[%s3962_s1 + $0x540] sm:$0xff]  }
  0x72   : > { %2880 = vmatpush3.bf16.msra.mxu0 %v3168_v49  ;;  %v3235_v49 = vld [vmem:[%s3962_s1 + $0x480] sm:$0xff]  }
  0x73   : > { %2902 = vmatpush3.bf16.msra.mxu1 %v3170_v51  ;;  %2881 = vmatprep.subr.bf16.mxu0 %v3171_v52  ;;  %v3237_v51 = vld [vmem:[%s3417_s23 + $0x48] ss:$100 sps:$4 sm:$0xff]  }
  0x74   : > { %2903 = vmatprep.subr.bf16.mxu1 %v3173_v54  ;;  %v3239_v52 = vld [vmem:[%s3417_s23 + $0x4c] ss:$100 sps:$4 sm:$0xff]   ;;  %v3241_v54 = vld [vmem:[%s3962_s1 + $0x5f8] sm:$0xff]  }
  0x76   : > { %2882 = vmatpush3.bf16.msra.mxu0 %v3172_v53  ;;  %v3240_v53 = vld [vmem:[%s3962_s1 + $0x538] sm:$0xff]  }
  0x77   : > { %2904 = vmatpush3.bf16.msra.mxu1 %v3174_v55  ;;  %2883 = vmatprep.subr.bf16.mxu0 %v3175_v56  ;;  %v3242_v55 = vld [vmem:[%s3962_s1 + $0x5b8] sm:$0xff]   ;;  %v3243_v56 = vld [vmem:[%s3962_s1 + $0x570] sm:$0xff]  }
  0x78   : > { %2905 = vmatprep.subr.bf16.mxu1 %v3177_v58  ;;  %v3245_v58 = vld [vmem:[%s3962_s1 + $0x5f0] sm:$0xff]  }
  0x7a   : > { %2884 = vmatpush3.bf16.msra.mxu0 %v3176_v57  ;;  %v3244_v57 = vld [vmem:[%s3962_s1 + $0x530] sm:$0xff]  }
  0x7b   : > { %2906 = vmatpush3.bf16.msra.mxu1 %v3178_v59  ;;  %2885 = vmatprep.subr.bf16.mxu0 %v3179_v60  ;;  %v3246_v59 = vld [vmem:[%s3962_s1 + $0x5b0] sm:$0xff]   ;;  %v3247_v60 = vld [vmem:[%s3962_s1 + $0x568] sm:$0xff]  }
  0x7c   : > { %2907 = vmatprep.subr.bf16.mxu1 %v3181_v62  ;;  %v3249_v62 = vld [vmem:[%s3962_s1 + $0x5e8] sm:$0xff]  }
  0x7e   : > { %2886 = vmatpush3.bf16.msra.mxu0 %v3180_v61  ;;  %v3248_v61 = vld [vmem:[%s3962_s1 + $0x528] sm:$0xff]  }
  0x7f   : > { %2908 = vmatpush3.bf16.msra.mxu1 %v3182_v63  ;;  %2887 = vmatprep.subr.bf16.mxu0 %v3183_v0  ;;  %v3250_v63 = vld [vmem:[%s3962_s1 + $0x5a8] sm:$0xff]   ;;  %v3251_v0 = vld [vmem:[%s3962_s1 + $0x560] sm:$0xff]  }
  0x80   : > { %2909 = vmatprep.subr.bf16.mxu1 %v3185_v2  ;;  %v3253_v2 = vld [vmem:[%s3962_s1 + $0x5e0] sm:$0xff]  }
  0x82   : > { %2888 = vmatpush3.bf16.msra.mxu0 %v3184_v1  ;;  %v3252_v1 = vld [vmem:[%s3962_s1 + $0x520] sm:$0xff]  }
  0x83   : > { %2910 = vmatpush3.bf16.msra.mxu1 %v3186_v3  ;;  %2889 = vmatprep.subr.bf16.mxu0 %v3187_v4  ;;  %v3254_v3 = vld [vmem:[%s3962_s1 + $0x5a0] sm:$0xff]   ;;  %v3255_v4 = vld [vmem:[%s3962_s1 + $0x558] sm:$0xff]  }
  0x84   : > { %2911 = vmatprep.subr.bf16.mxu1 %v3189_v6  ;;  %v3257_v6 = vld [vmem:[%s3962_s1 + $0x5d8] sm:$0xff]  }
  0x86   : > { %2890 = vmatpush3.bf16.msra.mxu0 %v3188_v5  ;;  %v3256_v5 = vld [vmem:[%s3962_s1 + $0x518] sm:$0xff]  }
  0x87   : > { %2912 = vmatpush3.bf16.msra.mxu1 %v3190_v7  ;;  %2891 = vmatprep.subr.bf16.mxu0 %v3191_v8  ;;  %v3258_v7 = vld [vmem:[%s3962_s1 + $0x598] sm:$0xff]   ;;  %v3259_v8 = vld [vmem:[%s3962_s1 + $0x550] sm:$0xff]  }
  0x88   : > { %2913 = vmatprep.subr.bf16.mxu1 %v3193_v10  ;;  %v3261_v10 = vld [vmem:[%s3962_s1 + $0x5d0] sm:$0xff]  }
  0x8a   : > { %2892 = vmatpush3.bf16.msra.mxu0 %v3192_v9  ;;  %v3260_v9 = vld [vmem:[%s3962_s1 + $0x510] sm:$0xff]  }
  0x8b   : > { %2914 = vmatpush3.bf16.msra.mxu1 %v3197_v13  ;;  %2921 = vmatprep.subr.bf16.mxu0 %v3198_v14  ;;  %v3264_v13 = vld [vmem:[%s3962_s1 + $0x508] sm:$0xff]  }
  0x8c   : > { %2943 = vmatprep.subr.bf16.mxu1 %v3203_v18  ;;  %v3265_v14 = vld [vmem:[%s3962_s1 + $0x5c8] sm:$0xff]   ;;  %v3269_v18 = vld [vmem:[%s3962_s1 + $0x5c0] sm:$0xff]  }
  0x8d   : > { %2182 = vmatmul.mubr.bf16.vlgmr.msra.gmra.mxu0 %v3194_v11  ;;  %v3262_v11 = vld [vmem:[%s3962_s1 + $0x590] sm:$0xff]  }
  0x8e   : > { %2922 = vmatpush3.bf16.msra.mxu0 %v3202_v17  ;;  %2223 = vmatmul.mubr.bf16.vlgmr.msra.gmra.mxu1 %v3199_v15  ;;  %v3266_v15 = vld [vmem:[%s3962_s1 + $0x588] sm:$0xff]   ;;  %v3268_v17 = vld [vmem:[%s3962_s1 + $0x500] sm:$0xff]  }
  0x8f   : > { %2944 = vmatpush3.bf16.msra.mxu1 %v3204_v19  ;;  %2923 = vmatprep.subr.bf16.mxu0 %v3205_v20  ;;  %v3270_v19 = vld [vmem:[%s3417_s23 + $0x50] ss:$100 sps:$4 sm:$0xff]  }
  0x90   : > { %2945 = vmatprep.subr.bf16.mxu1 %v3207_v22  ;;  %2263 = vmatprep.mubr.bf16.mxu0 %v3234_v48  ;;  %v3272_v20 = vld [vmem:[%s3417_s23 + $0x54] ss:$100 sps:$4 sm:$0xff]   ;;  %v3294_v22 = vmov 0.0  }
  0x91   : > { %2304 = vmatprep.mubr.bf16.mxu1 %v3239_v52 }
  0x92   : > { %2924 = vmatpush3.bf16.msra.mxu0 %v3206_v21  ;;  %v3273_v21 = vld [vmem:[%s3962_s1 + $0x580] sm:$0xff]  }
  0x93   : > { %2946 = vmatpush3.bf16.msra.mxu1 %v3208_v23  ;;  %2925 = vmatprep.subr.bf16.mxu0 %v3209_v24  ;;  %v3274_v23 = vld [vmem:[%s3417_s23 + $0x58] ss:$100 sps:$4 sm:$0xff]  }
  0x94   : > { %2947 = vmatprep.subr.bf16.mxu1 %v3211_v26  ;;  %v3276_v24 = vld [vmem:[%s3417_s23 + $0x5c] ss:$100 sps:$4 sm:$0xff]   ;;  %v3278_v26 = vld [vmem:[%s3962_s1 + $0x630] sm:$0xff]  }
  0x96   : > { %2926 = vmatpush3.bf16.msra.mxu0 %v3210_v25  ;;  %v3277_v25 = vld [vmem:[%s3962_s1 + $0x638] sm:$0xff]  }
  0x97   : > { %2948 = vmatpush3.bf16.msra.mxu1 %v3212_v27  ;;  %2927 = vmatprep.subr.bf16.mxu0 %v3213_v28  ;;  %v3279_v27 = vld [vmem:[%s3962_s1 + $0x628] sm:$0xff]   ;;  %v3280_v28 = vld [vmem:[%s3962_s1 + $0x620] sm:$0xff]  }
  0x98   : > { %2949 = vmatprep.subr.bf16.mxu1 %v3215_v30  ;;  %v3282_v30 = vld [vmem:[%s3962_s1 + $0x610] sm:$0xff]  }
  0x9a   : > { %2928 = vmatpush3.bf16.msra.mxu0 %v3214_v29  ;;  %v3281_v29 = vld [vmem:[%s3962_s1 + $0x618] sm:$0xff]  }
  0x9b   : > { %2950 = vmatpush3.bf16.msra.mxu1 %v3216_v31  ;;  %2929 = vmatprep.subr.bf16.mxu0 %v3217_v32  ;;  %v3283_v31 = vld [vmem:[%s3962_s1 + $0x608] sm:$0xff]   ;;  %v3284_v32 = vld [vmem:[%s3962_s1 + $0x600] sm:$0xff]  }
  0x9c   : > { %2951 = vmatprep.subr.bf16.mxu1 %v3219_v34 }
  0x9e   : > { %2930 = vmatpush3.bf16.msra.mxu0 %v3218_v33  ;;  %v3285_v33 = vld [vmem:[%s3417_s23 + $0x60] ss:$100 sps:$4 sm:$0xff]   ;;  %s2513_s23 = sshll.u32 %s3965_s15, 2 }
  0x9f   : > { %2952 = vmatpush3.bf16.msra.mxu1 %v3220_v35  ;;  %2931 = vmatprep.subr.bf16.mxu0 %v3221_v36  ;;  %s148_s14 = scalar_lea.vmem %s3963_s2, %s2513_s23 }
  0xa0   : > { %2953 = vmatprep.subr.bf16.mxu1 %v3223_v38 }
  0xa2   : > { %2932 = vmatpush3.bf16.msra.mxu0 %v3222_v37 }
  0xa3   : > { %2954 = vmatpush3.bf16.msra.mxu1 %v3224_v39  ;;  %2933 = vmatprep.subr.bf16.mxu0 %v3225_v40 }
  0xa4   : > { %2955 = vmatprep.subr.bf16.mxu1 %v3227_v42 }
  0xa6   : > { %2934 = vmatpush3.bf16.msra.mxu0 %v3226_v41 }
  0xa7   : > { %2956 = vmatpush3.bf16.msra.mxu1 %v3228_v43  ;;  %2935 = vmatprep.subr.bf16.mxu0 %v3229_v44 }
  0xa8   : > { %2957 = vmatprep.subr.bf16.mxu1 %v3231_v46 }
  0xaa   : > { %2936 = vmatpush3.bf16.msra.mxu0 %v3230_v45 }
  0xab   : > { %2958 = vmatpush3.bf16.msra.mxu1 %v3235_v49  ;;  %2965 = vmatprep.subr.bf16.mxu0 %v3236_v50 }
  0xac   : > { %2987 = vmatprep.subr.bf16.mxu1 %v3241_v54 }
  0xad   : > { %2264 = vmatmul.mubr.bf16.vlgmr.msra.gmra.mxu0 %v3232_v47 }
  0xae   : > { %2966 = vmatpush3.bf16.msra.mxu0 %v3240_v53  ;;  %2305 = vmatmul.mubr.bf16.vlgmr.msra.gmra.mxu1 %v3237_v51 }
  0xaf   : > { %2988 = vmatpush3.bf16.msra.mxu1 %v3242_v55  ;;  %2967 = vmatprep.subr.bf16.mxu0 %v3243_v56 }
  0xb0   : > { %2989 = vmatprep.subr.bf16.mxu1 %v3245_v58  ;;  %2345 = vmatprep.mubr.bf16.mxu0 %v3272_v20 }
  0xb1   : > { %2386 = vmatprep.mubr.bf16.mxu1 %v3276_v24 }
  0xb2   : > { %2968 = vmatpush3.bf16.msra.mxu0 %v3244_v57 }
  0xb3   : > { %2990 = vmatpush3.bf16.msra.mxu1 %v3246_v59  ;;  %2969 = vmatprep.subr.bf16.mxu0 %v3247_v60 }
  0xb4   : > { %2991 = vmatprep.subr.bf16.mxu1 %v3249_v62 }
  0xb6   : > { %2970 = vmatpush3.bf16.msra.mxu0 %v3248_v61 }
  0xb7   : > { %2992 = vmatpush3.bf16.msra.mxu1 %v3250_v63  ;;  %2971 = vmatprep.subr.bf16.mxu0 %v3251_v0 }
  0xb8   : > { %2993 = vmatprep.subr.bf16.mxu1 %v3253_v2 }
  0xba   : > { %2972 = vmatpush3.bf16.msra.mxu0 %v3252_v1 }
  0xbb   : > { %2994 = vmatpush3.bf16.msra.mxu1 %v3254_v3  ;;  %2973 = vmatprep.subr.bf16.mxu0 %v3255_v4 }
  0xbc   : > { %2995 = vmatprep.subr.bf16.mxu1 %v3257_v6 }
  0xbe   : > { %2974 = vmatpush3.bf16.msra.mxu0 %v3256_v5 }
  0xbf   : > { %2996 = vmatpush3.bf16.msra.mxu1 %v3258_v7  ;;  %2975 = vmatprep.subr.bf16.mxu0 %v3259_v8 }
  0xc0   : > { %2997 = vmatprep.subr.bf16.mxu1 %v3261_v10 }
  0xc2   : > { %2976 = vmatpush3.bf16.msra.mxu0 %v3260_v9 }
  0xc3   : > { %2998 = vmatpush3.bf16.msra.mxu1 %v3262_v11  ;;  %2977 = vmatprep.subr.bf16.mxu0 %v3263_v12 }
  0xc4   : > { %2999 = vmatprep.subr.bf16.mxu1 %v3265_v14 }
  0xc6   : > { %2978 = vmatpush3.bf16.msra.mxu0 %v3264_v13 }
  0xc7   : > { %3000 = vmatpush3.bf16.msra.mxu1 %v3266_v15  ;;  %2979 = vmatprep.subr.bf16.mxu0 %v3267_v16 }
  0xc8   : > { %3001 = vmatprep.subr.bf16.mxu1 %v3269_v18 }
  0xca   : > { %2980 = vmatpush3.bf16.msra.mxu0 %v3268_v17 }
  0xcb   : > { %3018 = vmatprep.subr.bf16.mxu0 %v3294_v22  ;;  %3002 = vmatpush3.bf16.msra.mxu1 %v3273_v21 }
  0xcd   : > { %2346 = vmatmul.mubr.bf16.vlgmr.msra.gmra.mxu0 %v3270_v19 }
  0xce   : > { %3034 = vmatprep.mubr.msk.bf16.mxu0 %vm3295_vm0, %v3294_v22  ;;  %3019 = vmatpush3.bf16.msra.mxu0 %v3277_v25 }
  0xcf   : > { %2387 = vmatmul.mubr.bf16.vlgmr.msra.gmra.mxu1 %v3274_v23  ;;  %3020 = vmatprep.subr.bf16.mxu0 %v3294_v22 }
  0xd2   : > { %3021 = vmatpush3.bf16.msra.mxu0 %v3278_v26 }
  0xd3   : > { %3022 = vmatprep.subr.bf16.mxu0 %v3294_v22 }
  0xd6   : > { %3023 = vmatpush3.bf16.msra.mxu0 %v3279_v27 }
  0xd7   : > { %3024 = vmatprep.subr.bf16.mxu0 %v3294_v22 }
  0xda   : > { %3025 = vmatpush3.bf16.msra.mxu0 %v3280_v28 }
  0xdb   : > { %3026 = vmatprep.subr.bf16.mxu0 %v3294_v22 }
  0xde   : > { %3027 = vmatpush3.bf16.msra.mxu0 %v3281_v29 }
  0xdf   : > { %3028 = vmatprep.subr.bf16.mxu0 %v3294_v22 }
  0xe2   : > { %3029 = vmatpush3.bf16.msra.mxu0 %v3282_v30 }
  0xe3   : > { %3030 = vmatprep.subr.bf16.mxu0 %v3294_v22 }
  0xe6   : > { %3031 = vmatpush3.bf16.msra.mxu0 %v3283_v31 }
  0xe7   : > { %3032 = vmatprep.subr.bf16.mxu0 %v3294_v22 }
  0xea   : > { %3033 = vmatpush3.bf16.msra.mxu0 %v3284_v32 }
  0xed   : > { %3035 = vmatmul.mubr.bf16.vlgmr.msra.gmra.mxu0 %v3285_v33  ;;  %v2761_v34 = vpop.f32.mrf.mxu0 }
  0xee   : > { %v2783_v35 = vpop.f32.mrf.mxu1 }
  0xef   : > { %v2762_v36 = vpop.f32.mrf.mxu0 }
  0xf0   : > { %v2784_v37 = vpop.f32.mrf.mxu1  ;;  %v2763_v1 = vadd.f32 %v2762_v36, %v2761_v34 }
  0xf1   : > { %v2764_v38 = vpop.f32.mrf.mxu0  ;;  %v2785_v2 = vadd.f32 %v2784_v37, %v2783_v35 }
  0xf2   : > { %v2786_v39 = vpop.f32.mrf.mxu1 }
  0xf3   : > { %v2765_v40 = vpop.f32.mrf.mxu0  ;;  %v1979_v6 = vadd.f32 %v2785_v2, %v2763_v1 }
  0xf4   : > { %v2787_v42 = vpop.f32.mrf.mxu1  ;;  %v2766_v7 = vadd.f32 %v2765_v40, %v2764_v38 }
  0xf5   : > { %v2788_v8 = vadd.f32 %v2787_v42, %v2786_v39 }
  0xf7   : > { %v1982_v14 = vadd.f32 %v2788_v8, %v2766_v7 }
 0x10d   : > { %v2805_v41 = vpop.f32.mrf.mxu0 }
 0x10e   : > { %v2827_v44 = vpop.f32.mrf.mxu1 }
 0x10f   : > { %v2806_v43 = vpop.f32.mrf.mxu0 }
 0x110   : > { %v2828_v46 = vpop.f32.mrf.mxu1  ;;  %v2807_v4 = vadd.f32 %v2806_v43, %v2805_v41 }
 0x111   : > { %v2808_v45 = vpop.f32.mrf.mxu0  ;;  %v2829_v12 = vadd.f32 %v2828_v46, %v2827_v44 }
 0x112   : > { %v2830_v48 = vpop.f32.mrf.mxu1  ;;  %v2020_v11 = vadd.f32 %v2807_v4, %v1979_v6 }
 0x113   : > { %v2809_v47 = vpop.f32.mrf.mxu0 }
 0x114   : > { %v2831_v50 = vpop.f32.mrf.mxu1  ;;  %v2810_v13 = vadd.f32 %v2809_v47, %v2808_v45  ;;  %v2061_v18 = vadd.f32 %v2829_v12, %v2020_v11 }
 0x115   : > { %v2832_v20 = vadd.f32 %v2831_v50, %v2830_v48 }
 0x116   : > { %v2023_v19 = vadd.f32 %v2810_v13, %v1982_v14 }
 0x118   : > { %v2064_v26 = vadd.f32 %v2832_v20, %v2023_v19 }
 0x12d   : > { %v2849_v49 = vpop.f32.mrf.mxu0 }
 0x12e   : > { %v2871_v52 = vpop.f32.mrf.mxu1 }
 0x12f   : > { %v2850_v51 = vpop.f32.mrf.mxu0 }
 0x130   : > { %v2872_v54 = vpop.f32.mrf.mxu1  ;;  %v2851_v15 = vadd.f32 %v2850_v51, %v2849_v49 }
 0x131   : > { %v2852_v53 = vpop.f32.mrf.mxu0  ;;  %v2873_v22 = vadd.f32 %v2872_v54, %v2871_v52 }
 0x132   : > { %v2874_v56 = vpop.f32.mrf.mxu1  ;;  %v2102_v21 = vadd.f32 %v2851_v15, %v2061_v18 }
 0x133   : > { %v2853_v55 = vpop.f32.mrf.mxu0 }
 0x134   : > { %v2875_v58 = vpop.f32.mrf.mxu1  ;;  %v2854_v23 = vadd.f32 %v2853_v55, %v2852_v53  ;;  %v2143_v29 = vadd.f32 %v2873_v22, %v2102_v21 }
 0x135   : > { %v2876_v31 = vadd.f32 %v2875_v58, %v2874_v56 }
 0x136   : > { %v2105_v30 = vadd.f32 %v2854_v23, %v2064_v26 }
 0x138   : > { %v2146_v38 = vadd.f32 %v2876_v31, %v2105_v30 }
 0x14d   : > { %v2893_v57 = vpop.f32.mrf.mxu0 }
 0x14e   : > { %v2915_v60 = vpop.f32.mrf.mxu1 }
 0x14f   : > { %v2894_v59 = vpop.f32.mrf.mxu0 }
 0x150   : > { %v2916_v62 = vpop.f32.mrf.mxu1  ;;  %v2895_v27 = vadd.f32 %v2894_v59, %v2893_v57 }
 0x151   : > { %v2896_v61 = vpop.f32.mrf.mxu0  ;;  %v2917_v34 = vadd.f32 %v2916_v62, %v2915_v60 }
 0x152   : > { %v2918_v0 = vpop.f32.mrf.mxu1  ;;  %v2184_v33 = vadd.f32 %v2895_v27, %v2143_v29 }
 0x153   : > { %v2897_v63 = vpop.f32.mrf.mxu0 }
 0x154   : > { %v2919_v5 = vpop.f32.mrf.mxu1  ;;  %v2898_v35 = vadd.f32 %v2897_v63, %v2896_v61  ;;  %v2225_v40 = vadd.f32 %v2917_v34, %v2184_v33 }
 0x155   : > { %v2920_v42 = vadd.f32 %v2919_v5, %v2918_v0 }
 0x156   : > { %v2187_v41 = vadd.f32 %v2898_v35, %v2146_v38 }
 0x158   : > { %v2228_v48 = vadd.f32 %v2920_v42, %v2187_v41 }
 0x16d   : > { %v2937_v3 = vpop.f32.mrf.mxu0 }
 0x16e   : > { %v2959_v10 = vpop.f32.mrf.mxu1 }
 0x16f   : > { %v2938_v9 = vpop.f32.mrf.mxu0 }
 0x170   : > { %v2960_v17 = vpop.f32.mrf.mxu1  ;;  %v2939_v39 = vadd.f32 %v2938_v9, %v2937_v3 }
 0x171   : > { %v2940_v16 = vpop.f32.mrf.mxu0  ;;  %v2961_v46 = vadd.f32 %v2960_v17, %v2959_v10 }
 0x172   : > { %v2962_v25 = vpop.f32.mrf.mxu1  ;;  %v2266_v45 = vadd.f32 %v2939_v39, %v2225_v40 }
 0x173   : > { %v2941_v24 = vpop.f32.mrf.mxu0 }
 0x174   : > { %v2963_v32 = vpop.f32.mrf.mxu1  ;;  %v2942_v47 = vadd.f32 %v2941_v24, %v2940_v16  ;;  %v2307_v52 = vadd.f32 %v2961_v46, %v2266_v45 }
 0x175   : > { %v2964_v54 = vadd.f32 %v2963_v32, %v2962_v25 }
 0x176   : > { %v2269_v53 = vadd.f32 %v2942_v47, %v2228_v48 }
 0x178   : > { %v2310_v59 = vadd.f32 %v2964_v54, %v2269_v53 }
 0x18d   : > { %v2981_v28 = vpop.f32.mrf.mxu0 }
 0x18f   : > { %v2982_v36 = vpop.f32.mrf.mxu0  ;;  %v3003_v37 = vpop.f32.mrf.mxu1 }
 0x190   : > { %v2983_v49 = vadd.f32 %v2982_v36, %v2981_v28 }
 0x191   : > { %v2984_v43 = vpop.f32.mrf.mxu0  ;;  %v3004_v44 = vpop.f32.mrf.mxu1 }
 0x192   : > { %v2348_v55 = vadd.f32 %v2983_v49, %v2307_v52  ;;  %v3005_v56 = vadd.f32 %v3004_v44, %v3003_v37 }
 0x193   : > { %v2985_v50 = vpop.f32.mrf.mxu0  ;;  %v3006_v51 = vpop.f32.mrf.mxu1 }
 0x194   : > { %v2986_v57 = vadd.f32 %v2985_v50, %v2984_v43  ;;  %v2389_v62 = vadd.f32 %v3005_v56, %v2348_v55 }
 0x195   : > { %v3007_v58 = vpop.f32.mrf.mxu1 }
 0x196   : > { %v2351_v60 = vadd.f32 %v2986_v57, %v2310_v59  ;;  %v3008_v61 = vadd.f32 %v3007_v58, %v3006_v51 }
 0x198   : > { %v2392_v3 = vadd.f32 %v3008_v61, %v2351_v60 }
 0x1ad   : > { %v2429_v63 = vpop.f32.mrf.mxu0 }
 0x1ae   : > { %v2430_v0 = vadd.f32 %v2429_v63, %v2389_v62 }
 0x1af   : > { %v3036_v1 = vpop.f32.mrf.mxu0 }
 0x1b0   : > { %v2436_v2 = vmax.f32 %v2430_v0, 0.0 }
 0x1b1   : > { %v2432_v4 = vpop.f32.mrf.mxu0 }
 0x1b2   : > { %v2743_v5 = vpack.c.bf16 %v2436_v2, %v2436_v2  ;;  %v2433_v6 = vadd.f32 %v2432_v4, %v2392_v3 }
 0x1b3   : > { %v3037_v7 = vpop.f32.mrf.mxu0 }
 0x1b4   : > { %2447 = vst.msk [vmem:[%s148_s14] sm:$0xf] %vm2446_vm1, %v2743_v5  ;;  %v2437_v8 = vmax.f32 %v2433_v6, 0.0 }
 0x1b6   : > { %v2744_v9 = vpack.c.bf16 %v2437_v8, %v2437_v8 }
 0x1b8   : > { %2448 = vst.msk [vmem:[%s148_s14 + $0x4] sm:$0xf] %vm2446_vm1, %v2744_v9 }
 0x1b9 PF: > { %s12_s9 = sadd.s32 1, %s3292_s9  }
 0x1ba   : > { %p9_p4 = scmp.ge.s32.totalorder %s12_s9, 4  }
 0x1bc   :  { %11 = sbr.rel (!%p9_p4) target bundleno = 1 (0x1), region = 58 }

// kernel: scott_forward.5
= control target key start
LH: loop header
LB: loop body
LE: loop exit
PB: predicated region body
PF: predicated region fallthrough
CT: control target
= control target key end

     0   :  { %s3527_s0 = inlined_call_operand.vmem [shape: f32[2,4,64], index: 0, kind: input, shape index: {}]   ;;  %s3528_s1 = inlined_call_operand.vmem [shape: f32[1,4,64], index: 1, kind: input, shape index: {}]   ;;  %s3529_s2 = inlined_call_operand.vmem [shape: f32[1,2,64], index: 2, kind: input, shape index: {}]   ;;  %s3530_s3 = inlined_call_operand.vmem [shape: f32[2,1,64], index: 3, kind: input, shape index: {}]   ;;  %s3531_s4 = inlined_call_operand.vmem [shape: f32[2,1,64], index: 4, kind: input, shape index: {}]   ;;  %s3532_s5 = inlined_call_operand.vmem [shape: bf16[2,64,64], index: 5, kind: input, shape index: {}]   ;;  %s3533_s6 = inlined_call_operand.vmem [shape: f32[2,1,64], index: 6, kind: input, shape index: {}]   ;;  %s3534_s7 = inlined_call_operand.vmem [shape: bf16[2,64,64], index: 7, kind: input, shape index: {}]   ;;  %s3535_s8 = inlined_call_operand.vmem [shape: f32[2,1,64], index: 8, kind: input, shape index: {}]   ;;  %s3536_s9 = inlined_call_operand.vmem [shape: bf16[2,64,64], index: 9, kind: input, shape index: {}]   ;;  %s3537_s10 = inlined_call_operand.vmem [shape: f32[2,1,64], index: 10, kind: input, shape index: {}]   ;;  %s3538_s11 = inlined_call_operand.vmem [shape: bf16[2,64,64], index: 11, kind: input, shape index: {}]   ;;  %s3539_s12 = inlined_call_operand.vmem [shape: f32[2,1,64], index: 12, kind: input, shape index: {}]   ;;  %s3540_s13 = inlined_call_operand.vmem [shape: f32[2,1,64], index: 13, kind: input, shape index: {}]   ;;  %s3541_s14 = inlined_call_operand.vmem [shape: f32[2,1,64], index: 14, kind: input, shape index: {}]   ;;  %s3542_s15 = inlined_call_operand.vmem [shape: bf16[2,64,128], index: 15, kind: input, shape index: {}]   ;;  %s3543_s16 = inlined_call_operand.vmem [shape: f32[2,1,128], index: 16, kind: input, shape index: {}]   ;;  %s3544_s17 = inlined_call_operand.vmem [shape: bf16[2,128,64], index: 17, kind: input, shape index: {}]   ;;  %s3545_s18 = inlined_call_operand.vmem [shape: f32[2,1,64], index: 18, kind: input, shape index: {}]   ;;  %s3546_s19 = inlined_call_operand.vmem [shape: f32[1,1,64], index: 19, kind: input, shape index: {}]   ;;  %s3547_s20 = inlined_call_operand.vmem [shape: f32[1,1,64], index: 20, kind: input, shape index: {}]   ;;  %s3548_s21 = inlined_call_operand.hbm [shape: f32[2,4,64], index: 21, kind: output, shape index: {}]  }
   0x1   :  { %3564 = sst [smem:[#allocation19_spill]] %s3527_s0 }
   0x2   :  { %3565 = sst [smem:[#allocation20_spill]] %s3528_s1 }
   0x3   :  { %3566 = sst [smem:[#allocation21_spill]] %s3529_s2 }
   0x4   :  { %3567 = sst [smem:[#allocation22_spill]] %s3530_s3 }
   0x5   :  { %3568 = sst [smem:[#allocation23_spill]] %s3531_s4 }
   0x6   :  { %3569 = sst [smem:[#allocation24_spill]] %s3532_s5 }
   0x7   :  { %3570 = sst [smem:[#allocation25_spill]] %s3534_s7 }
   0x8   :  { %3571 = sst [smem:[#allocation26_spill]] %s3535_s8 }
   0x9   :  { %3572 = sst [smem:[#allocation27_spill]] %s3536_s9 }
   0xa   :  { %3573 = sst [smem:[#allocation28_spill]] %s3538_s11 }
   0xb   :  { %3574 = sst [smem:[#allocation29_spill]] %s3539_s12 }
   0xc   :  { %3575 = sst [smem:[#allocation30_spill]] %s3540_s13 }
   0xd   :  { %3576 = sst [smem:[#allocation31_spill]] %s3544_s17 }
   0xe   :  { %3577 = sst [smem:[#allocation32_spill]] %s3545_s18 }
   0xf   :  { %3578 = sst [smem:[#allocation33_spill]] %s3546_s19 }
  0x10   :  { %3579 = sst [smem:[#allocation34_spill]] %s3547_s20 }
  0x11   :  { %3580 = sst [smem:[#allocation35_spill]] %s3548_s21 }
  0x12   :  { %26 = vsyncpa [#allocation4], 0 }
  0x13   :  { %28 = vsyncpa [#allocation4 + $0x1], 0  ;;  %s3100_s2 = smov 0   ;;  %s3102_s25 = smov 0  }
  0x14   :  { %s3104_s26 = smov 0   ;;  %s3106_s27 = smov 0  }
  0x15   :  { %s3108_s3 = smov 0   ;;  %s3110_s28 = smov 0  }
  0x16   :  { %s3112_s29 = smov 0   ;;  %s3114_s0 = smov 0  }
  0x17 LB: > { %3581 = sst [smem:[#allocation6_spill]] %s2951_s2  ;;  %s2494_s4 = sadd.s32 4294967295, %s2979_s0   ;;  %s2979_s0 = sphi %s3114_s0, %s34_s0   ;;  %s2975_s29 = sphi %s3112_s29, %s3641_s29   ;;  %s2971_s28 = sphi %s3110_s28, %s3640_s28   ;;  %s2967_s3 = sphi %s3108_s3, %s3639_s3   ;;  %s2963_s27 = sphi %s3106_s27, %s3638_s27   ;;  %s2959_s26 = sphi %s3104_s26, %s3637_s26   ;;  %s2955_s25 = sphi %s3102_s25, %s3636_s25   ;;  %s2951_s2 = sphi %s3100_s2, %s3635_s2  }
  0x18   : > { %3582 = sst [smem:[#allocation7_spill]] %s2955_s25  ;;  %s2495_s30 = sadd.s32 4294967294, %s2979_s0  }
  0x19   : > { %3583 = sst [smem:[#allocation8_spill]] %s2959_s26  ;;  %s43_s5 = sadd.s32 1, %s2971_s28 }
  0x1a   : > { %3584 = sst [smem:[#allocation9_spill]] %s2963_s27  ;;  %p44_p0 = scmp.ge.s32.totalorder %s43_s5, 2 }
  0x1b   : > { %3585 = sst [smem:[#allocation10_spill]] %s2967_s3  ;;  %s46_s22 = sadd.s32 1, %s2975_s29 }
  0x1c   : > { %3586 = sst [smem:[#allocation11_spill]] %s2971_s28  ;;  %p589_p1 = scmp.ne.s32.totalorder %s2959_s26, %s2955_s25 }
  0x1d   : > { %3587 = sst [smem:[#allocation12_spill]] %s2975_s29  ;;  %p590_p2 = scmp.eq.s32.totalorder %s2494_s4, 3 }
  0x1e   : > { %3588 = sst [smem:[#allocation13_spill]] %s2979_s0  ;;  %s3643_s5 = smov (%p44_p0, %s43_s5), 0 }
  0x1f   : > { %3589 = sst [smem:[#allocation14_spill]] %s3643_s5  ;;  %s3645_s22 = smov (!%p44_p0, %s46_s22), %s2975_s29 }
  0x20   : > { %p3149_p3 = por %p590_p2, %p589_p1  ;;  %p595_p4 = scmp.ne.s32.totalorder %s2955_s25, %s2951_s2 }
  0x21   : > { %p48_p5 = scmp.ge.s32.totalorder %s3645_s22, 2  ;;  %p596_p6 = scmp.eq.s32.totalorder %s2495_s30, 3 }
  0x22   : > { %s3590_s23 = scalar_select %p3149_p3, 1, 0 }
  0x23   : > { %p2498_p7 = scmp.ge.s32.totalorder %s2979_s0, 1  ;;  %p741_p8 = scmp.lt.s32.totalorder %s2979_s0, 5 }
  0x24   : > { %3591 = sst [smem:[#allocation15_spill]] %s3590_s23  ;;  %s3647_s22 = smov (%p48_p5, %s3645_s22), 0 }
  0x25   : > { %3592 = sst [smem:[#allocation16_spill]] %s3647_s22  ;;  %p3159_p9 = por %p596_p6, %p595_p4 }
  0x26   : > { %p742_p10 = pnand %p2498_p7, %p741_p8  ;;  %s576_s24 = ssub.s32 %s2975_s29, %s3647_s22 }
  0x27   : > { %s3593_s1 = scalar_select %p3159_p9, 1, 0 }
  0x28   : > { %s579_s4 = sadd.s32 1, %s2959_s26  ;;  %p577_p11 = scmp.eq.s32.totalorder %s576_s24, 0 }
  0x29   : > { %3594 = sst [smem:[#allocation17_spill]] %s3593_s1  ;;  %745 = sbr.rel (%p742_p10) target bundleno = 3202 (0xc82), region = 104 }
  0x2a   : > { %s3167_s5 = scalar_select %p577_p11, %s2959_s26, %s579_s4  }
  0x2b   : > { %s3554_s30 = sand.u32 (!%p742_p10), 1, %s2955_s25   ;;  %p860_p12 = scmp.lt.s32.totalorder (!%p742_p10), %s2967_s3, 1 }
  0x2c   : > { %3595 = sst [smem:[#allocation18_spill]] %s3167_s5  ;;  %s3173_s28 = sshll.u32 (!%p742_p10), %s3554_s30, 2 }
  0x2d   : > { %p864_p13 = scmp.lt.s32.totalorder (!%p742_p10), %s2963_s27, 1  ;;  %s3596_s29 = sld [smem:[#allocation19_spill]] (!%p742_p10) }
  0x2e   : > { %s861_s1 = scalar_select %p860_p12, %s2967_s3, 1 }
  0x2f   : > { %s3178_s2 = scalar_select %p864_p13, %s2963_s27, 1 }
  0x30   : > { %s2500_s24 = sshll.u32 %s861_s1, 2  ;;  %s3599_s18 = sld [smem:[#allocation24_spill]] }
  0x31   : > { %s2580_s19 = sshll.u32 %s3178_s2, 5  ;;  %s3600_s7 = sld [smem:[#allocation25_spill]] }
  0x32   : > { %s3602_s9 = sld [smem:[#allocation27_spill]]  ;;  %s3239_s27 = scalar_lea.vmem %s3542_s15, %s2580_s19 }
  0x33   : > { %s863_s30 = scalar_lea.vmem %s3596_s29, %s2500_s24  ;;  %s3603_s11 = sld [smem:[#allocation28_spill]] }
  0x34   : > { %s915_s21 = scalar_lea.vmem %s3543_s16, %s3178_s2  ;;  %s3607_s3 = sld [smem:[#allocation31_spill]] }
  0x35   : > { %s859_s20 = scalar_lea.vmem [#allocation3], %s3173_s28  ;;  %s3608_s23 = sld [smem:[#allocation9_spill]] }
  0x36   : > { %s3195_s1 = scalar_lea.vmem %s3599_s18, %s2580_s19 }
  0x37   : > { %s3204_s0 = scalar_lea.vmem %s3600_s7, %s2580_s19  ;;  %s3606_s7 = sld [smem:[#allocation32_spill]] }
  0x38   : > { %s3213_s17 = scalar_lea.vmem %s3602_s9, %s2580_s19  ;;  %s907_s9 = scalar_lea.vmem %s3541_s14, %s3178_s2 }
  0x39   : > { %s3222_s29 = scalar_lea.vmem %s3603_s11, %s2580_s19  ;;  %s2585_s11 = sshll.u32 %s3178_s2, 6 }
  0x3a   : > { %s3253_s13 = scalar_lea.vmem %s3607_s3, %s2585_s11 }
  0x3b   : > { %p2513_p0 = scmp.ne.s32.totalorder %s3608_s23, 0 }
  0x3c   : > { %s3609_s18 = sld [smem:[#allocation20_spill]] (!%p2513_p0) }
  0x3d   : > { %s923_s12 = scalar_lea.vmem %s3606_s7, %s3178_s2  ;;  %928 = sbr.rel (%p2513_p0) target bundleno = 71 (0x47), region = 108 }
  0x3e   : > { %s3610_s7 = sld [smem:[#allocation21_spill]] (!%p2513_p0) }
  0x42   : > { %v929_v0 = vld [vmem:[%s863_s30] sm:$0xf]  ;;  %vm932_vm0 = vcmask 519168   ;;  %vm935_vm1 = vcmask 517120  }
  0x43   : > { %v930_v1 = vld [vmem:[%s3609_s18] sm:$0xf] }
  0x44   : > { %v931_v2 = vadd.f32 %v930_v1, %v929_v0  ;;  %v934_v3 = vld [vmem:[%s3610_s7] sm:$0x3] }
  0x45   : > { %936 = vst.msk [vmem:[#allocation2 + $0x4] sm:$0x3] %vm935_vm1, %v934_v3 }
  0x46   : > { %933 = vst.msk [vmem:[#allocation2] sm:$0xf] %vm932_vm0, %v931_v2 }
  0x47 PF: > { %vm940_vm2 = vcmask 521216   ;;  %v2835_v11 = vld [vmem:[%s3195_s1 + $0x18] sm:$0xff]   ;;  %v2981_v13 = vmov 0.0   ;;  %v2837_v14 = vld [vmem:[%s3195_s1 + $0x10] sm:$0xff]   ;;  %vm2982_vm3 = vmmov 0   ;;  %v2839_v16 = vld [vmem:[%s3195_s1 + $0x8] sm:$0xff]   ;;  %s3615_s23 = scalar_lea.vmem %s3533_s6, %s3178_s2  ;;  %s3618_s11 = scalar_lea.vmem %s3537_s10, %s3178_s2 }
  0x48   : > { %v2836_v12 = vld [vmem:[%s3213_s17 + $0x18] sm:$0xff]   ;;  %2636 = vmatprep.subr.bf16.mxu1 %v2981_v13  ;;  %2660 = vmatprep.subr.bf16.mxu0 %v2981_v13  ;;  %v2838_v15 = vld [vmem:[%s3213_s17 + $0x10] sm:$0xff]   ;;  %v2840_v17 = vld [vmem:[%s3213_s17 + $0x8] sm:$0xff]   ;;  %s3613_s26 = sld [smem:[#allocation23_spill]]  ;;  %vm1009_vm4 = vcmask 523264   ;;  %vm1212_vm5 = vcmask 130048  }
  0x49   : > { %2637 = vmatpush3.bf16.msra.mxu1 %v2835_v11  ;;  %2661 = vmatpush3.bf16.msra.mxu0 %v2836_v12  ;;  %v2841_v18 = vld [vmem:[%s3195_s1] sm:$0xff]   ;;  %s3611_s1 = sld [smem:[#allocation22_spill]]  ;;  %v2843_v29 = vld [vmem:[%s3204_s0 + $0x18] sm:$0xff]   ;;  %v2844_v31 = vld [vmem:[%s3204_s0 + $0x10] sm:$0xff]   ;;  %s2983_s30 = smov 112   ;;  %vm1305_vm6 = vcmask 1045504  }
  0x4a   : > { %2638 = vmatprep.subr.bf16.mxu1 %v2981_v13  ;;  %2662 = vmatprep.subr.bf16.mxu0 %v2981_v13  ;;  %v2842_v19 = vld [vmem:[%s3213_s17] sm:$0xff]   ;;  %v2845_v32 = vld [vmem:[%s3204_s0 + $0x8] sm:$0xff]   ;;  %s3616_s18 = sld [smem:[#allocation26_spill]]  ;;  %vm1289_vm7 = vcmask 46080   ;;  %vm1301_vm8 = vcmask 48128   ;;  %s2986_s17 = smov 16  }
  0x4b   : > { %2644 = vmatprep.mubr.msk.bf16.mxu1 %vm2982_vm3, %v2981_v13  ;;  %2668 = vmatprep.mubr.msk.bf16.mxu0 %vm2982_vm3, %v2981_v13  ;;  %v2846_v33 = vld [vmem:[%s3204_s0] sm:$0xff]   ;;  %s2987_s24 = smov 32   ;;  %vm1890_vm9 = vcmask 261120   ;;  %vm1892_vm10 = vcmask 392192   ;;  %s3619_s0 = sld [smem:[#allocation29_spill]] }
  0x4c   : > { %v2516_v42 = vld [vmem:[%s3615_s23] ss:$0 sm:$0xff]  ;;  %s3621_s19 = sld [smem:[#allocation30_spill]] }
  0x4d   : > { %v3263_v4 = vld [vmem:[#allocation2] sm:$0x3f]  ;;  %2639 = vmatpush3.bf16.msra.mxu1 %v2837_v14  ;;  %2663 = vmatpush3.bf16.msra.mxu0 %v2838_v15 }
  0x4e   : > { %v941_v5 = vsel %vm940_vm2, %v3263_v4, 0.0  ;;  %2640 = vmatprep.subr.bf16.mxu1 %v2981_v13  ;;  %2664 = vmatprep.subr.bf16.mxu0 %v2981_v13  ;;  %s3614_s5 = scalar_lea.vmem %s3613_s26, %s3178_s2  ;;  %v2528_v47 = vld [vmem:[%s3618_s11] ss:$0 sm:$0xff]  ;;  %s2988_s26 = smov 48  }
  0x4f   : > { %942 = vadd.xlane.f32.xlu0 %v941_v5  ;;  %s3612_s3 = scalar_lea.vmem %s3611_s1, %s3178_s2  ;;  %v2515_v26 = vld [vmem:[%s3614_s5] ss:$0 sm:$0xff]  ;;  %s2984_s1 = smov 80  }
  0x50   : > { %v2514_v24 = vld [vmem:[%s3612_s3] ss:$0 sm:$0xff]  ;;  %s3617_s22 = scalar_lea.vmem %s3616_s18, %s3178_s2  ;;  %s2985_s3 = smov 96  }
  0x51   : > { %2641 = vmatpush3.bf16.msra.mxu1 %v2839_v16  ;;  %2665 = vmatpush3.bf16.msra.mxu0 %v2840_v17  ;;  %v2522_v43 = vld [vmem:[%s3617_s22] ss:$0 sm:$0xff]  ;;  %s3620_s25 = scalar_lea.vmem %s3619_s0, %s3178_s2  ;;  %s3624_s11 = sld [smem:[#allocation9_spill]] }
  0x52   : > { %2642 = vmatprep.subr.bf16.mxu1 %v2981_v13  ;;  %2666 = vmatprep.subr.bf16.mxu0 %v2981_v13  ;;  %s3622_s18 = scalar_lea.vmem %s3621_s19, %s3178_s2 }
  0x55   : > { %2643 = vmatpush3.bf16.msra.mxu1 %v2841_v18  ;;  %2667 = vmatpush3.bf16.msra.mxu0 %v2842_v19 }
  0x56   : > { %2648 = vmatprep.subr.bf16.mxu1 %v2981_v13  ;;  %2692 = vmatprep.subr.mxu0 %v2981_v13 }
  0x57   : > { %p2573_p1 = scmp.ne.s32.totalorder %s3624_s11, 1 }
  0xd8   : > { %v943_v6 = vpop.xlane.xlu0 %942 }
  0xd9   : > { %v945_v7 = vmul.f32 0.015625, %v943_v6 }
  0xdb   : > { %v946_v8 = vsub.f32 %v3263_v4, %v945_v7 }
  0xdd   : > { %v947_v9 = vmul.f32 %v946_v8, %v946_v8 }
  0xdf   : > { %v948_v10 = vsel %vm940_vm2, %v947_v9, 0.0 }
  0xe0   : > { %949 = vadd.xlane.f32.xlu0 %v948_v10 }
 0x169   : > { %v950_v20 = vpop.xlane.xlu0 %949 }
 0x16a   : > { %v951_v21 = vmul.f32 0.015625, %v950_v20 }
 0x16c   : > { %v952_v22 = vadd.f32 1e-05, %v951_v21 }
 0x16e   : > { %2863 = vrsqrt.f32 %v952_v22 }
 0x17b   : > { %v2864_v23 = vpop.eup %2863 }
 0x17c   : > { %v954_v25 = vmul.f32 %v2864_v23, %v946_v8 }
 0x17e   : > { %v961_v27 = vmul.f32 %v2514_v24, %v954_v25 }
 0x180   : > { %v968_v28 = vadd.f32 %v2515_v26, %v961_v27 }
 0x182   : > { %v969_v30 = vpack.c.bf16 %v968_v28, %v968_v28 }
 0x184   : > { %2645 = vmatmul.mubr.msk.bf16.vlgmr.msra.gmra.mxu1 %vm1009_vm4, %v969_v30  ;;  %2669 = vmatmul.mubr.msk.bf16.vlgmr.msra.gmra.mxu0 %vm1009_vm4, %v969_v30 }
 0x185   : > { %2649 = vmatpush3.bf16.msra.mxu1 %v2843_v29  ;;  %2656 = vmatprep.mubr.msk.bf16.mxu1 %vm2982_vm3, %v2981_v13 }
 0x186   : > { %2650 = vmatprep.subr.bf16.mxu1 %v2981_v13  ;;  %2694 = vmatprep.mubr.msk.f32.mxu0 %vm2982_vm3, %v2981_v13 }
 0x189   : > { %2651 = vmatpush3.bf16.msra.mxu1 %v2844_v31 }
 0x18a   : > { %2652 = vmatprep.subr.bf16.mxu1 %v2981_v13 }
 0x18d   : > { %2653 = vmatpush3.bf16.msra.mxu1 %v2845_v32 }
 0x18e   : > { %2654 = vmatprep.subr.bf16.mxu1 %v2981_v13 }
 0x191   : > { %2655 = vmatpush3.bf16.msra.mxu1 %v2846_v33 }
 0x192   : > { %2672 = vmatprep.subr.mxu1 %v2981_v13 }
 0x194   : > { %2657 = vmatmul.mubr.msk.bf16.vlgmr.msra.gmra.mxu1 %vm1009_vm4, %v969_v30 }
 0x195   : > { %2674 = vmatprep.mubr.msk.f32.mxu1 %vm2982_vm3, %v2981_v13 }
 0x244   : > { %v1047_v34 = vpop.f32.mrf.mxu1  ;;  %v1206_v35 = vpop.f32.mrf.mxu0 }
 0x245   : > { %v1048_v44 = vadd.f32 %v2516_v42, %v1047_v34  ;;  %v3336_v51 = vadd.f32 %v2528_v47, %v1206_v35  ;;  %v2848_v47 = vld [vmem:[%s3222_s29 + $0x10] sm:$0xff]  }
 0x246   : > { %v2646_v36 = vpop.f32.mrf.mxu1  ;;  %v2670_v37 = vpop.f32.mrf.mxu0 }
 0x247   : > { %v1053_v49 = vmul.f32 0.25, %v1048_v44 }
 0x248   : > { %v1050_v38 = vpop.f32.mrf.mxu1  ;;  %v1209_v39 = vpop.f32.mrf.mxu0 }
 0x24a   : > { %v2647_v40 = vpop.f32.mrf.mxu1  ;;  %v2671_v41 = vpop.f32.mrf.mxu0 }
 0x254   : > { %v1127_v45 = vpop.f32.mrf.mxu1 }
 0x255   : > { %v1128_v46 = vadd.f32 %v2522_v43, %v1127_v45 }
 0x256   : > { %v2658_v48 = vpop.f32.mrf.mxu1 }
 0x257   : > { %1381 = vrot.lane.b32.xlu0 %v1128_v46, %s2983_s30  ;;  %2673 = vmatpush3.xpose.msk.msra.mxu1 %vm1212_vm5, %v1128_v46  ;;  %v2849_v48 = vld [vmem:[%s3222_s29 + $0x8] sm:$0xff]  }
 0x258   : > { %v1130_v50 = vpop.f32.mrf.mxu1  ;;  %2677 = vmatprep.subr.mxu1 %v2981_v13 }
 0x25a   : > { %v2659_v52 = vpop.f32.mrf.mxu1  ;;  %2675 = vmatmul.mubr.msk.f32.vlgmr.msra.gmra.mxu1 %vm1212_vm5, %v1053_v49 }
 0x25b   : > { %1713 = vrot.lane.b32.xlu0 %v1128_v46, %s2984_s1  ;;  %2678 = vmatpush3.msk.msra.mxu1 %vm1305_vm6, %v3336_v51 }
 0x25c   : > { %2679 = vmatprep.mubr.msk.f32.mxu1 %vm2982_vm3, %v2981_v13  ;;  %2682 = vmatprep.subr.mxu1 %v2981_v13 }
 0x2c9   : > { %v1382_v63 = vpop.permute.xlu0 %1381 }
 0x2cd   : > { %v1714_v2 = vpop.permute.xlu0 %1713 }
 0x31a   : > { %v1285_v53 = vpop.f32.mrf.mxu1 }
 0x31b   : > { %v1290_v54 = vsel %vm1289_vm7, %v1285_v53, -inf }
 0x31c   : > { %1291 = vmax.xlane.f32.xlu1 %v1290_v54  ;;  %v2676_v55 = vpop.f32.mrf.mxu1 }
 0x32d   : > { %1379 = vrot.lane.b32.xlu1 %v1053_v49, %s2983_s30 }
 0x331   : > { %1547 = vrot.lane.b32.xlu1 %v1128_v46, %s2985_s3  ;;  %v2847_v46 = vld [vmem:[%s3222_s29 + $0x18] sm:$0xff]  }
 0x3a5   : > { %v1292_v56 = vpop.xlane.xlu1 %1291 }
 0x3a6   : > { %v1293_v57 = vsub.f32 %v1285_v53, %v1292_v56 }
 0x3a8   : > { %v1294_v58 = vmul.f32 1.442695, %v1293_v57 }
 0x3a9   : > { %v1380_v59 = vpop.permute.xlu1 %1379 }
 0x3aa   : > { %2865 = vpow2.f32 %v1294_v58 }
 0x3ad   : > { %v1548_v60 = vpop.permute.xlu1 %1547 }
 0x3ae   : > { %2693 = vmatpush3.xpose.msk.msra.mxu0 %vm1212_vm5, %v1548_v60 }
 0x3af   : > { %2702 = vmatprep.subr.mxu0 %v2981_v13 }
 0x3b7   : > { %v2866_v61 = vpop.eup %2865 }
 0x3b8   : > { %v1296_v62 = vsel %vm1289_vm7, %v2866_v61, 0.0 }
 0x3b9   : > { %1297 = vadd.xlane.f32.xlu1 %v1296_v62 }
 0x3ca   : > { %1545 = vrot.lane.b32.xlu1 %v1053_v49, %s2985_s3 }
 0x3ce   : > { %1711 = vrot.lane.b32.xlu1 %v1053_v49, %s2984_s1  ;;  %v2850_v49 = vld [vmem:[%s3222_s29] sm:$0xff]  }
 0x442   : > { %v1298_v0 = vpop.xlane.xlu1 %1297 }
 0x443   : > { %2867 = vrcp.f32 %v1298_v0 }
 0x446   : > { %v1546_v1 = vpop.permute.xlu1 %1545 }
 0x447   : > { %2695 = vmatmul.mubr.msk.f32.vlgmr.msra.gmra.mxu0 %vm1212_vm5, %v1546_v1 }
 0x448   : > { %2703 = vmatpush3.xpose.msk.msra.mxu0 %vm1212_vm5, %v1714_v2  ;;  %2704 = vmatprep.mubr.msk.f32.mxu0 %vm2982_vm3, %v2981_v13 }
 0x449   : > { %2712 = vmatprep.subr.bf16.mxu0 %v2981_v13 }
 0x44a   : > { %v1712_v3 = vpop.permute.xlu1 %1711 }
 0x44b   : > { %2705 = vmatmul.mubr.msk.f32.vlgmr.msra.gmra.mxu0 %vm1212_vm5, %v1712_v3 }
 0x44c   : > { %2720 = vmatprep.mubr.msk.bf16.mxu0 %vm2982_vm3, %v2981_v13  ;;  %2713 = vmatpush3.bf16.msra.mxu0 %v2847_v46 }
 0x44d   : > { %2714 = vmatprep.subr.bf16.mxu0 %v2981_v13 }
 0x450   : > { %v2868_v5 = vpop.eup %2867  ;;  %2715 = vmatpush3.bf16.msra.mxu0 %v2848_v47 }
 0x451   : > { %v1300_v6 = vmul.f32 %v2868_v5, %v2866_v61  ;;  %2716 = vmatprep.subr.bf16.mxu0 %v2981_v13 }
 0x453   : > { %2680 = vmatmul.mubr.msk.f32.vlgmr.msra.gmra.mxu1 %vm1301_vm8, %v1300_v6 }
 0x454   : > { %2683 = vmatpush3.xpose.msk.msra.mxu1 %vm1212_vm5, %v1382_v63  ;;  %2684 = vmatprep.mubr.msk.f32.mxu1 %vm2982_vm3, %v2981_v13  ;;  %v2550_v63 = vld [vmem:[%s3620_s25] ss:$0 sm:$0xff] }
 0x455   : > { %2687 = vmatprep.subr.mxu1 %v2981_v13  ;;  %2717 = vmatpush3.bf16.msra.mxu0 %v2849_v48 }
 0x456   : > { %2718 = vmatprep.subr.bf16.mxu0 %v2981_v13 }
 0x457   : > { %2685 = vmatmul.mubr.msk.f32.vlgmr.msra.gmra.mxu1 %vm1212_vm5, %v1380_v59 }
 0x458   : > { %2689 = vmatprep.mubr.msk.f32.mxu1 %vm2982_vm3, %v2981_v13 }
 0x459   : > { %2719 = vmatpush3.bf16.msra.mxu0 %v2850_v49 }
 0x45a   : > { %2736 = vmatprep.subr.bf16.mxu0 %v2981_v13 }
 0x507   : > { %v1619_v7 = vpop.f32.mrf.mxu0 }
 0x508   : > { %v1623_v8 = vsel %vm1289_vm7, %v1619_v7, -inf }
 0x509   : > { %1624 = vmax.xlane.f32.xlu1 %v1623_v8  ;;  %v2696_v9 = vpop.f32.mrf.mxu0 }
 0x50b   : > { %v1785_v10 = vpop.f32.mrf.mxu0 }
 0x50c   : > { %v1789_v18 = vsel %vm1289_vm7, %v1785_v10, -inf }
 0x50d   : > { %v2706_v11 = vpop.f32.mrf.mxu0 }
 0x513   : > { %v3370_v12 = vpop.f32.mrf.mxu1 }
 0x515   : > { %v2681_v14 = vpop.f32.mrf.mxu1 }
 0x516   : > { %v2851_v14 = vld [vmem:[%s3239_s27 + $0x18] sm:$0xff]  }
 0x517   : > { %v1453_v15 = vpop.f32.mrf.mxu1 }
 0x518   : > { %v1457_v16 = vsel %vm1289_vm7, %v1453_v15, -inf }
 0x519   : > { %1458 = vmax.xlane.f32.xlu0 %v1457_v16  ;;  %v2686_v17 = vpop.f32.mrf.mxu1  ;;  %v2854_v16 = vld [vmem:[%s3239_s27] sm:$0xff]  }
 0x51d   : > { %1790 = vmax.xlane.f32.xlu0 %v1789_v18 }
 0x592   : > { %v1625_v19 = vpop.xlane.xlu1 %1624 }
 0x593   : > { %v1626_v20 = vsub.f32 %v1619_v7, %v1625_v19 }
 0x595   : > { %v1627_v21 = vmul.f32 1.442695, %v1626_v20 }
 0x597   : > { %2869 = vpow2.f32 %v1627_v21  ;;  %v2556_v21 = vld [vmem:[%s3622_s18] ss:$0 sm:$0xff] }
 0x5a2   : > { %v1459_v22 = vpop.xlane.xlu0 %1458 }
 0x5a3   : > { %v1460_v23 = vsub.f32 %v1453_v15, %v1459_v22  ;;  %v2853_v15 = vld [vmem:[%s3239_s27 + $0x8] sm:$0xff]  }
 0x5a4   : > { %v2870_v24 = vpop.eup %2869 }
 0x5a5   : > { %v1461_v25 = vmul.f32 1.442695, %v1460_v23  ;;  %v1629_v26 = vsel %vm1289_vm7, %v2870_v24, 0.0  ;;  %v2557_v23 = vld [vmem:[%s907_s9] ss:$0 sm:$0xff] }
 0x5a6   : > { %1630 = vadd.xlane.f32.xlu0 %v1629_v26  ;;  %v1791_v27 = vpop.xlane.xlu0 %1790 }
 0x5a7   : > { %2871 = vpow2.f32 %v1461_v25  ;;  %v1792_v28 = vsub.f32 %v1785_v10, %v1791_v27  ;;  %v2855_v27 = vld [vmem:[%s3253_s13 + $0x38] sm:$0xff]  }
 0x5a9   : > { %v1793_v29 = vmul.f32 1.442695, %v1792_v28  ;;  %v2856_v28 = vld [vmem:[%s3253_s13 + $0x30] sm:$0xff]  }
 0x5ab   : > { %2873 = vpow2.f32 %v1793_v29  ;;  %v2857_v29 = vld [vmem:[%s3253_s13 + $0x28] sm:$0xff]  }
 0x5b4   : > { %v2872_v30 = vpop.eup %2871 }
 0x5b5   : > { %v1463_v31 = vsel %vm1289_vm7, %v2872_v30, 0.0 }
 0x5b6   : > { %1464 = vadd.xlane.f32.xlu0 %v1463_v31  ;;  %v2859_v31 = vld [vmem:[%s3253_s13 + $0x18] sm:$0xff]  }
 0x5b8   : > { %v2874_v32 = vpop.eup %2873 }
 0x5b9   : > { %v1795_v33 = vsel %vm1289_vm7, %v2874_v32, 0.0 }
 0x5ba   : > { %1796 = vadd.xlane.f32.xlu1 %v1795_v33  ;;  %v2861_v33 = vld [vmem:[%s3253_s13 + $0x8] sm:$0xff]  }
 0x5cb   : > { %1634 = vrot.lane.b32.xlu1 %v3336_v51, %s2985_s3 }
 0x5cc   : > { %1468 = vrot.lane.b32.xlu0 %v3336_v51, %s2983_s30  ;;  %s3625_s30 = sld [smem:[#allocation33_spill]] (!%p2573_p1) }
 0x5cf   : > { %1800 = vrot.lane.b32.xlu1 %v3336_v51, %s2984_s1 }
 0x62f   : > { %v1631_v34 = vpop.xlane.xlu0 %1630 }
 0x63f   : > { %v1465_v35 = vpop.xlane.xlu0 %1464 }
 0x640   : > { %2875 = vrcp.f32 %v1465_v35  ;;  %v2558_v35 = vld [vmem:[%s915_s21] ss:$0 sm:$0xff] }
 0x641   : > { %2877 = vrcp.f32 %v1631_v34  ;;  %v2862_v34 = vld [vmem:[%s3253_s13] sm:$0xff]  }
 0x643   : > { %v1797_v36 = vpop.xlane.xlu1 %1796  ;;  %v1469_v37 = vpop.permute.xlu0 %1468 }
 0x644   : > { %2688 = vmatpush3.msk.msra.mxu1 %vm1305_vm6, %v1469_v37  ;;  %2879 = vrcp.f32 %v1797_v36 }
 0x645   : > { %2697 = vmatprep.subr.mxu1 %v2981_v13 }
 0x647   : > { %v1635_v39 = vpop.permute.xlu1 %1634 }
 0x64b   : > { %v1801_v44 = vpop.permute.xlu1 %1800 }
 0x64d   : > { %v2876_v38 = vpop.eup %2875 }
 0x64e   : > { %v1467_v40 = vmul.f32 %v2876_v38, %v2872_v30  ;;  %v2878_v41 = vpop.eup %2877  ;;  %v2858_v30 = vld [vmem:[%s3253_s13 + $0x20] sm:$0xff]  }
 0x64f   : > { %v1633_v42 = vmul.f32 %v2878_v41, %v2870_v24 }
 0x650   : > { %2690 = vmatmul.mubr.msk.f32.vlgmr.msra.gmra.mxu1 %vm1301_vm8, %v1467_v40 }
 0x651   : > { %2698 = vmatpush3.msk.msra.mxu1 %vm1305_vm6, %v1635_v39  ;;  %2699 = vmatprep.mubr.msk.f32.mxu1 %vm2982_vm3, %v2981_v13  ;;  %v2880_v43 = vpop.eup %2879 }
 0x652   : > { %2707 = vmatprep.subr.mxu1 %v2981_v13  ;;  %v1799_v45 = vmul.f32 %v2880_v43, %v2874_v32  ;;  %v2860_v32 = vld [vmem:[%s3253_s13 + $0x10] sm:$0xff]  }
 0x654   : > { %2700 = vmatmul.mubr.msk.f32.vlgmr.msra.gmra.mxu1 %vm1301_vm8, %v1633_v42 }
 0x655   : > { %2708 = vmatpush3.msk.msra.mxu1 %vm1305_vm6, %v1801_v44  ;;  %2709 = vmatprep.mubr.msk.f32.mxu1 %vm2982_vm3, %v2981_v13 }
 0x656   : > { %2724 = vmatprep.subr.bf16.mxu1 %v2981_v13 }
 0x658   : > { %2710 = vmatmul.mubr.msk.f32.vlgmr.msra.gmra.mxu1 %vm1301_vm8, %v1799_v45 }
 0x659   : > { %2732 = vmatprep.mubr.msk.bf16.mxu1 %vm2982_vm3, %v2981_v13  ;;  %2725 = vmatpush3.bf16.msra.mxu1 %v2851_v14 }
 0x65a   : > { %2726 = vmatprep.subr.bf16.mxu1 %v2981_v13 }
 0x710   : > { %v1541_v50 = vpop.f32.mrf.mxu1 }
 0x711   : > { %1878 = vrot.lane.b32.xlu1 %v1541_v50, %s2986_s17  ;;  %v2564_v50 = vld [vmem:[%s923_s12] ss:$0 sm:$0xff]  ;;  %s3626_s17 = sld [smem:[#allocation34_spill]] (!%p2573_p1) }
 0x712   : > { %v2691_v51 = vpop.f32.mrf.mxu1 }
 0x714   : > { %v1707_v52 = vpop.f32.mrf.mxu1 }
 0x715   : > { %1882 = vrot.lane.b32.xlu0 %v1707_v52, %s2987_s24 }
 0x716   : > { %v2701_v53 = vpop.f32.mrf.mxu1 }
 0x718   : > { %v1873_v54 = vpop.f32.mrf.mxu1 }
 0x719   : > { %1886 = vrot.lane.b32.xlu1 %v1873_v54, %s2988_s26 }
 0x71a   : > { %v2711_v55 = vpop.f32.mrf.mxu1 }
 0x783   : > { %v1879_v56 = vpop.permute.xlu1 %1878 }
 0x784   : > { %v1889_v58 = vsel %vm1212_vm5, %v3370_v12, %v1879_v56 }
 0x787   : > { %v1883_v57 = vpop.permute.xlu0 %1882 }
 0x788   : > { %v1891_v59 = vsel %vm1890_vm9, %v1889_v58, %v1883_v57 }
 0x78b   : > { %v1887_v60 = vpop.permute.xlu1 %1886 }
 0x78c   : > { %v1893_v61 = vsel %vm1892_vm10, %v1891_v59, %v1887_v60 }
 0x78d   : > { %v1894_v62 = vpack.c.bf16 %v1893_v61, %v1893_v61 }
 0x78f   : > { %2721 = vmatmul.mubr.msk.bf16.vlgmr.msra.gmra.mxu0 %vm1009_vm4, %v1894_v62 }
 0x790   : > { %2752 = vmatprep.mubr.msk.bf16.mxu0 %vm2982_vm3, %v2981_v13  ;;  %2737 = vmatpush3.bf16.msra.mxu0 %v2855_v27 }
 0x791   : > { %2738 = vmatprep.subr.bf16.mxu0 %v2981_v13 }
 0x794   : > { %2739 = vmatpush3.bf16.msra.mxu0 %v2856_v28 }
 0x795   : > { %2740 = vmatprep.subr.bf16.mxu0 %v2981_v13 }
 0x798   : > { %2741 = vmatpush3.bf16.msra.mxu0 %v2857_v29 }
 0x799   : > { %2742 = vmatprep.subr.bf16.mxu0 %v2981_v13 }
 0x79c   : > { %2743 = vmatpush3.bf16.msra.mxu0 %v2858_v30 }
 0x79d   : > { %2744 = vmatprep.subr.bf16.mxu0 %v2981_v13 }
 0x7a0   : > { %2745 = vmatpush3.bf16.msra.mxu0 %v2859_v31 }
 0x7a1   : > { %2746 = vmatprep.subr.bf16.mxu0 %v2981_v13 }
 0x7a4   : > { %2747 = vmatpush3.bf16.msra.mxu0 %v2860_v32 }
 0x7a5   : > { %2748 = vmatprep.subr.bf16.mxu0 %v2981_v13 }
 0x7a8   : > { %2749 = vmatpush3.bf16.msra.mxu0 %v2861_v33 }
 0x7a9   : > { %2750 = vmatprep.subr.bf16.mxu0 %v2981_v13 }
 0x7ac   : > { %2751 = vmatpush3.bf16.msra.mxu0 %v2862_v34 }
 0x84f   : > { %v1971_v0 = vpop.f32.mrf.mxu0 }
 0x850   : > { %v1972_v1 = vadd.f32 %v2550_v63, %v1971_v0 }
 0x851   : > { %v2722_v2 = vpop.f32.mrf.mxu0 }
 0x852   : > { %v3417_v3 = vadd.f32 %v1972_v1, %v3263_v4  ;;  %v2852_v4 = vld [vmem:[%s3239_s27 + $0x10] sm:$0xff]  }
 0x853   : > { %v1974_v5 = vpop.f32.mrf.mxu0  ;;  %2727 = vmatpush3.bf16.msra.mxu1 %v2852_v4 }
 0x854   : > { %v1980_v6 = vsel %vm940_vm2, %v3417_v3, 0.0  ;;  %2728 = vmatprep.subr.bf16.mxu1 %v2981_v13 }
 0x855   : > { %1981 = vadd.xlane.f32.xlu0 %v1980_v6  ;;  %v2723_v7 = vpop.f32.mrf.mxu0 }
 0x857   : > { %2729 = vmatpush3.bf16.msra.mxu1 %v2853_v15 }
 0x858   : > { %2730 = vmatprep.subr.bf16.mxu1 %v2981_v13 }
 0x85b   : > { %2731 = vmatpush3.bf16.msra.mxu1 %v2854_v16 }
 0x8de   : > { %v1982_v8 = vpop.xlane.xlu0 %1981 }
 0x8df   : > { %v1983_v9 = vmul.f32 0.015625, %v1982_v8 }
 0x8e1   : > { %v1984_v10 = vsub.f32 %v3417_v3, %v1983_v9 }
 0x8e3   : > { %v1985_v11 = vmul.f32 %v1984_v10, %v1984_v10 }
 0x8e5   : > { %v1986_v12 = vsel %vm940_vm2, %v1985_v11, 0.0 }
 0x8e6   : > { %1987 = vadd.xlane.f32.xlu1 %v1986_v12 }
 0x96f   : > { %v1988_v17 = vpop.xlane.xlu1 %1987 }
 0x970   : > { %v1989_v18 = vmul.f32 0.015625, %v1988_v17 }
 0x972   : > { %v1990_v19 = vadd.f32 1e-05, %v1989_v18 }
 0x974   : > { %2881 = vrsqrt.f32 %v1990_v19 }
 0x981   : > { %v2882_v20 = vpop.eup %2881 }
 0x982   : > { %v1992_v22 = vmul.f32 %v2882_v20, %v1984_v10 }
 0x984   : > { %v1999_v24 = vmul.f32 %v2556_v21, %v1992_v22 }
 0x986   : > { %v2006_v25 = vadd.f32 %v2557_v23, %v1999_v24 }
 0x988   : > { %v2007_v26 = vpack.c.bf16 %v2006_v25, %v2006_v25 }
 0x98a   : > { %2733 = vmatmul.mubr.msk.bf16.vlgmr.msra.gmra.mxu1 %vm1009_vm4, %v2007_v26 }
 0xa4a   : > { %v2084_v36 = vpop.f32.mrf.mxu1 }
 0xa4b   : > { %v2085_v37 = vadd.f32 %v2558_v35, %v2084_v36 }
 0xa4c   : > { %v2734_v38 = vpop.f32.mrf.mxu1 }
 0xa4d   : > { %v2090_v39 = vmul.f32 %v2085_v37, %v2085_v37 }
 0xa4e   : > { %v2087_v40 = vpop.f32.mrf.mxu1 }
 0xa4f   : > { %v2091_v41 = vmul.f32 %v2090_v39, %v2085_v37 }
 0xa50   : > { %v2735_v42 = vpop.f32.mrf.mxu1 }
 0xa51   : > { %v2092_v43 = vmul.f32 0.044715, %v2091_v41 }
 0xa53   : > { %v2093_v44 = vadd.f32 %v2092_v43, %v2085_v37 }
 0xa55   : > { %v2094_v45 = vmul.f32 0.7978846, %v2093_v44 }
 0xa57   : > { %2883 = vtanh.f32 %v2094_v45 }
 0xa64   : > { %v2884_v46 = vpop.eup %2883 }
 0xa65   : > { %v2096_v13 = vadd.f32 1.0, %v2884_v46 }
 0xa67   : > { %v2097_v47 = vmul.f32 0.5, %v2096_v13 }
 0xa69   : > { %v2098_v48 = vmul.f32 %v2097_v47, %v2085_v37 }
 0xa6b   : > { %v2099_v49 = vpack.c.bf16 %v2098_v48, %v2098_v48 }
 0xa6d   : > { %2753 = vmatmul.mubr.bf16.vlgmr.msra.gmra.mxu0 %v2099_v49 }
 0xb2d   : > { %v2205_v51 = vpop.f32.mrf.mxu0 }
 0xb2e   : > { %v2206_v52 = vadd.f32 %v2564_v50, %v2205_v51 }
 0xb2f   : > { %v2754_v53 = vpop.f32.mrf.mxu0  ;;  %2216 = sbr.rel (%p2573_p1) target bundleno = 3177 (0xc69), region = 112 }
 0xb30   : > { %v2211_v54 = vadd.f32 %v2206_v52, %v3417_v3 }
 0xb31   : > { %v2208_v55 = vpop.f32.mrf.mxu0 }
 0xb32   : > { %2212 = vst.msk [vmem:[#allocation2] sm:$0x3f] %vm940_vm2, %v2211_v54 }
 0xb33   : > { %v2755_v56 = vpop.f32.mrf.mxu0 }
 0xb34   : > { %v2219_v57 = vsel %vm940_vm2, %v2211_v54, 0.0  ;;  %v2574_v3 = vld [vmem:[%s3625_s30] ss:$0 sm:$0xff]  ;;  %vm2246_vm11 = vcmask 519168  }
 0xb35   : > { %2220 = vadd.xlane.f32.xlu0 %v2219_v57  ;;  %v2575_v6 = vld [vmem:[%s3626_s17] ss:$0 sm:$0xff] }
 0xbbe   : > { %v2221_v58 = vpop.xlane.xlu0 %2220 }
 0xbbf   : > { %v2222_v59 = vmul.f32 0.015625, %v2221_v58 }
 0xbc1   : > { %v2223_v60 = vsub.f32 %v2211_v54, %v2222_v59 }
 0xbc3   : > { %v2224_v61 = vmul.f32 %v2223_v60, %v2223_v60 }
 0xbc5   : > { %v2225_v62 = vsel %vm940_vm2, %v2224_v61, 0.0 }
 0xbc6   : > { %2226 = vadd.xlane.f32.xlu0 %v2225_v62 }
 0xc4f   : > { %v2227_v63 = vpop.xlane.xlu0 %2226 }
 0xc50   : > { %v2228_v0 = vmul.f32 0.015625, %v2227_v63 }
 0xc52   : > { %v2229_v1 = vadd.f32 1e-05, %v2228_v0 }
 0xc54   : > { %2885 = vrsqrt.f32 %v2229_v1 }
 0xc61   : > { %v2886_v2 = vpop.eup %2885 }
 0xc62   : > { %v2231_v5 = vmul.f32 %v2886_v2, %v2223_v60 }
 0xc64   : > { %v2238_v7 = vmul.f32 %v2574_v3, %v2231_v5 }
 0xc66   : > { %v2245_v8 = vadd.f32 %v2575_v6, %v2238_v7 }
 0xc68   : > { %2247 = vst.msk [vmem:[%s859_s20] sm:$0xf] %vm2246_vm11, %v2245_v8 }
 0xc69 PF: > { %s3627_s24 = sld [smem:[#allocation10_spill]]  ;;  %s2262_s19 = sshll.u32 %s859_s20, 4  ;;  %s2263_s19 = int_to_ptr.vmem [resolvable:$true] %s2262_s19 }
 0xc6a   : > { %s3628_s26 = sld [smem:[#allocation7_spill]]  ;;  %s2887_s4 = scalar_lea.vmem %s2263_s19, 64 }
 0xc6b   : > { %s3630_s23 = sld [smem:[#allocation35_spill]]  ;;  %p2888_p2 = scmp.ne.s32.totalorder %s2263_s19, %s2887_s4 }
 0xc6c   : > { %s2989_s9 = smov [#allocation3]  }
 0xc6d   : > { %p2889_p4 = pnand %p2888_p2, %p3149_p3  ;;  %s2891_s27 = sshll.u32 %s2989_s9, 4  ;;  %s2892_s27 = int_to_ptr.vmem [resolvable:$false] %s2891_s27 }
 0xc6e   : > { %s2893_s13 = scalar_lea.vmem %s2892_s27, 128  ;;  %p2894_p6 = scmp.lt.s32.totalorder %s2263_s19, %s2892_s27 }
 0xc6f   : > { %s2577_s5 = sshll.u32 %s3627_s24, 6  ;;  %p2890_p5 = pneg %p2889_p4 }
 0xc70   : > { %s3631_s18 = sand.u32 1, %s3628_s26   ;;  %p2895_p7 = scmp.lt.s32.totalorder %s2893_s13, %s2887_s4 }
 0xc71   : > { %s2260_s8 = scalar_lea.hbm %s3630_s23, %s2577_s5  ;;  %s2249_s22 = scalar_lea.sflag [#allocation4], %s3631_s18 }
 0xc72   : > { %p2896_p8 = por %p2895_p7, %p2894_p6 }
 0xc74   : > { %p2897_p10 = pnand %p2896_p8, %p2890_p5 }
 0xc76   : > { %2900 = shalt.err (!%p2897_p10)
}
 0xc77   : > { %s2901_s21 = scalar_lea.hbm %s2260_s8, 64  ;;  %s2905_s7 = scalar_lea.hbm %s3630_s23, 128 }
 0xc78   : > { %p2902_p11 = scmp.ne.s32.totalorder %s2260_s8, %s2901_s21  ;;  %p2906_p0 = scmp.lt.s32.totalorder %s2260_s8, %s3630_s23 }
 0xc79   : > { %p2907_p1 = scmp.lt.s32.totalorder %s2905_s7, %s2901_s21 }
 0xc7a   : > { %p2903_p12 = pnand %p2902_p11, %p3149_p3 }
 0xc7b   : > { %p2908_p2 = por %p2907_p1, %p2906_p0 }
 0xc7c   : > { %p2904_p13 = pneg %p2903_p12 }
 0xc7e   : > { %p2909_p4 = pnand %p2908_p2, %p2904_p13 }
 0xc80   : > { %2912 = shalt.err (!%p2909_p4)
}
 0xc81   : > { %2756 = dma.vmem_to_hbm [thread:$0]  (%p3149_p3), %s2263_s19, 64, %s2260_s8, %s2249_s22  }
 0xc82 PF: > { %s3632_s2 = sld [smem:[#allocation13_spill]] }
 0xc83   : > { %s3633_s30 = sld [smem:[#allocation6_spill]] }
 0xc88   : > { %p2762_p5 = scmp.ge.s32.totalorder %s3632_s2, 2 }
 0xc89   : > { %s2274_s3 = sand.u32 1, %s3633_s30  }
 0xc8a   : > { %p2759_p6 = pnand %p2762_p5, %p3159_p9  ;;  %s2275_s17 = scalar_lea.sflag [#allocation4], %s2274_s3 }
 0xc8c   : > { %p2760_p7 = pneg %p2759_p6 }
 0xc8e   : > { %2946 = dma.done.wait (%p2760_p7), %s2275_s17, 64  }
 0xc8f   : > { %2948 = vsyncadd (%p2760_p7), %s2275_s17, 4294967232  ;;  %s34_s0 = sadd.s32 1, %s3632_s2   ;;  %s3635_s2 = sld [smem:[#allocation7_spill]] }
 0xc90   : > { %p31_p8 = scmp.ge.s32.totalorder %s34_s0, 6   ;;  %s3636_s25 = sld [smem:[#allocation8_spill]] }
 0xc91   : > { %s3637_s26 = sld [smem:[#allocation18_spill]] }
 0xc92   : > { %s3638_s27 = sld [smem:[#allocation11_spill]]  ;;  %33 = sbr.rel (!%p31_p8) target bundleno = 23 (0x17), region = 195 }
 0xc93   : > { %s3639_s3 = sld [smem:[#allocation12_spill]] }
 0xc94   : > { %s3640_s28 = sld [smem:[#allocation14_spill]] }
 0xc95   : > { %s3641_s29 = sld [smem:[#allocation16_spill]] }
 0xc97   :  { %2280 = vsyncpa [#allocation4], 1 }
 0xc98   :  { %2282 = vsyncpa [#allocation4 + $0x1], 1 }

</bundles_post_ra>
